<compile_context>
chip_gen: v5e
topology: v5e:2x2
jax: 0.10.0
libtpu: 0.0.40
codegen_flags: <defaults>
</compile_context>

<pallas_src>
import functools
import math

import jax
import jax.numpy as jnp
from jax.experimental import pallas as pl
from jax.experimental.pallas import tpu as pltpu

EPS = 1e-12                      # LayerNorm variance_epsilon (added to std)
NEG_INF = -1e10                  # masked_fill value used by SelfAttention
MXU_DTYPE = jnp.bfloat16         # MXU operand dtype (f32 accumulation everywhere)


def _device_tuning():
    """Per-generation (scoped VMEM limit, row-tile target)."""
    try:
        kind = jax.devices()[0].device_kind.lower()
    except Exception:
        return 32 * 1024 * 1024, 512
    if "v7" in kind:
        # v7x: only 64 MiB VMEM per TensorCore -> keep headroom, smaller tiles.
        return 48 * 1024 * 1024, 512
    if any(t in kind for t in ("v4", "v5", "v6")):
        # 128 MiB VMEM parts: use it (bigger row tiles amortize grid overhead).
        return 100 * 1024 * 1024, 1024
    return 32 * 1024 * 1024, 512


VMEM_LIMIT, ROW_TILE_TARGET = _device_tuning()


def _cparams(n_parallel_axes):
    return pltpu.CompilerParams(
        dimension_semantics=("parallel",) * n_parallel_axes,
        vmem_limit_bytes=VMEM_LIMIT)


def _row_tile(m):
    return m if m <= ROW_TILE_TARGET else ROW_TILE_TARGET


def _pad_rows(x2d, tm):
    """Pad the row axis up to a multiple of the tile (never a full-M fallback)."""
    m = x2d.shape[0]
    mp = ((m + tm - 1) // tm) * tm
    if mp != m:
        x2d = jnp.pad(x2d, ((0, mp - m), (0, 0)))
    return x2d, m, mp


# ------------------------- in-kernel shared helpers -------------------------

def _layernorm(t, gamma, beta, hid):
    # torch-style LayerNorm: unbiased std (N-1), eps added to std.
    mean = jnp.mean(t, axis=-1, keepdims=True)
    diff = t - mean
    var = jnp.sum(diff * diff, axis=-1, keepdims=True) * (1.0 / (hid - 1))
    # column reciprocal + broadcast multiply instead of a broadcast divide
    inv = pl.reciprocal(jnp.sqrt(var) + EPS)
    return (diff * inv) * gamma + beta


def _mha_core(q, k, v, mask, wo, n_heads):
    """Batched-head attention + single fused output projection.

    q: (Sq, H) f32, already scaled by 1/sqrt(d).  k, v: (Sk, H) f32.
    mask: (Sq, 1) per-query or (1, Sk) per-key, 1 = keep / 0 = mask.
    wo:   (H, H) bf16 (already transposed).
    """
    Sq, H = q.shape
    Sk = k.shape[0]
    d = H // n_heads
    qh = jnp.transpose(q.astype(MXU_DTYPE).reshape(Sq, n_heads, d), (1, 0, 2))
    kh = jnp.transpose(k.astype(MXU_DTYPE).reshape(Sk, n_heads, d), (1, 0, 2))
    vh = jnp.transpose(v.astype(MXU_DTYPE).reshape(Sk, n_heads, d), (1, 0, 2))
    # (n_heads, Sq, Sk) scores, one batched contraction
    s = jnp.einsum('hqd,hkd->hqk', qh, kh, preferred_element_type=jnp.float32)
    # exact masked_fill semantics: applied once on the batched scores
    s = jnp.where(mask == 0.0, NEG_INF, s)
    s = s - jnp.max(s, axis=-1, keepdims=True)
    p = jnp.exp(s)
    p = p * pl.reciprocal(jnp.sum(p, axis=-1, keepdims=True), approx=True)
    ctx = jnp.einsum('hqk,hkd->hqd', p.astype(MXU_DTYPE), vh,
                     preferred_element_type=jnp.float32)
    ctx = jnp.transpose(ctx, (1, 0, 2)).reshape(Sq, H)      # concat heads
    # single (Sq,H) @ (H,H) output projection (full-K MXU pass)
    return jnp.dot(ctx.astype(MXU_DTYPE), wo, preferred_element_type=jnp.float32)


# ----------------------------- Pallas kernels -------------------------------

def _proj_kernel(x_ref, wt_ref, b_ref, o_ref):
    # y = x @ Wt + b over one row tile (used for the `ft` input projection).
    o_ref[...] = (jnp.dot(x_ref[...].astype(MXU_DTYPE), wt_ref[...],
                          preferred_element_type=jnp.float32) + b_ref[...]
                  ).astype(o_ref.dtype)


def project(x2d, wt, b):
    m0, K = x2d.shape
    N = wt.shape[1]
    tm = _row_tile(m0)
    xp, m0, mp = _pad_rows(x2d, tm)
    # TODO(synk): mark the grid-invariant weight/bias blocks with
    # pipeline_mode=pl.Buffered(1) once single-buffered invariant operands are
    # supported end-to-end, to reclaim the wasted double-buffer VMEM.
    out = pl.pallas_call(
        _proj_kernel,
        grid=(mp // tm,),
        in_specs=[pl.BlockSpec((tm, K), lambda i: (i, 0)),
                  pl.BlockSpec((K, N), lambda i: (0, 0)),      # grid-invariant
                  pl.BlockSpec((1, N), lambda i: (0, 0))],
        out_specs=pl.BlockSpec((tm, N), lambda i: (i, 0)),
        out_shape=jax.ShapeDtypeStruct((mp, N), jnp.float32),
        compiler_params=_cparams(1),
    )(xp, wt, b)
    return out[:m0] if mp != m0 else out


def _self_attn_ln_kernel(x_ref, qm_ref, wqkv_ref, bqkv_ref, wo_ref, bo_ref,
                         g_ref, beta_ref, o_ref, *, n_heads):
    # Per-batch block: fused QKV projection + batched-head self-attention +
    # output projection + residual add + LayerNorm.
    Sq, H = x_ref.shape
    d = H // n_heads
    x = x_ref[...]                                            # (Sq, H) f32
    qkv = jnp.dot(x.astype(MXU_DTYPE), wqkv_ref[...],
                  preferred_element_type=jnp.float32) + bqkv_ref[...]
    q = qkv[:, :H] * (1.0 / math.sqrt(d))                     # fold 1/sqrt(d) into q
    attn = _mha_core(q, qkv[:, H:2 * H], qkv[:, 2 * H:], qm_ref[...],
                     wo_ref[...], n_heads)
    t = x + attn + bo_ref[...]
    o_ref[...] = _layernorm(t, g_ref[...], beta_ref[...], H)
    # TODO(synk): for long sequences (esp. v7x's 64 MiB VMEM), tile the query
    # axis and accumulate over key tiles with an online softmax instead of the
    # full (heads, Sq, Sk) score tile per batch block.


def self_attn_ln(x, qmask, wqkv_t, bqkv, wo_t, bo, gamma, beta, n_heads):
    B, Sq, H = x.shape
    per_b = lambda s, w: pl.BlockSpec((pl.Squeezed(), s, w), lambda b: (b, 0, 0))
    inv = lambda shp: pl.BlockSpec(shp, lambda b: (0, 0))
    return pl.pallas_call(
        functools.partial(_self_attn_ln_kernel, n_heads=n_heads),
        grid=(B,),
        in_specs=[per_b(Sq, H), per_b(Sq, 1),
                  inv((H, 3 * H)), inv((1, 3 * H)),
                  inv((H, H)), inv((1, H)), inv((1, H)), inv((1, H))],
        out_specs=per_b(Sq, H),
        out_shape=jax.ShapeDtypeStruct((B, Sq, H), jnp.float32),
        compiler_params=_cparams(1),
    )(x, qmask, wqkv_t, bqkv, wo_t, bo, gamma, beta)


def _cross_attn_ln_kernel(x_ref, src_ref, km_ref, wq_ref, bq_ref, wkv_ref,
                          bkv_ref, wo_ref, bo_ref, g_ref, beta_ref, o_ref,
                          *, n_heads):
    # Per-batch block: fused Q projection (from x) + KV projection (from src) +
    # batched-head cross-attention + output projection + residual add + LN.
    Sq, H = x_ref.shape
    d = H // n_heads
    x = x_ref[...]                                            # (Sq, H) f32
    q = (jnp.dot(x.astype(MXU_DTYPE), wq_ref[...],
                 preferred_element_type=jnp.float32) + bq_ref[...]) \
        * (1.0 / math.sqrt(d))
    kv = jnp.dot(src_ref[...].astype(MXU_DTYPE), wkv_ref[...],
                 preferred_element_type=jnp.float32) + bkv_ref[...]
    attn = _mha_core(q, kv[:, :H], kv[:, H:], km_ref[...], wo_ref[...], n_heads)
    t = x + attn + bo_ref[...]
    o_ref[...] = _layernorm(t, g_ref[...], beta_ref[...], H)


def cross_attn_ln(x, src, kmask, wq_t, bq, wkv_t, bkv, wo_t, bo, gamma, beta,
                  n_heads):
    B, Sq, H = x.shape
    Sk = src.shape[1]
    per_b = lambda s, w: pl.BlockSpec((pl.Squeezed(), s, w), lambda b: (b, 0, 0))
    inv = lambda shp: pl.BlockSpec(shp, lambda b: (0, 0))
    return pl.pallas_call(
        functools.partial(_cross_attn_ln_kernel, n_heads=n_heads),
        grid=(B,),
        in_specs=[per_b(Sq, H), per_b(Sk, H), per_b(1, Sk),
                  inv((H, H)), inv((1, H)),
                  inv((H, 2 * H)), inv((1, 2 * H)),
                  inv((H, H)), inv((1, H)), inv((1, H)), inv((1, H))],
        out_specs=per_b(Sq, H),
        out_shape=jax.ShapeDtypeStruct((B, Sq, H), jnp.float32),
        compiler_params=_cparams(1),
    )(x, src, kmask, wq_t, bq, wkv_t, bkv, wo_t, bo, gamma, beta)


def _ffn_ln_kernel(x_ref, w1_ref, b1_ref, w2_ref, b2_ref, g_ref, beta_ref, o_ref):
    # PositionwiseFeedforward (Conv1d k=1 -> ReLU -> Conv1d k=1) fused with the
    # residual add + LayerNorm of the sub-layer, over one row tile of B*S.
    x = x_ref[...]                                            # (tile, H) f32
    H = x.shape[-1]
    h = jnp.maximum(jnp.dot(x.astype(MXU_DTYPE), w1_ref[...],
                            preferred_element_type=jnp.float32) + b1_ref[...], 0.0)
    y = jnp.dot(h.astype(MXU_DTYPE), w2_ref[...],
                preferred_element_type=jnp.float32) + b2_ref[...]
    o_ref[...] = _layernorm(x + y, g_ref[...], beta_ref[...], H)


def ffn_ln(x, w1_t, b1, w2_t, b2, gamma, beta):
    B, S, H = x.shape
    PF = w1_t.shape[1]
    M = B * S
    tm = _row_tile(M)
    xp, M, Mp = _pad_rows(x.reshape(M, H), tm)
    out = pl.pallas_call(
        _ffn_ln_kernel,
        grid=(Mp // tm,),
        in_specs=[pl.BlockSpec((tm, H), lambda i: (i, 0)),
                  pl.BlockSpec((H, PF), lambda i: (0, 0)),
                  pl.BlockSpec((1, PF), lambda i: (0, 0)),
                  pl.BlockSpec((PF, H), lambda i: (0, 0)),
                  pl.BlockSpec((1, H), lambda i: (0, 0)),
                  pl.BlockSpec((1, H), lambda i: (0, 0)),
                  pl.BlockSpec((1, H), lambda i: (0, 0))],
        out_specs=pl.BlockSpec((tm, H), lambda i: (i, 0)),
        out_shape=jax.ShapeDtypeStruct((Mp, H), jnp.float32),
        compiler_params=_cparams(1),
    )(xp, w1_t, b1, w2_t, b2, gamma, beta)
    out = out[:M] if Mp != M else out
    return out.reshape(B, S, H)


def _pool_head_kernel(x_ref, m_ref, w1, b1, w2, b2, w3, b3, w4, b4, o_ref):
    # Per-batch block: masked mean over the sequence axis fused with the
    # 4-layer MLP head (Linear 256 -> ReLU -> 64 -> ReLU -> 32 -> ReLU -> 1).
    x = x_ref[...]                                     # (S, H) f32
    m = m_ref[...]                                     # (S, 1) f32
    num = jnp.sum(x * m, axis=0, keepdims=True)        # (1, H)
    den = jnp.sum(m, axis=0, keepdims=True)            # (1, 1)
    h = num / den          # same div-by-zero behavior as the torch module
    for wt_, bt_ in ((w1, b1), (w2, b2), (w3, b3)):
        h = jnp.maximum(jnp.dot(h.astype(MXU_DTYPE), wt_[...],
                                preferred_element_type=jnp.float32) + bt_[...], 0.0)
    o_ref[...] = jnp.dot(h.astype(MXU_DTYPE), w4[...],
                         preferred_element_type=jnp.float32) + b4[...]


def pool_head(x, qmask, head_params):
    B, S, H = x.shape
    (w1, b1), (w2, b2), (w3, b3), (w4, b4) = head_params
    per_b = lambda s, w: pl.BlockSpec((pl.Squeezed(), s, w), lambda b: (b, 0, 0))
    inv = lambda a: pl.BlockSpec(a.shape, lambda b: (0, 0))
    return pl.pallas_call(
        _pool_head_kernel,
        grid=(B,),
        in_specs=[per_b(S, H), per_b(S, 1),
                  inv(w1), inv(b1), inv(w2), inv(b2),
                  inv(w3), inv(b3), inv(w4), inv(b4)],
        out_specs=pl.BlockSpec((pl.Squeezed(), 1, 1), lambda b: (b, 0, 0)),
        out_shape=jax.ShapeDtypeStruct((B, 1, 1), jnp.float32),
        compiler_params=_cparams(1),
    )(x, qmask, w1, b1, w2, b2, w3, b3, w4, b4)


# ----------------------------- Model wrapper --------------------------------

def decoder_forward(params, trg, src, trg_mask, cross_attn_mask, *, n_heads):
    B, St, H = trg.shape
    Ss = src.shape[1]

    # Masks stay 1-D per query / per key (no O(S^2) broadcast in HBM).
    # trg_mask: (B,1,St,1) per-query; cross_attn_mask: (B,1,1,Ss) per-key.
    if trg_mask is None:
        qmask = jnp.ones((B, St, 1), jnp.float32)      # also used for pooling
    else:
        qmask = trg_mask[:, 0].astype(jnp.float32)     # (B, St, 1)
    if cross_attn_mask is None:
        kmask = jnp.ones((B, 1, Ss), jnp.float32)
    else:
        kmask = cross_attn_mask[:, 0].astype(jnp.float32)   # (B, 1, Ss)

    # src is only ever an MXU operand -> cast to bf16 once (halves HBM reads).
    src_bf = src.astype(MXU_DTYPE)

    # trg = self.ft(trg); dropout layers are identity at inference time.
    x = project(trg.reshape(B * St, H), params["ft_wt"], params["ft_b"])
    x = x.reshape(B, St, H)

    for lp in params["layers"]:
        # self-attention sub-layer: QKV proj + attention + out-proj + add + LN
        x = self_attn_ln(x, qmask, lp["sa_wqkv_t"], lp["sa_bqkv"],
                         lp["sa_wo_t"], lp["sa_bo"], lp["ln1_g"], lp["ln1_b"],
                         n_heads)
        # cross-attention sub-layer: Q/KV proj + attention + out-proj + add + LN
        x = cross_attn_ln(x, src_bf, kmask, lp["ea_wq_t"], lp["ea_bq"],
                          lp["ea_wkv_t"], lp["ea_bkv"], lp["ea_wo_t"],
                          lp["ea_bo"], lp["ln2_g"], lp["ln2_b"], n_heads)
        # positionwise feed-forward sub-layer: FFN + add + LN
        x = ffn_ln(x, lp["fc1_wt"], lp["fc1_b"], lp["fc2_wt"], lp["fc2_b"],
                   lp["ln3_g"], lp["ln3_b"])

    label = pool_head(x, qmask, params["head"])        # (B, 1, 1)
    return jnp.squeeze(label)                          # matches torch.squeeze


# --------------------------- Parameter handling ------------------------------

def init_params(key, hid, pf, n_layers, n_heads):
    """Raw parameters in PyTorch layout: Linear/Conv1d(k=1) weights are (out, in)."""
    keys = jax.random.split(key, 2 + n_layers * 20 + 8)
    ki = iter(keys)

    def lin(out_d, in_d):
        w = jax.random.normal(next(ki), (out_d, in_d), jnp.float32) * 0.05
        b = jax.random.normal(next(ki), (out_d,), jnp.float32) * 0.05
        return w, b

    params = {}
    params["ft_w"], params["ft_b"] = lin(hid, hid)
    layers = []
    for _ in range(n_layers):
        lp = {}
        for name in ("sa", "ea"):
            wq, bq = lin(hid, hid)
            wk, bk = lin(hid, hid)
            wv, bv = lin(hid, hid)
            wo, bo = lin(hid, hid)
            lp[name] = dict(wq=wq, bq=bq, wk=wk, bk=bk, wv=wv, bv=bv, wo=wo, bo=bo)
        lp["fc1_w"], lp["fc1_b"] = lin(pf, hid)
        lp["fc2_w"], lp["fc2_b"] = lin(hid, pf)
        for i in (1, 2, 3):
            lp[f"ln{i}_g"] = jnp.ones((hid,), jnp.float32)
            lp[f"ln{i}_b"] = jnp.zeros((hid,), jnp.float32)
        layers.append(lp)
    params["layers"] = layers
    params["head"] = [lin(256, hid), lin(64, 256), lin(32, 64), lin(1, 32)]
    # The PyTorch module also owns an unused `self.ln` / `self.sa` (never called
    # in forward) — intentionally not instantiated here.
    return params


def prepare_params(raw):
    """One-time prep: transpose weights to (in,out), fuse QKV / KV column-wise,
    cast matmul weights to MXU_DTYPE, reshape biases / LN params to (1, N)."""
    wt = lambda w: jnp.asarray(w.T, MXU_DTYPE)
    row = lambda b: jnp.asarray(b, jnp.float32).reshape(1, -1)

    p = {"ft_wt": wt(raw["ft_w"]), "ft_b": row(raw["ft_b"]), "layers": []}
    for lp in raw["layers"]:
        sa, ea = lp["sa"], lp["ea"]
        p["layers"].append({
            "sa_wqkv_t": jnp.concatenate([sa["wq"].T, sa["wk"].T, sa["wv"].T],
                                         axis=1).astype(MXU_DTYPE),
            "sa_bqkv": row(jnp.concatenate([sa["bq"], sa["bk"], sa["bv"]])),
            "sa_wo_t": wt(sa["wo"]), "sa_bo": row(sa["bo"]),
            "ea_wq_t": wt(ea["wq"]), "ea_bq": row(ea["bq"]),
            "ea_wkv_t": jnp.concatenate([ea["wk"].T, ea["wv"].T],
                                        axis=1).astype(MXU_DTYPE),
            "ea_bkv": row(jnp.concatenate([ea["bk"], ea["bv"]])),
            "ea_wo_t": wt(ea["wo"]), "ea_bo": row(ea["bo"]),
            "fc1_wt": wt(lp["fc1_w"]), "fc1_b": row(lp["fc1_b"]),
            "fc2_wt": wt(lp["fc2_w"]), "fc2_b": row(lp["fc2_b"]),
            "ln1_g": row(lp["ln1_g"]), "ln1_b": row(lp["ln1_b"]),
            "ln2_g": row(lp["ln2_g"]), "ln2_b": row(lp["ln2_b"]),
            "ln3_g": row(lp["ln3_g"]), "ln3_b": row(lp["ln3_b"]),
        })
    p["head"] = [(wt(w), row(b)) for (w, b) in raw["head"]]
    return p


if __name__ == "__main__":
    B, S_TRG, S_SRC, HID, N_HEADS, PF, N_LAYERS = 2, 8, 8, 32, 4, 64, 2

    key = jax.random.PRNGKey(0)
    k_params, k_trg, k_src = jax.random.split(key, 3)
    raw_params = init_params(k_params, HID, PF, N_LAYERS, N_HEADS)
    params = prepare_params(raw_params)

    trg = jax.random.normal(k_trg, (B, S_TRG, HID), jnp.float32)
    src = jax.random.normal(k_src, (B, S_SRC, HID), jnp.float32)
    # trg_mask is (B, 1, S_trg, 1) in the PyTorch model; forward also uses
    # trg_mask[:, 0, :, 0] for the pooled mean.
    trg_mask = jnp.ones((B, 1, S_TRG, 1), jnp.float32).at[1, 0, 6:, 0].set(0.0)
    # cross-attention key-padding mask, broadcastable against (B, H, S_trg, S_src)
    cross_attn_mask = jnp.ones((B, 1, 1, S_SRC), jnp.float32).at[1, 0, 0, 5:].set(0.0)

    fwd = jax.jit(functools.partial(decoder_forward, n_heads=N_HEADS))
    out = jax.block_until_ready(fwd(params, trg, src, trg_mask, cross_attn_mask))
    assert out.shape == (B,) and out.dtype == jnp.float32
    print("KERNEL_OK")
</pallas_src>

<mosaic_0001>
module attributes {stable_mosaic.version = 11 : i64} {
  func.func @_proj_kernel(%arg0: i32, %arg1: memref<16x32xf32, #tpu.memory_space<vmem>>, %arg2: memref<32x32xbf16, #tpu.memory_space<vmem>>, %arg3: memref<1x32xf32, #tpu.memory_space<vmem>>, %arg4: memref<16x32xf32, #tpu.memory_space<vmem>>) attributes {dimension_semantics = [#tpu.dimension_semantics<parallel>], iteration_bounds = array<i64: 1>, scalar_prefetch = 0 : i64, scratch_operands = 0 : i64, tpu.core_type = #tpu.core_type<tc>, window_params = [{transform_indices = @transform_0, window_bounds = array<i64: 16, 32>}, {pipeline_mode = #tpu.pipeline_mode<synchronous>, transform_indices = @transform_1, window_bounds = array<i64: 32, 32>}, {pipeline_mode = #tpu.pipeline_mode<synchronous>, transform_indices = @transform_2, window_bounds = array<i64: 1, 32>}, {transform_indices = @transform_3, window_bounds = array<i64: 16, 32>}]} {
    %c0 = arith.constant 0 : index
    %c0_0 = arith.constant 0 : index
    %0 = vector.load %arg1[%c0, %c0_0] : memref<16x32xf32, #tpu.memory_space<vmem>>, vector<16x32xf32>
    %1 = arith.truncf %0 : vector<16x32xf32> to vector<16x32xbf16>
    %c0_1 = arith.constant 0 : index
    %c0_2 = arith.constant 0 : index
    %2 = vector.load %arg2[%c0_1, %c0_2] : memref<32x32xbf16, #tpu.memory_space<vmem>>, vector<32x32xbf16>
    %cst = arith.constant dense<0.000000e+00> : vector<16x32xf32>
    %3 = tpu.matmul %1, %2, %cst {dimension_numbers = #tpu.dot_dimension_numbers<[1], [0], [0], [1], [0, 0, 1, 1], [], []>} : vector<16x32xbf16>, vector<32x32xbf16>, vector<16x32xf32> -> vector<16x32xf32>
    %c0_3 = arith.constant 0 : index
    %c0_4 = arith.constant 0 : index
    %4 = vector.load %arg3[%c0_3, %c0_4] : memref<1x32xf32, #tpu.memory_space<vmem>>, vector<1x32xf32>
    %5 = vector.broadcast %4 : vector<1x32xf32> to vector<16x32xf32>
    %6 = arith.addf %3, %5 : vector<16x32xf32>
    %c0_5 = arith.constant 0 : index
    %c0_6 = arith.constant 0 : index
    %7 = vector.load %arg4[%c0_5, %c0_6] : memref<16x32xf32, #tpu.memory_space<vmem>>, vector<16x32xf32>
    tpu.vector_store %arg4[%c0_5, %c0_6], %6 {strides = array<i32>} : memref<16x32xf32, #tpu.memory_space<vmem>>, vector<16x32xf32>,
    return
  }
  func.func @transform_0(%arg0: i32) -> (i32, i32) {
    %c0_i32 = arith.constant 0 : i32
    %c0_i32_0 = arith.constant 0 : i32
    return %arg0, %c0_i32 : i32, i32
  }
  func.func @transform_1(%arg0: i32) -> (i32, i32) {
    %c0_i32 = arith.constant 0 : i32
    %c0_i32_0 = arith.constant 0 : i32
    %c0_i32_1 = arith.constant 0 : i32
    return %c0_i32, %c0_i32_0 : i32, i32
  }
  func.func @transform_2(%arg0: i32) -> (i32, i32) {
    %c0_i32 = arith.constant 0 : i32
    %c0_i32_0 = arith.constant 0 : i32
    %c0_i32_1 = arith.constant 0 : i32
    return %c0_i32, %c0_i32_0 : i32, i32
  }
  func.func @transform_3(%arg0: i32) -> (i32, i32) {
    %c0_i32 = arith.constant 0 : i32
    %c0_i32_0 = arith.constant 0 : i32
    return %arg0, %c0_i32 : i32, i32
  }
}

module attributes {stable_mosaic.version = 11 : i64} {
  func.func @_self_attn_ln_kernel(%arg0: i32, %arg1: memref<1x8x32xf32, #tpu.memory_space<vmem>>, %arg2: memref<1x8x1xf32, #tpu.memory_space<vmem>>, %arg3: memref<32x96xbf16, #tpu.memory_space<vmem>>, %arg4: memref<1x96xf32, #tpu.memory_space<vmem>>, %arg5: memref<32x32xbf16, #tpu.memory_space<vmem>>, %arg6: memref<1x32xf32, #tpu.memory_space<vmem>>, %arg7: memref<1x32xf32, #tpu.memory_space<vmem>>, %arg8: memref<1x32xf32, #tpu.memory_space<vmem>>, %arg9: memref<1x8x32xf32, #tpu.memory_space<vmem>>) attributes {dimension_semantics = [#tpu.dimension_semantics<parallel>], iteration_bounds = array<i64: 2>, scalar_prefetch = 0 : i64, scratch_operands = 0 : i64, tpu.core_type = #tpu.core_type<tc>, window_params = [{transform_indices = @transform_0, window_bounds = array<i64: 1, 8, 32>}, {transform_indices = @transform_1, window_bounds = array<i64: 1, 8, 1>}, {pipeline_mode = #tpu.pipeline_mode<synchronous>, transform_indices = @transform_2, window_bounds = array<i64: 32, 96>}, {pipeline_mode = #tpu.pipeline_mode<synchronous>, transform_indices = @transform_3, window_bounds = array<i64: 1, 96>}, {pipeline_mode = #tpu.pipeline_mode<synchronous>, transform_indices = @transform_4, window_bounds = array<i64: 32, 32>}, {pipeline_mode = #tpu.pipeline_mode<synchronous>, transform_indices = @transform_5, window_bounds = array<i64: 1, 32>}, {pipeline_mode = #tpu.pipeline_mode<synchronous>, transform_indices = @transform_6, window_bounds = array<i64: 1, 32>}, {pipeline_mode = #tpu.pipeline_mode<synchronous>, transform_indices = @transform_7, window_bounds = array<i64: 1, 32>}, {transform_indices = @transform_8, window_bounds = array<i64: 1, 8, 32>}]} {
    %c0 = arith.constant 0 : index
    %c0_0 = arith.constant 0 : index
    %c0_1 = arith.constant 0 : index
    %0 = vector.load %arg1[%c0, %c0_0, %c0_1] : memref<1x8x32xf32, #tpu.memory_space<vmem>>, vector<1x8x32xf32>
    %1 = vector.shape_cast %0 : vector<1x8x32xf32> to vector<8x32xf32>
    %2 = arith.truncf %1 : vector<8x32xf32> to vector<8x32xbf16>
    %c0_2 = arith.constant 0 : index
    %c0_3 = arith.constant 0 : index
    %3 = vector.load %arg3[%c0_2, %c0_3] : memref<32x96xbf16, #tpu.memory_space<vmem>>, vector<32x96xbf16>
    %cst = arith.constant dense<0.000000e+00> : vector<8x96xf32>
    %4 = tpu.matmul %2, %3, %cst {dimension_numbers = #tpu.dot_dimension_numbers<[1], [0], [0], [1], [0, 0, 1, 1], [], []>} : vector<8x32xbf16>, vector<32x96xbf16>, vector<8x96xf32> -> vector<8x96xf32>
    %c0_4 = arith.constant 0 : index
    %c0_5 = arith.constant 0 : index
    %5 = vector.load %arg4[%c0_4, %c0_5] : memref<1x96xf32, #tpu.memory_space<vmem>>, vector<1x96xf32>
    %6 = vector.broadcast %5 : vector<1x96xf32> to vector<8x96xf32>
    %7 = arith.addf %4, %6 : vector<8x96xf32>
    %8 = vector.extract_strided_slice %7 {offsets = [0, 0], sizes = [8, 32], strides = [1, 1]} : vector<8x96xf32> to vector<8x32xf32>
    %cst_6 = arith.constant 0.353553385 : f32
    %9 = vector.broadcast %cst_6 : f32 to vector<8x32xf32>
    %10 = arith.mulf %8, %9 : vector<8x32xf32>
    %11 = vector.extract_strided_slice %7 {offsets = [0, 32], sizes = [8, 32], strides = [1, 1]} : vector<8x96xf32> to vector<8x32xf32>
    %12 = vector.extract_strided_slice %7 {offsets = [0, 64], sizes = [8, 32], strides = [1, 1]} : vector<8x96xf32> to vector<8x32xf32>
    %c0_7 = arith.constant 0 : index
    %c0_8 = arith.constant 0 : index
    %c0_9 = arith.constant 0 : index
    %13 = vector.load %arg2[%c0_7, %c0_8, %c0_9] : memref<1x8x1xf32, #tpu.memory_space<vmem>>, vector<1x8x1xf32>
    %14 = vector.shape_cast %13 : vector<1x8x1xf32> to vector<8x1xf32>
    %c0_10 = arith.constant 0 : index
    %c0_11 = arith.constant 0 : index
    %15 = vector.load %arg5[%c0_10, %c0_11] : memref<32x32xbf16, #tpu.memory_space<vmem>>, vector<32x32xbf16>
    %16 = arith.truncf %10 : vector<8x32xf32> to vector<8x32xbf16>
    %17 = vector.shape_cast %16 : vector<8x32xbf16> to vector<8x4x8xbf16>
    %18 = tpu.transpose %17, [1, 0, 2] : vector<8x4x8xbf16> -> vector<4x8x8xbf16>
    %19 = arith.truncf %11 : vector<8x32xf32> to vector<8x32xbf16>
    %20 = vector.shape_cast %19 : vector<8x32xbf16> to vector<8x4x8xbf16>
    %21 = tpu.transpose %20, [1, 0, 2] : vector<8x4x8xbf16> -> vector<4x8x8xbf16>
    %22 = arith.truncf %12 : vector<8x32xf32> to vector<8x32xbf16>
    %23 = vector.shape_cast %22 : vector<8x32xbf16> to vector<8x4x8xbf16>
    %24 = tpu.transpose %23, [1, 0, 2] : vector<8x4x8xbf16> -> vector<4x8x8xbf16>
    "tpu.trace_start"() <{level = 10 : i32, message = "hqd,hkd->hqk"}> : () -> ()
    %cst_12 = arith.constant dense<0.000000e+00> : vector<4x8x8xf32>
    %25 = tpu.matmul %18, %21, %cst_12 {dimension_numbers = #tpu.dot_dimension_numbers<[2], [2], [1], [1], [0, 0, 0, 1, 1, 1], [0], [0]>} : vector<4x8x8xbf16>, vector<4x8x8xbf16>, vector<4x8x8xf32> -> vector<4x8x8xf32>
    %cst_13 = arith.constant 0.000000e+00 : f32
    "tpu.trace_stop"() : () -> ()
    %26 = vector.broadcast %cst_13 : f32 to vector<8x1xf32>
    %27 = arith.cmpf oeq, %14, %26 : vector<8x1xf32>
    %cst_14 = arith.constant -1.000000e+10 : f32
    %28 = vector.shape_cast %27 : vector<8x1xi1> to vector<1x8x1xi1>
    %29 = vector.broadcast %28 : vector<1x8x1xi1> to vector<4x8x8xi1>
    %30 = vector.broadcast %cst_14 : f32 to vector<4x8x8xf32>
    %31 = arith.select %29, %30, %25 : vector<4x8x8xi1>, vector<4x8x8xf32>
    %cst_15 = arith.constant dense<0xFF800000> : vector<4x8xf32>
    %32 = vector.multi_reduction <maximumf>, %31, %cst_15 [2] : vector<4x8x8xf32> to vector<4x8xf32>
    %33 = vector.shape_cast %32 : vector<4x8xf32> to vector<4x8x1xf32>
    %34 = vector.broadcast %33 : vector<4x8x1xf32> to vector<4x8x8xf32>
    %35 = arith.subf %31, %34 : vector<4x8x8xf32>
    %36 = math.exp %35 : vector<4x8x8xf32>
    %cst_16 = arith.constant dense<0.000000e+00> : vector<4x8xf32>
    %37 = vector.multi_reduction <add>, %36, %cst_16 [2] : vector<4x8x8xf32> to vector<4x8xf32>
    %38 = vector.shape_cast %37 : vector<4x8xf32> to vector<4x8x1xf32>
    %39 = tpu.reciprocal %38 {approx = true} : vector<4x8x1xf32> -> vector<4x8x1xf32>
    %40 = vector.broadcast %39 : vector<4x8x1xf32> to vector<4x8x8xf32>
    %41 = arith.mulf %36, %40 : vector<4x8x8xf32>
    %42 = arith.truncf %41 : vector<4x8x8xf32> to vector<4x8x8xbf16>
    "tpu.trace_start"() <{level = 10 : i32, message = "hqk,hkd->hqd"}> : () -> ()
    %cst_17 = arith.constant dense<0.000000e+00> : vector<4x8x8xf32>
    %43 = tpu.matmul %42, %24, %cst_17 {dimension_numbers = #tpu.dot_dimension_numbers<[2], [1], [1], [2], [0, 0, 0, 1, 1, 2], [0], [0]>} : vector<4x8x8xbf16>, vector<4x8x8xbf16>, vector<4x8x8xf32> -> vector<4x8x8xf32>
    "tpu.trace_stop"() : () -> ()
    %44 = tpu.transpose %43, [1, 0, 2] : vector<4x8x8xf32> -> vector<8x4x8xf32>
    %45 = vector.shape_cast %44 : vector<8x4x8xf32> to vector<8x32xf32>
    %46 = arith.truncf %45 : vector<8x32xf32> to vector<8x32xbf16>
    %cst_18 = arith.constant dense<0.000000e+00> : vector<8x32xf32>
    %47 = tpu.matmul %46, %15, %cst_18 {dimension_numbers = #tpu.dot_dimension_numbers<[1], [0], [0], [1], [0, 0, 1, 1], [], []>} : vector<8x32xbf16>, vector<32x32xbf16>, vector<8x32xf32> -> vector<8x32xf32>
    %48 = arith.addf %1, %47 : vector<8x32xf32>
    %c0_19 = arith.constant 0 : index
    %c0_20 = arith.constant 0 : index
    %49 = vector.load %arg6[%c0_19, %c0_20] : memref<1x32xf32, #tpu.memory_space<vmem>>, vector<1x32xf32>
    %50 = vector.broadcast %49 : vector<1x32xf32> to vector<8x32xf32>
    %51 = arith.addf %48, %50 : vector<8x32xf32>
    %c0_21 = arith.constant 0 : index
    %c0_22 = arith.constant 0 : index
    %52 = vector.load %arg7[%c0_21, %c0_22] : memref<1x32xf32, #tpu.memory_space<vmem>>, vector<1x32xf32>
    %c0_23 = arith.constant 0 : index
    %c0_24 = arith.constant 0 : index
    %53 = vector.load %arg8[%c0_23, %c0_24] : memref<1x32xf32, #tpu.memory_space<vmem>>, vector<1x32xf32>
    %cst_25 = arith.constant dense<0.000000e+00> : vector<8xf32>
    %54 = vector.multi_reduction <add>, %51, %cst_25 [1] : vector<8x32xf32> to vector<8xf32>
    %55 = vector.shape_cast %54 : vector<8xf32> to vector<8x1xf32>
    %cst_26 = arith.constant 3.200000e+01 : f32
    %56 = vector.broadcast %cst_26 : f32 to vector<8x1xf32>
    %57 = arith.divf %55, %56 : vector<8x1xf32>
    %58 = vector.broadcast %57 : vector<8x1xf32> to vector<8x32xf32>
    %59 = arith.subf %51, %58 : vector<8x32xf32>
    %60 = arith.mulf %59, %59 : vector<8x32xf32>
    %cst_27 = arith.constant dense<0.000000e+00> : vector<8xf32>
    %61 = vector.multi_reduction <add>, %60, %cst_27 [1] : vector<8x32xf32> to vector<8xf32>
    %62 = vector.shape_cast %61 : vector<8xf32> to vector<8x1xf32>
    %cst_28 = arith.constant 0.0322580636 : f32
    %63 = vector.broadcast %cst_28 : f32 to vector<8x1xf32>
    %64 = arith.mulf %62, %63 : vector<8x1xf32>
    %65 = math.sqrt %64 : vector<8x1xf32>
    %cst_29 = arith.constant 9.99999996E-13 : f32
    %66 = vector.broadcast %cst_29 : f32 to vector<8x1xf32>
    %67 = arith.addf %65, %66 : vector<8x1xf32>
    %68 = tpu.reciprocal %67 : vector<8x1xf32> -> vector<8x1xf32>
    %69 = vector.broadcast %68 : vector<8x1xf32> to vector<8x32xf32>
    %70 = arith.mulf %59, %69 : vector<8x32xf32>
    %71 = vector.broadcast %52 : vector<1x32xf32> to vector<8x32xf32>
    %72 = arith.mulf %70, %71 : vector<8x32xf32>
    %73 = vector.broadcast %53 : vector<1x32xf32> to vector<8x32xf32>
    %74 = arith.addf %72, %73 : vector<8x32xf32>
    %c0_30 = arith.constant 0 : index
    %c0_31 = arith.constant 0 : index
    %c0_32 = arith.constant 0 : index
    %75 = vector.load %arg9[%c0_30, %c0_31, %c0_32] : memref<1x8x32xf32, #tpu.memory_space<vmem>>, vector<1x8x32xf32>
    %76 = vector.shape_cast %75 : vector<1x8x32xf32> to vector<8x32xf32>
    %77 = vector.shape_cast %74 : vector<8x32xf32> to vector<1x8x32xf32>
    tpu.vector_store %arg9[%c0_30, %c0_31, %c0_32], %77 {strides = array<i32>} : memref<1x8x32xf32, #tpu.memory_space<vmem>>, vector<1x8x32xf32>,
    return
  }
  func.func @transform_0(%arg0: i32) -> (i32, i32, i32) {
    %c0_i32 = arith.constant 0 : i32
    %c0_i32_0 = arith.constant 0 : i32
    %c0_i32_1 = arith.constant 0 : i32
    return %arg0, %c0_i32, %c0_i32_0 : i32, i32, i32
  }
  func.func @transform_1(%arg0: i32) -> (i32, i32, i32) {
    %c0_i32 = arith.constant 0 : i32
    %c0_i32_0 = arith.constant 0 : i32
    %c0_i32_1 = arith.constant 0 : i32
    return %arg0, %c0_i32, %c0_i32_0 : i32, i32, i32
  }
  func.func @transform_2(%arg0: i32) -> (i32, i32) {
    %c0_i32 = arith.constant 0 : i32
    %c0_i32_0 = arith.constant 0 : i32
    %c0_i32_1 = arith.constant 0 : i32
    return %c0_i32, %c0_i32_0 : i32, i32
  }
  func.func @transform_3(%arg0: i32) -> (i32, i32) {
    %c0_i32 = arith.constant 0 : i32
    %c0_i32_0 = arith.constant 0 : i32
    %c0_i32_1 = arith.constant 0 : i32
    return %c0_i32, %c0_i32_0 : i32, i32
  }
  func.func @transform_4(%arg0: i32) -> (i32, i32) {
    %c0_i32 = arith.constant 0 : i32
    %c0_i32_0 = arith.constant 0 : i32
    %c0_i32_1 = arith.constant 0 : i32
    return %c0_i32, %c0_i32_0 : i32, i32
  }
  func.func @transform_5(%arg0: i32) -> (i32, i32) {
    %c0_i32 = arith.constant 0 : i32
    %c0_i32_0 = arith.constant 0 : i32
    %c0_i32_1 = arith.constant 0 : i32
    return %c0_i32, %c0_i32_0 : i32, i32
  }
  func.func @transform_6(%arg0: i32) -> (i32, i32) {
    %c0_i32 = arith.constant 0 : i32
    %c0_i32_0 = arith.constant 0 : i32
    %c0_i32_1 = arith.constant 0 : i32
    return %c0_i32, %c0_i32_0 : i32, i32
  }
  func.func @transform_7(%arg0: i32) -> (i32, i32) {
    %c0_i32 = arith.constant 0 : i32
    %c0_i32_0 = arith.constant 0 : i32
    %c0_i32_1 = arith.constant 0 : i32
    return %c0_i32, %c0_i32_0 : i32, i32
  }
  func.func @transform_8(%arg0: i32) -> (i32, i32, i32) {
    %c0_i32 = arith.constant 0 : i32
    %c0_i32_0 = arith.constant 0 : i32
    %c0_i32_1 = arith.constant 0 : i32
    return %arg0, %c0_i32, %c0_i32_0 : i32, i32, i32
  }
}

module attributes {stable_mosaic.version = 11 : i64} {
  func.func @_cross_attn_ln_kernel(%arg0: i32, %arg1: memref<1x8x32xf32, #tpu.memory_space<vmem>>, %arg2: memref<1x8x32xbf16, #tpu.memory_space<vmem>>, %arg3: memref<1x1x8xf32, #tpu.memory_space<vmem>>, %arg4: memref<32x32xbf16, #tpu.memory_space<vmem>>, %arg5: memref<1x32xf32, #tpu.memory_space<vmem>>, %arg6: memref<32x64xbf16, #tpu.memory_space<vmem>>, %arg7: memref<1x64xf32, #tpu.memory_space<vmem>>, %arg8: memref<32x32xbf16, #tpu.memory_space<vmem>>, %arg9: memref<1x32xf32, #tpu.memory_space<vmem>>, %arg10: memref<1x32xf32, #tpu.memory_space<vmem>>, %arg11: memref<1x32xf32, #tpu.memory_space<vmem>>, %arg12: memref<1x8x32xf32, #tpu.memory_space<vmem>>) attributes {dimension_semantics = [#tpu.dimension_semantics<parallel>], iteration_bounds = array<i64: 2>, scalar_prefetch = 0 : i64, scratch_operands = 0 : i64, tpu.core_type = #tpu.core_type<tc>, window_params = [{transform_indices = @transform_0, window_bounds = array<i64: 1, 8, 32>}, {transform_indices = @transform_1, window_bounds = array<i64: 1, 8, 32>}, {transform_indices = @transform_2, window_bounds = array<i64: 1, 1, 8>}, {pipeline_mode = #tpu.pipeline_mode<synchronous>, transform_indices = @transform_3, window_bounds = array<i64: 32, 32>}, {pipeline_mode = #tpu.pipeline_mode<synchronous>, transform_indices = @transform_4, window_bounds = array<i64: 1, 32>}, {pipeline_mode = #tpu.pipeline_mode<synchronous>, transform_indices = @transform_5, window_bounds = array<i64: 32, 64>}, {pipeline_mode = #tpu.pipeline_mode<synchronous>, transform_indices = @transform_6, window_bounds = array<i64: 1, 64>}, {pipeline_mode = #tpu.pipeline_mode<synchronous>, transform_indices = @transform_7, window_bounds = array<i64: 32, 32>}, {pipeline_mode = #tpu.pipeline_mode<synchronous>, transform_indices = @transform_8, window_bounds = array<i64: 1, 32>}, {pipeline_mode = #tpu.pipeline_mode<synchronous>, transform_indices = @transform_9, window_bounds = array<i64: 1, 32>}, {pipeline_mode = #tpu.pipeline_mode<synchronous>, transform_indices = @transform_10, window_bounds = array<i64: 1, 32>}, {transform_indices = @transform_11, window_bounds = array<i64: 1, 8, 32>}]} {
    %c0 = arith.constant 0 : index
    %c0_0 = arith.constant 0 : index
    %c0_1 = arith.constant 0 : index
    %0 = vector.load %arg1[%c0, %c0_0, %c0_1] : memref<1x8x32xf32, #tpu.memory_space<vmem>>, vector<1x8x32xf32>
    %1 = vector.shape_cast %0 : vector<1x8x32xf32> to vector<8x32xf32>
    %2 = arith.truncf %1 : vector<8x32xf32> to vector<8x32xbf16>
    %c0_2 = arith.constant 0 : index
    %c0_3 = arith.constant 0 : index
    %3 = vector.load %arg4[%c0_2, %c0_3] : memref<32x32xbf16, #tpu.memory_space<vmem>>, vector<32x32xbf16>
    %cst = arith.constant dense<0.000000e+00> : vector<8x32xf32>
    %4 = tpu.matmul %2, %3, %cst {dimension_numbers = #tpu.dot_dimension_numbers<[1], [0], [0], [1], [0, 0, 1, 1], [], []>} : vector<8x32xbf16>, vector<32x32xbf16>, vector<8x32xf32> -> vector<8x32xf32>
    %c0_4 = arith.constant 0 : index
    %c0_5 = arith.constant 0 : index
    %5 = vector.load %arg5[%c0_4, %c0_5] : memref<1x32xf32, #tpu.memory_space<vmem>>, vector<1x32xf32>
    %6 = vector.broadcast %5 : vector<1x32xf32> to vector<8x32xf32>
    %7 = arith.addf %4, %6 : vector<8x32xf32>
    %cst_6 = arith.constant 0.353553385 : f32
    %8 = vector.broadcast %cst_6 : f32 to vector<8x32xf32>
    %9 = arith.mulf %7, %8 : vector<8x32xf32>
    %c0_7 = arith.constant 0 : index
    %c0_8 = arith.constant 0 : index
    %c0_9 = arith.constant 0 : index
    %10 = vector.load %arg2[%c0_7, %c0_8, %c0_9] : memref<1x8x32xbf16, #tpu.memory_space<vmem>>, vector<1x8x32xbf16>
    %11 = vector.shape_cast %10 : vector<1x8x32xbf16> to vector<8x32xbf16>
    %c0_10 = arith.constant 0 : index
    %c0_11 = arith.constant 0 : index
    %12 = vector.load %arg6[%c0_10, %c0_11] : memref<32x64xbf16, #tpu.memory_space<vmem>>, vector<32x64xbf16>
    %cst_12 = arith.constant dense<0.000000e+00> : vector<8x64xf32>
    %13 = tpu.matmul %11, %12, %cst_12 {dimension_numbers = #tpu.dot_dimension_numbers<[1], [0], [0], [1], [0, 0, 1, 1], [], []>} : vector<8x32xbf16>, vector<32x64xbf16>, vector<8x64xf32> -> vector<8x64xf32>
    %c0_13 = arith.constant 0 : index
    %c0_14 = arith.constant 0 : index
    %14 = vector.load %arg7[%c0_13, %c0_14] : memref<1x64xf32, #tpu.memory_space<vmem>>, vector<1x64xf32>
    %15 = vector.broadcast %14 : vector<1x64xf32> to vector<8x64xf32>
    %16 = arith.addf %13, %15 : vector<8x64xf32>
    %17 = vector.extract_strided_slice %16 {offsets = [0, 0], sizes = [8, 32], strides = [1, 1]} : vector<8x64xf32> to vector<8x32xf32>
    %18 = vector.extract_strided_slice %16 {offsets = [0, 32], sizes = [8, 32], strides = [1, 1]} : vector<8x64xf32> to vector<8x32xf32>
    %c0_15 = arith.constant 0 : index
    %c0_16 = arith.constant 0 : index
    %c0_17 = arith.constant 0 : index
    %19 = vector.load %arg3[%c0_15, %c0_16, %c0_17] : memref<1x1x8xf32, #tpu.memory_space<vmem>>, vector<1x1x8xf32>
    %20 = vector.shape_cast %19 : vector<1x1x8xf32> to vector<1x8xf32>
    %c0_18 = arith.constant 0 : index
    %c0_19 = arith.constant 0 : index
    %21 = vector.load %arg8[%c0_18, %c0_19] : memref<32x32xbf16, #tpu.memory_space<vmem>>, vector<32x32xbf16>
    %22 = arith.truncf %9 : vector<8x32xf32> to vector<8x32xbf16>
    %23 = vector.shape_cast %22 : vector<8x32xbf16> to vector<8x4x8xbf16>
    %24 = tpu.transpose %23, [1, 0, 2] : vector<8x4x8xbf16> -> vector<4x8x8xbf16>
    %25 = arith.truncf %17 : vector<8x32xf32> to vector<8x32xbf16>
    %26 = vector.shape_cast %25 : vector<8x32xbf16> to vector<8x4x8xbf16>
    %27 = tpu.transpose %26, [1, 0, 2] : vector<8x4x8xbf16> -> vector<4x8x8xbf16>
    %28 = arith.truncf %18 : vector<8x32xf32> to vector<8x32xbf16>
    %29 = vector.shape_cast %28 : vector<8x32xbf16> to vector<8x4x8xbf16>
    %30 = tpu.transpose %29, [1, 0, 2] : vector<8x4x8xbf16> -> vector<4x8x8xbf16>
    "tpu.trace_start"() <{level = 10 : i32, message = "hqd,hkd->hqk"}> : () -> ()
    %cst_20 = arith.constant dense<0.000000e+00> : vector<4x8x8xf32>
    %31 = tpu.matmul %24, %27, %cst_20 {dimension_numbers = #tpu.dot_dimension_numbers<[2], [2], [1], [1], [0, 0, 0, 1, 1, 1], [0], [0]>} : vector<4x8x8xbf16>, vector<4x8x8xbf16>, vector<4x8x8xf32> -> vector<4x8x8xf32>
    %cst_21 = arith.constant 0.000000e+00 : f32
    "tpu.trace_stop"() : () -> ()
    %32 = vector.broadcast %cst_21 : f32 to vector<1x8xf32>
    %33 = arith.cmpf oeq, %20, %32 : vector<1x8xf32>
    %cst_22 = arith.constant -1.000000e+10 : f32
    %34 = vector.shape_cast %33 : vector<1x8xi1> to vector<1x1x8xi1>
    %35 = vector.broadcast %34 : vector<1x1x8xi1> to vector<4x8x8xi1>
    %36 = vector.broadcast %cst_22 : f32 to vector<4x8x8xf32>
    %37 = arith.select %35, %36, %31 : vector<4x8x8xi1>, vector<4x8x8xf32>
    %cst_23 = arith.constant dense<0xFF800000> : vector<4x8xf32>
    %38 = vector.multi_reduction <maximumf>, %37, %cst_23 [2] : vector<4x8x8xf32> to vector<4x8xf32>
    %39 = vector.shape_cast %38 : vector<4x8xf32> to vector<4x8x1xf32>
    %40 = vector.broadcast %39 : vector<4x8x1xf32> to vector<4x8x8xf32>
    %41 = arith.subf %37, %40 : vector<4x8x8xf32>
    %42 = math.exp %41 : vector<4x8x8xf32>
    %cst_24 = arith.constant dense<0.000000e+00> : vector<4x8xf32>
    %43 = vector.multi_reduction <add>, %42, %cst_24 [2] : vector<4x8x8xf32> to vector<4x8xf32>
    %44 = vector.shape_cast %43 : vector<4x8xf32> to vector<4x8x1xf32>
    %45 = tpu.reciprocal %44 {approx = true} : vector<4x8x1xf32> -> vector<4x8x1xf32>
    %46 = vector.broadcast %45 : vector<4x8x1xf32> to vector<4x8x8xf32>
    %47 = arith.mulf %42, %46 : vector<4x8x8xf32>
    %48 = arith.truncf %47 : vector<4x8x8xf32> to vector<4x8x8xbf16>
    "tpu.trace_start"() <{level = 10 : i32, message = "hqk,hkd->hqd"}> : () -> ()
    %cst_25 = arith.constant dense<0.000000e+00> : vector<4x8x8xf32>
    %49 = tpu.matmul %48, %30, %cst_25 {dimension_numbers = #tpu.dot_dimension_numbers<[2], [1], [1], [2], [0, 0, 0, 1, 1, 2], [0], [0]>} : vector<4x8x8xbf16>, vector<4x8x8xbf16>, vector<4x8x8xf32> -> vector<4x8x8xf32>
    "tpu.trace_stop"() : () -> ()
    %50 = tpu.transpose %49, [1, 0, 2] : vector<4x8x8xf32> -> vector<8x4x8xf32>
    %51 = vector.shape_cast %50 : vector<8x4x8xf32> to vector<8x32xf32>
    %52 = arith.truncf %51 : vector<8x32xf32> to vector<8x32xbf16>
    %cst_26 = arith.constant dense<0.000000e+00> : vector<8x32xf32>
    %53 = tpu.matmul %52, %21, %cst_26 {dimension_numbers = #tpu.dot_dimension_numbers<[1], [0], [0], [1], [0, 0, 1, 1], [], []>} : vector<8x32xbf16>, vector<32x32xbf16>, vector<8x32xf32> -> vector<8x32xf32>
    %54 = arith.addf %1, %53 : vector<8x32xf32>
    %c0_27 = arith.constant 0 : index
    %c0_28 = arith.constant 0 : index
    %55 = vector.load %arg9[%c0_27, %c0_28] : memref<1x32xf32, #tpu.memory_space<vmem>>, vector<1x32xf32>
    %56 = vector.broadcast %55 : vector<1x32xf32> to vector<8x32xf32>
    %57 = arith.addf %54, %56 : vector<8x32xf32>
    %c0_29 = arith.constant 0 : index
    %c0_30 = arith.constant 0 : index
    %58 = vector.load %arg10[%c0_29, %c0_30] : memref<1x32xf32, #tpu.memory_space<vmem>>, vector<1x32xf32>
    %c0_31 = arith.constant 0 : index
    %c0_32 = arith.constant 0 : index
    %59 = vector.load %arg11[%c0_31, %c0_32] : memref<1x32xf32, #tpu.memory_space<vmem>>, vector<1x32xf32>
    %cst_33 = arith.constant dense<0.000000e+00> : vector<8xf32>
    %60 = vector.multi_reduction <add>, %57, %cst_33 [1] : vector<8x32xf32> to vector<8xf32>
    %61 = vector.shape_cast %60 : vector<8xf32> to vector<8x1xf32>
    %cst_34 = arith.constant 3.200000e+01 : f32
    %62 = vector.broadcast %cst_34 : f32 to vector<8x1xf32>
    %63 = arith.divf %61, %62 : vector<8x1xf32>
    %64 = vector.broadcast %63 : vector<8x1xf32> to vector<8x32xf32>
    %65 = arith.subf %57, %64 : vector<8x32xf32>
    %66 = arith.mulf %65, %65 : vector<8x32xf32>
    %cst_35 = arith.constant dense<0.000000e+00> : vector<8xf32>
    %67 = vector.multi_reduction <add>, %66, %cst_35 [1] : vector<8x32xf32> to vector<8xf32>
    %68 = vector.shape_cast %67 : vector<8xf32> to vector<8x1xf32>
    %cst_36 = arith.constant 0.0322580636 : f32
    %69 = vector.broadcast %cst_36 : f32 to vector<8x1xf32>
    %70 = arith.mulf %68, %69 : vector<8x1xf32>
    %71 = math.sqrt %70 : vector<8x1xf32>
    %cst_37 = arith.constant 9.99999996E-13 : f32
    %72 = vector.broadcast %cst_37 : f32 to vector<8x1xf32>
    %73 = arith.addf %71, %72 : vector<8x1xf32>
    %74 = tpu.reciprocal %73 : vector<8x1xf32> -> vector<8x1xf32>
    %75 = vector.broadcast %74 : vector<8x1xf32> to vector<8x32xf32>
    %76 = arith.mulf %65, %75 : vector<8x32xf32>
    %77 = vector.broadcast %58 : vector<1x32xf32> to vector<8x32xf32>
    %78 = arith.mulf %76, %77 : vector<8x32xf32>
    %79 = vector.broadcast %59 : vector<1x32xf32> to vector<8x32xf32>
    %80 = arith.addf %78, %79 : vector<8x32xf32>
    %c0_38 = arith.constant 0 : index
    %c0_39 = arith.constant 0 : index
    %c0_40 = arith.constant 0 : index
    %81 = vector.load %arg12[%c0_38, %c0_39, %c0_40] : memref<1x8x32xf32, #tpu.memory_space<vmem>>, vector<1x8x32xf32>
    %82 = vector.shape_cast %81 : vector<1x8x32xf32> to vector<8x32xf32>
    %83 = vector.shape_cast %80 : vector<8x32xf32> to vector<1x8x32xf32>
    tpu.vector_store %arg12[%c0_38, %c0_39, %c0_40], %83 {strides = array<i32>} : memref<1x8x32xf32, #tpu.memory_space<vmem>>, vector<1x8x32xf32>,
    return
  }
  func.func @transform_0(%arg0: i32) -> (i32, i32, i32) {
    %c0_i32 = arith.constant 0 : i32
    %c0_i32_0 = arith.constant 0 : i32
    %c0_i32_1 = arith.constant 0 : i32
    return %arg0, %c0_i32, %c0_i32_0 : i32, i32, i32
  }
  func.func @transform_1(%arg0: i32) -> (i32, i32, i32) {
    %c0_i32 = arith.constant 0 : i32
    %c0_i32_0 = arith.constant 0 : i32
    %c0_i32_1 = arith.constant 0 : i32
    return %arg0, %c0_i32, %c0_i32_0 : i32, i32, i32
  }
  func.func @transform_2(%arg0: i32) -> (i32, i32, i32) {
    %c0_i32 = arith.constant 0 : i32
    %c0_i32_0 = arith.constant 0 : i32
    %c0_i32_1 = arith.constant 0 : i32
    return %arg0, %c0_i32, %c0_i32_0 : i32, i32, i32
  }
  func.func @transform_3(%arg0: i32) -> (i32, i32) {
    %c0_i32 = arith.constant 0 : i32
    %c0_i32_0 = arith.constant 0 : i32
    %c0_i32_1 = arith.constant 0 : i32
    return %c0_i32, %c0_i32_0 : i32, i32
  }
  func.func @transform_4(%arg0: i32) -> (i32, i32) {
    %c0_i32 = arith.constant 0 : i32
    %c0_i32_0 = arith.constant 0 : i32
    %c0_i32_1 = arith.constant 0 : i32
    return %c0_i32, %c0_i32_0 : i32, i32
  }
  func.func @transform_5(%arg0: i32) -> (i32, i32) {
    %c0_i32 = arith.constant 0 : i32
    %c0_i32_0 = arith.constant 0 : i32
    %c0_i32_1 = arith.constant 0 : i32
    return %c0_i32, %c0_i32_0 : i32, i32
  }
  func.func @transform_6(%arg0: i32) -> (i32, i32) {
    %c0_i32 = arith.constant 0 : i32
    %c0_i32_0 = arith.constant 0 : i32
    %c0_i32_1 = arith.constant 0 : i32
    return %c0_i32, %c0_i32_0 : i32, i32
  }
  func.func @transform_7(%arg0: i32) -> (i32, i32) {
    %c0_i32 = arith.constant 0 : i32
    %c0_i32_0 = arith.constant 0 : i32
    %c0_i32_1 = arith.constant 0 : i32
    return %c0_i32, %c0_i32_0 : i32, i32
  }
  func.func @transform_8(%arg0: i32) -> (i32, i32) {
    %c0_i32 = arith.constant 0 : i32
    %c0_i32_0 = arith.constant 0 : i32
    %c0_i32_1 = arith.constant 0 : i32
    return %c0_i32, %c0_i32_0 : i32, i32
  }
  func.func @transform_9(%arg0: i32) -> (i32, i32) {
    %c0_i32 = arith.constant 0 : i32
    %c0_i32_0 = arith.constant 0 : i32
    %c0_i32_1 = arith.constant 0 : i32
    return %c0_i32, %c0_i32_0 : i32, i32
  }
  func.func @transform_10(%arg0: i32) -> (i32, i32) {
    %c0_i32 = arith.constant 0 : i32
    %c0_i32_0 = arith.constant 0 : i32
    %c0_i32_1 = arith.constant 0 : i32
    return %c0_i32, %c0_i32_0 : i32, i32
  }
  func.func @transform_11(%arg0: i32) -> (i32, i32, i32) {
    %c0_i32 = arith.constant 0 : i32
    %c0_i32_0 = arith.constant 0 : i32
    %c0_i32_1 = arith.constant 0 : i32
    return %arg0, %c0_i32, %c0_i32_0 : i32, i32, i32
  }
}

module attributes {stable_mosaic.version = 11 : i64} {
  func.func @_ffn_ln_kernel(%arg0: i32, %arg1: memref<16x32xf32, #tpu.memory_space<vmem>>, %arg2: memref<32x64xbf16, #tpu.memory_space<vmem>>, %arg3: memref<1x64xf32, #tpu.memory_space<vmem>>, %arg4: memref<64x32xbf16, #tpu.memory_space<vmem>>, %arg5: memref<1x32xf32, #tpu.memory_space<vmem>>, %arg6: memref<1x32xf32, #tpu.memory_space<vmem>>, %arg7: memref<1x32xf32, #tpu.memory_space<vmem>>, %arg8: memref<16x32xf32, #tpu.memory_space<vmem>>) attributes {dimension_semantics = [#tpu.dimension_semantics<parallel>], iteration_bounds = array<i64: 1>, scalar_prefetch = 0 : i64, scratch_operands = 0 : i64, tpu.core_type = #tpu.core_type<tc>, window_params = [{transform_indices = @transform_0, window_bounds = array<i64: 16, 32>}, {pipeline_mode = #tpu.pipeline_mode<synchronous>, transform_indices = @transform_1, window_bounds = array<i64: 32, 64>}, {pipeline_mode = #tpu.pipeline_mode<synchronous>, transform_indices = @transform_2, window_bounds = array<i64: 1, 64>}, {pipeline_mode = #tpu.pipeline_mode<synchronous>, transform_indices = @transform_3, window_bounds = array<i64: 64, 32>}, {pipeline_mode = #tpu.pipeline_mode<synchronous>, transform_indices = @transform_4, window_bounds = array<i64: 1, 32>}, {pipeline_mode = #tpu.pipeline_mode<synchronous>, transform_indices = @transform_5, window_bounds = array<i64: 1, 32>}, {pipeline_mode = #tpu.pipeline_mode<synchronous>, transform_indices = @transform_6, window_bounds = array<i64: 1, 32>}, {transform_indices = @transform_7, window_bounds = array<i64: 16, 32>}]} {
    %c0 = arith.constant 0 : index
    %c0_0 = arith.constant 0 : index
    %0 = vector.load %arg1[%c0, %c0_0] : memref<16x32xf32, #tpu.memory_space<vmem>>, vector<16x32xf32>
    %1 = arith.truncf %0 : vector<16x32xf32> to vector<16x32xbf16>
    %c0_1 = arith.constant 0 : index
    %c0_2 = arith.constant 0 : index
    %2 = vector.load %arg2[%c0_1, %c0_2] : memref<32x64xbf16, #tpu.memory_space<vmem>>, vector<32x64xbf16>
    %cst = arith.constant dense<0.000000e+00> : vector<16x64xf32>
    %3 = tpu.matmul %1, %2, %cst {dimension_numbers = #tpu.dot_dimension_numbers<[1], [0], [0], [1], [0, 0, 1, 1], [], []>} : vector<16x32xbf16>, vector<32x64xbf16>, vector<16x64xf32> -> vector<16x64xf32>
    %c0_3 = arith.constant 0 : index
    %c0_4 = arith.constant 0 : index
    %4 = vector.load %arg3[%c0_3, %c0_4] : memref<1x64xf32, #tpu.memory_space<vmem>>, vector<1x64xf32>
    %5 = vector.broadcast %4 : vector<1x64xf32> to vector<16x64xf32>
    %6 = arith.addf %3, %5 : vector<16x64xf32>
    %cst_5 = arith.constant 0.000000e+00 : f32
    %7 = vector.broadcast %cst_5 : f32 to vector<16x64xf32>
    %8 = arith.maximumf %6, %7 : vector<16x64xf32>
    %9 = arith.truncf %8 : vector<16x64xf32> to vector<16x64xbf16>
    %c0_6 = arith.constant 0 : index
    %c0_7 = arith.constant 0 : index
    %10 = vector.load %arg4[%c0_6, %c0_7] : memref<64x32xbf16, #tpu.memory_space<vmem>>, vector<64x32xbf16>
    %cst_8 = arith.constant dense<0.000000e+00> : vector<16x32xf32>
    %11 = tpu.matmul %9, %10, %cst_8 {dimension_numbers = #tpu.dot_dimension_numbers<[1], [0], [0], [1], [0, 0, 1, 1], [], []>} : vector<16x64xbf16>, vector<64x32xbf16>, vector<16x32xf32> -> vector<16x32xf32>
    %c0_9 = arith.constant 0 : index
    %c0_10 = arith.constant 0 : index
    %12 = vector.load %arg5[%c0_9, %c0_10] : memref<1x32xf32, #tpu.memory_space<vmem>>, vector<1x32xf32>
    %13 = vector.broadcast %12 : vector<1x32xf32> to vector<16x32xf32>
    %14 = arith.addf %11, %13 : vector<16x32xf32>
    %15 = arith.addf %0, %14 : vector<16x32xf32>
    %c0_11 = arith.constant 0 : index
    %c0_12 = arith.constant 0 : index
    %16 = vector.load %arg6[%c0_11, %c0_12] : memref<1x32xf32, #tpu.memory_space<vmem>>, vector<1x32xf32>
    %c0_13 = arith.constant 0 : index
    %c0_14 = arith.constant 0 : index
    %17 = vector.load %arg7[%c0_13, %c0_14] : memref<1x32xf32, #tpu.memory_space<vmem>>, vector<1x32xf32>
    %cst_15 = arith.constant dense<0.000000e+00> : vector<16xf32>
    %18 = vector.multi_reduction <add>, %15, %cst_15 [1] : vector<16x32xf32> to vector<16xf32>
    %19 = vector.shape_cast %18 : vector<16xf32> to vector<16x1xf32>
    %cst_16 = arith.constant 3.200000e+01 : f32
    %20 = vector.broadcast %cst_16 : f32 to vector<16x1xf32>
    %21 = arith.divf %19, %20 : vector<16x1xf32>
    %22 = vector.broadcast %21 : vector<16x1xf32> to vector<16x32xf32>
    %23 = arith.subf %15, %22 : vector<16x32xf32>
    %24 = arith.mulf %23, %23 : vector<16x32xf32>
    %cst_17 = arith.constant dense<0.000000e+00> : vector<16xf32>
    %25 = vector.multi_reduction <add>, %24, %cst_17 [1] : vector<16x32xf32> to vector<16xf32>
    %26 = vector.shape_cast %25 : vector<16xf32> to vector<16x1xf32>
    %cst_18 = arith.constant 0.0322580636 : f32
    %27 = vector.broadcast %cst_18 : f32 to vector<16x1xf32>
    %28 = arith.mulf %26, %27 : vector<16x1xf32>
    %29 = math.sqrt %28 : vector<16x1xf32>
    %cst_19 = arith.constant 9.99999996E-13 : f32
    %30 = vector.broadcast %cst_19 : f32 to vector<16x1xf32>
    %31 = arith.addf %29, %30 : vector<16x1xf32>
    %32 = tpu.reciprocal %31 : vector<16x1xf32> -> vector<16x1xf32>
    %33 = vector.broadcast %32 : vector<16x1xf32> to vector<16x32xf32>
    %34 = arith.mulf %23, %33 : vector<16x32xf32>
    %35 = vector.broadcast %16 : vector<1x32xf32> to vector<16x32xf32>
    %36 = arith.mulf %34, %35 : vector<16x32xf32>
    %37 = vector.broadcast %17 : vector<1x32xf32> to vector<16x32xf32>
    %38 = arith.addf %36, %37 : vector<16x32xf32>
    %c0_20 = arith.constant 0 : index
    %c0_21 = arith.constant 0 : index
    %39 = vector.load %arg8[%c0_20, %c0_21] : memref<16x32xf32, #tpu.memory_space<vmem>>, vector<16x32xf32>
    tpu.vector_store %arg8[%c0_20, %c0_21], %38 {strides = array<i32>} : memref<16x32xf32, #tpu.memory_space<vmem>>, vector<16x32xf32>,
    return
  }
  func.func @transform_0(%arg0: i32) -> (i32, i32) {
    %c0_i32 = arith.constant 0 : i32
    %c0_i32_0 = arith.constant 0 : i32
    return %arg0, %c0_i32 : i32, i32
  }
  func.func @transform_1(%arg0: i32) -> (i32, i32) {
    %c0_i32 = arith.constant 0 : i32
    %c0_i32_0 = arith.constant 0 : i32
    %c0_i32_1 = arith.constant 0 : i32
    return %c0_i32, %c0_i32_0 : i32, i32
  }
  func.func @transform_2(%arg0: i32) -> (i32, i32) {
    %c0_i32 = arith.constant 0 : i32
    %c0_i32_0 = arith.constant 0 : i32
    %c0_i32_1 = arith.constant 0 : i32
    return %c0_i32, %c0_i32_0 : i32, i32
  }
  func.func @transform_3(%arg0: i32) -> (i32, i32) {
    %c0_i32 = arith.constant 0 : i32
    %c0_i32_0 = arith.constant 0 : i32
    %c0_i32_1 = arith.constant 0 : i32
    return %c0_i32, %c0_i32_0 : i32, i32
  }
  func.func @transform_4(%arg0: i32) -> (i32, i32) {
    %c0_i32 = arith.constant 0 : i32
    %c0_i32_0 = arith.constant 0 : i32
    %c0_i32_1 = arith.constant 0 : i32
    return %c0_i32, %c0_i32_0 : i32, i32
  }
  func.func @transform_5(%arg0: i32) -> (i32, i32) {
    %c0_i32 = arith.constant 0 : i32
    %c0_i32_0 = arith.constant 0 : i32
    %c0_i32_1 = arith.constant 0 : i32
    return %c0_i32, %c0_i32_0 : i32, i32
  }
  func.func @transform_6(%arg0: i32) -> (i32, i32) {
    %c0_i32 = arith.constant 0 : i32
    %c0_i32_0 = arith.constant 0 : i32
    %c0_i32_1 = arith.constant 0 : i32
    return %c0_i32, %c0_i32_0 : i32, i32
  }
  func.func @transform_7(%arg0: i32) -> (i32, i32) {
    %c0_i32 = arith.constant 0 : i32
    %c0_i32_0 = arith.constant 0 : i32
    return %arg0, %c0_i32 : i32, i32
  }
}

module attributes {stable_mosaic.version = 11 : i64} {
  func.func @_self_attn_ln_kernel(%arg0: i32, %arg1: memref<1x8x32xf32, #tpu.memory_space<vmem>>, %arg2: memref<1x8x1xf32, #tpu.memory_space<vmem>>, %arg3: memref<32x96xbf16, #tpu.memory_space<vmem>>, %arg4: memref<1x96xf32, #tpu.memory_space<vmem>>, %arg5: memref<32x32xbf16, #tpu.memory_space<vmem>>, %arg6: memref<1x32xf32, #tpu.memory_space<vmem>>, %arg7: memref<1x32xf32, #tpu.memory_space<vmem>>, %arg8: memref<1x32xf32, #tpu.memory_space<vmem>>, %arg9: memref<1x8x32xf32, #tpu.memory_space<vmem>>) attributes {dimension_semantics = [#tpu.dimension_semantics<parallel>], iteration_bounds = array<i64: 2>, scalar_prefetch = 0 : i64, scratch_operands = 0 : i64, tpu.core_type = #tpu.core_type<tc>, window_params = [{transform_indices = @transform_0, window_bounds = array<i64: 1, 8, 32>}, {transform_indices = @transform_1, window_bounds = array<i64: 1, 8, 1>}, {pipeline_mode = #tpu.pipeline_mode<synchronous>, transform_indices = @transform_2, window_bounds = array<i64: 32, 96>}, {pipeline_mode = #tpu.pipeline_mode<synchronous>, transform_indices = @transform_3, window_bounds = array<i64: 1, 96>}, {pipeline_mode = #tpu.pipeline_mode<synchronous>, transform_indices = @transform_4, window_bounds = array<i64: 32, 32>}, {pipeline_mode = #tpu.pipeline_mode<synchronous>, transform_indices = @transform_5, window_bounds = array<i64: 1, 32>}, {pipeline_mode = #tpu.pipeline_mode<synchronous>, transform_indices = @transform_6, window_bounds = array<i64: 1, 32>}, {pipeline_mode = #tpu.pipeline_mode<synchronous>, transform_indices = @transform_7, window_bounds = array<i64: 1, 32>}, {transform_indices = @transform_8, window_bounds = array<i64: 1, 8, 32>}]} {
    %c0 = arith.constant 0 : index
    %c0_0 = arith.constant 0 : index
    %c0_1 = arith.constant 0 : index
    %0 = vector.load %arg1[%c0, %c0_0, %c0_1] : memref<1x8x32xf32, #tpu.memory_space<vmem>>, vector<1x8x32xf32>
    %1 = vector.shape_cast %0 : vector<1x8x32xf32> to vector<8x32xf32>
    %2 = arith.truncf %1 : vector<8x32xf32> to vector<8x32xbf16>
    %c0_2 = arith.constant 0 : index
    %c0_3 = arith.constant 0 : index
    %3 = vector.load %arg3[%c0_2, %c0_3] : memref<32x96xbf16, #tpu.memory_space<vmem>>, vector<32x96xbf16>
    %cst = arith.constant dense<0.000000e+00> : vector<8x96xf32>
    %4 = tpu.matmul %2, %3, %cst {dimension_numbers = #tpu.dot_dimension_numbers<[1], [0], [0], [1], [0, 0, 1, 1], [], []>} : vector<8x32xbf16>, vector<32x96xbf16>, vector<8x96xf32> -> vector<8x96xf32>
    %c0_4 = arith.constant 0 : index
    %c0_5 = arith.constant 0 : index
    %5 = vector.load %arg4[%c0_4, %c0_5] : memref<1x96xf32, #tpu.memory_space<vmem>>, vector<1x96xf32>
    %6 = vector.broadcast %5 : vector<1x96xf32> to vector<8x96xf32>
    %7 = arith.addf %4, %6 : vector<8x96xf32>
    %8 = vector.extract_strided_slice %7 {offsets = [0, 0], sizes = [8, 32], strides = [1, 1]} : vector<8x96xf32> to vector<8x32xf32>
    %cst_6 = arith.constant 0.353553385 : f32
    %9 = vector.broadcast %cst_6 : f32 to vector<8x32xf32>
    %10 = arith.mulf %8, %9 : vector<8x32xf32>
    %11 = vector.extract_strided_slice %7 {offsets = [0, 32], sizes = [8, 32], strides = [1, 1]} : vector<8x96xf32> to vector<8x32xf32>
    %12 = vector.extract_strided_slice %7 {offsets = [0, 64], sizes = [8, 32], strides = [1, 1]} : vector<8x96xf32> to vector<8x32xf32>
    %c0_7 = arith.constant 0 : index
    %c0_8 = arith.constant 0 : index
    %c0_9 = arith.constant 0 : index
    %13 = vector.load %arg2[%c0_7, %c0_8, %c0_9] : memref<1x8x1xf32, #tpu.memory_space<vmem>>, vector<1x8x1xf32>
    %14 = vector.shape_cast %13 : vector<1x8x1xf32> to vector<8x1xf32>
    %c0_10 = arith.constant 0 : index
    %c0_11 = arith.constant 0 : index
    %15 = vector.load %arg5[%c0_10, %c0_11] : memref<32x32xbf16, #tpu.memory_space<vmem>>, vector<32x32xbf16>
    %16 = arith.truncf %10 : vector<8x32xf32> to vector<8x32xbf16>
    %17 = vector.shape_cast %16 : vector<8x32xbf16> to vector<8x4x8xbf16>
    %18 = tpu.transpose %17, [1, 0, 2] : vector<8x4x8xbf16> -> vector<4x8x8xbf16>
    %19 = arith.truncf %11 : vector<8x32xf32> to vector<8x32xbf16>
    %20 = vector.shape_cast %19 : vector<8x32xbf16> to vector<8x4x8xbf16>
    %21 = tpu.transpose %20, [1, 0, 2] : vector<8x4x8xbf16> -> vector<4x8x8xbf16>
    %22 = arith.truncf %12 : vector<8x32xf32> to vector<8x32xbf16>
    %23 = vector.shape_cast %22 : vector<8x32xbf16> to vector<8x4x8xbf16>
    %24 = tpu.transpose %23, [1, 0, 2] : vector<8x4x8xbf16> -> vector<4x8x8xbf16>
    "tpu.trace_start"() <{level = 10 : i32, message = "hqd,hkd->hqk"}> : () -> ()
    %cst_12 = arith.constant dense<0.000000e+00> : vector<4x8x8xf32>
    %25 = tpu.matmul %18, %21, %cst_12 {dimension_numbers = #tpu.dot_dimension_numbers<[2], [2], [1], [1], [0, 0, 0, 1, 1, 1], [0], [0]>} : vector<4x8x8xbf16>, vector<4x8x8xbf16>, vector<4x8x8xf32> -> vector<4x8x8xf32>
    %cst_13 = arith.constant 0.000000e+00 : f32
    "tpu.trace_stop"() : () -> ()
    %26 = vector.broadcast %cst_13 : f32 to vector<8x1xf32>
    %27 = arith.cmpf oeq, %14, %26 : vector<8x1xf32>
    %cst_14 = arith.constant -1.000000e+10 : f32
    %28 = vector.shape_cast %27 : vector<8x1xi1> to vector<1x8x1xi1>
    %29 = vector.broadcast %28 : vector<1x8x1xi1> to vector<4x8x8xi1>
    %30 = vector.broadcast %cst_14 : f32 to vector<4x8x8xf32>
    %31 = arith.select %29, %30, %25 : vector<4x8x8xi1>, vector<4x8x8xf32>
    %cst_15 = arith.constant dense<0xFF800000> : vector<4x8xf32>
    %32 = vector.multi_reduction <maximumf>, %31, %cst_15 [2] : vector<4x8x8xf32> to vector<4x8xf32>
    %33 = vector.shape_cast %32 : vector<4x8xf32> to vector<4x8x1xf32>
    %34 = vector.broadcast %33 : vector<4x8x1xf32> to vector<4x8x8xf32>
    %35 = arith.subf %31, %34 : vector<4x8x8xf32>
    %36 = math.exp %35 : vector<4x8x8xf32>
    %cst_16 = arith.constant dense<0.000000e+00> : vector<4x8xf32>
    %37 = vector.multi_reduction <add>, %36, %cst_16 [2] : vector<4x8x8xf32> to vector<4x8xf32>
    %38 = vector.shape_cast %37 : vector<4x8xf32> to vector<4x8x1xf32>
    %39 = tpu.reciprocal %38 {approx = true} : vector<4x8x1xf32> -> vector<4x8x1xf32>
    %40 = vector.broadcast %39 : vector<4x8x1xf32> to vector<4x8x8xf32>
    %41 = arith.mulf %36, %40 : vector<4x8x8xf32>
    %42 = arith.truncf %41 : vector<4x8x8xf32> to vector<4x8x8xbf16>
    "tpu.trace_start"() <{level = 10 : i32, message = "hqk,hkd->hqd"}> : () -> ()
    %cst_17 = arith.constant dense<0.000000e+00> : vector<4x8x8xf32>
    %43 = tpu.matmul %42, %24, %cst_17 {dimension_numbers = #tpu.dot_dimension_numbers<[2], [1], [1], [2], [0, 0, 0, 1, 1, 2], [0], [0]>} : vector<4x8x8xbf16>, vector<4x8x8xbf16>, vector<4x8x8xf32> -> vector<4x8x8xf32>
    "tpu.trace_stop"() : () -> ()
    %44 = tpu.transpose %43, [1, 0, 2] : vector<4x8x8xf32> -> vector<8x4x8xf32>
    %45 = vector.shape_cast %44 : vector<8x4x8xf32> to vector<8x32xf32>
    %46 = arith.truncf %45 : vector<8x32xf32> to vector<8x32xbf16>
    %cst_18 = arith.constant dense<0.000000e+00> : vector<8x32xf32>
    %47 = tpu.matmul %46, %15, %cst_18 {dimension_numbers = #tpu.dot_dimension_numbers<[1], [0], [0], [1], [0, 0, 1, 1], [], []>} : vector<8x32xbf16>, vector<32x32xbf16>, vector<8x32xf32> -> vector<8x32xf32>
    %48 = arith.addf %1, %47 : vector<8x32xf32>
    %c0_19 = arith.constant 0 : index
    %c0_20 = arith.constant 0 : index
    %49 = vector.load %arg6[%c0_19, %c0_20] : memref<1x32xf32, #tpu.memory_space<vmem>>, vector<1x32xf32>
    %50 = vector.broadcast %49 : vector<1x32xf32> to vector<8x32xf32>
    %51 = arith.addf %48, %50 : vector<8x32xf32>
    %c0_21 = arith.constant 0 : index
    %c0_22 = arith.constant 0 : index
    %52 = vector.load %arg7[%c0_21, %c0_22] : memref<1x32xf32, #tpu.memory_space<vmem>>, vector<1x32xf32>
    %c0_23 = arith.constant 0 : index
    %c0_24 = arith.constant 0 : index
    %53 = vector.load %arg8[%c0_23, %c0_24] : memref<1x32xf32, #tpu.memory_space<vmem>>, vector<1x32xf32>
    %cst_25 = arith.constant dense<0.000000e+00> : vector<8xf32>
    %54 = vector.multi_reduction <add>, %51, %cst_25 [1] : vector<8x32xf32> to vector<8xf32>
    %55 = vector.shape_cast %54 : vector<8xf32> to vector<8x1xf32>
    %cst_26 = arith.constant 3.200000e+01 : f32
    %56 = vector.broadcast %cst_26 : f32 to vector<8x1xf32>
    %57 = arith.divf %55, %56 : vector<8x1xf32>
    %58 = vector.broadcast %57 : vector<8x1xf32> to vector<8x32xf32>
    %59 = arith.subf %51, %58 : vector<8x32xf32>
    %60 = arith.mulf %59, %59 : vector<8x32xf32>
    %cst_27 = arith.constant dense<0.000000e+00> : vector<8xf32>
    %61 = vector.multi_reduction <add>, %60, %cst_27 [1] : vector<8x32xf32> to vector<8xf32>
    %62 = vector.shape_cast %61 : vector<8xf32> to vector<8x1xf32>
    %cst_28 = arith.constant 0.0322580636 : f32
    %63 = vector.broadcast %cst_28 : f32 to vector<8x1xf32>
    %64 = arith.mulf %62, %63 : vector<8x1xf32>
    %65 = math.sqrt %64 : vector<8x1xf32>
    %cst_29 = arith.constant 9.99999996E-13 : f32
    %66 = vector.broadcast %cst_29 : f32 to vector<8x1xf32>
    %67 = arith.addf %65, %66 : vector<8x1xf32>
    %68 = tpu.reciprocal %67 : vector<8x1xf32> -> vector<8x1xf32>
    %69 = vector.broadcast %68 : vector<8x1xf32> to vector<8x32xf32>
    %70 = arith.mulf %59, %69 : vector<8x32xf32>
    %71 = vector.broadcast %52 : vector<1x32xf32> to vector<8x32xf32>
    %72 = arith.mulf %70, %71 : vector<8x32xf32>
    %73 = vector.broadcast %53 : vector<1x32xf32> to vector<8x32xf32>
    %74 = arith.addf %72, %73 : vector<8x32xf32>
    %c0_30 = arith.constant 0 : index
    %c0_31 = arith.constant 0 : index
    %c0_32 = arith.constant 0 : index
    %75 = vector.load %arg9[%c0_30, %c0_31, %c0_32] : memref<1x8x32xf32, #tpu.memory_space<vmem>>, vector<1x8x32xf32>
    %76 = vector.shape_cast %75 : vector<1x8x32xf32> to vector<8x32xf32>
    %77 = vector.shape_cast %74 : vector<8x32xf32> to vector<1x8x32xf32>
    tpu.vector_store %arg9[%c0_30, %c0_31, %c0_32], %77 {strides = array<i32>} : memref<1x8x32xf32, #tpu.memory_space<vmem>>, vector<1x8x32xf32>,
    return
  }
  func.func @transform_0(%arg0: i32) -> (i32, i32, i32) {
    %c0_i32 = arith.constant 0 : i32
    %c0_i32_0 = arith.constant 0 : i32
    %c0_i32_1 = arith.constant 0 : i32
    return %arg0, %c0_i32, %c0_i32_0 : i32, i32, i32
  }
  func.func @transform_1(%arg0: i32) -> (i32, i32, i32) {
    %c0_i32 = arith.constant 0 : i32
    %c0_i32_0 = arith.constant 0 : i32
    %c0_i32_1 = arith.constant 0 : i32
    return %arg0, %c0_i32, %c0_i32_0 : i32, i32, i32
  }
  func.func @transform_2(%arg0: i32) -> (i32, i32) {
    %c0_i32 = arith.constant 0 : i32
    %c0_i32_0 = arith.constant 0 : i32
    %c0_i32_1 = arith.constant 0 : i32
    return %c0_i32, %c0_i32_0 : i32, i32
  }
  func.func @transform_3(%arg0: i32) -> (i32, i32) {
    %c0_i32 = arith.constant 0 : i32
    %c0_i32_0 = arith.constant 0 : i32
    %c0_i32_1 = arith.constant 0 : i32
    return %c0_i32, %c0_i32_0 : i32, i32
  }
  func.func @transform_4(%arg0: i32) -> (i32, i32) {
    %c0_i32 = arith.constant 0 : i32
    %c0_i32_0 = arith.constant 0 : i32
    %c0_i32_1 = arith.constant 0 : i32
    return %c0_i32, %c0_i32_0 : i32, i32
  }
  func.func @transform_5(%arg0: i32) -> (i32, i32) {
    %c0_i32 = arith.constant 0 : i32
    %c0_i32_0 = arith.constant 0 : i32
    %c0_i32_1 = arith.constant 0 : i32
    return %c0_i32, %c0_i32_0 : i32, i32
  }
  func.func @transform_6(%arg0: i32) -> (i32, i32) {
    %c0_i32 = arith.constant 0 : i32
    %c0_i32_0 = arith.constant 0 : i32
    %c0_i32_1 = arith.constant 0 : i32
    return %c0_i32, %c0_i32_0 : i32, i32
  }
  func.func @transform_7(%arg0: i32) -> (i32, i32) {
    %c0_i32 = arith.constant 0 : i32
    %c0_i32_0 = arith.constant 0 : i32
    %c0_i32_1 = arith.constant 0 : i32
    return %c0_i32, %c0_i32_0 : i32, i32
  }
  func.func @transform_8(%arg0: i32) -> (i32, i32, i32) {
    %c0_i32 = arith.constant 0 : i32
    %c0_i32_0 = arith.constant 0 : i32
    %c0_i32_1 = arith.constant 0 : i32
    return %arg0, %c0_i32, %c0_i32_0 : i32, i32, i32
  }
}

module attributes {stable_mosaic.version = 11 : i64} {
  func.func @_ffn_ln_kernel(%arg0: i32, %arg1: memref<16x32xf32, #tpu.memory_space<vmem>>, %arg2: memref<32x64xbf16, #tpu.memory_space<vmem>>, %arg3: memref<1x64xf32, #tpu.memory_space<vmem>>, %arg4: memref<64x32xbf16, #tpu.memory_space<vmem>>, %arg5: memref<1x32xf32, #tpu.memory_space<vmem>>, %arg6: memref<1x32xf32, #tpu.memory_space<vmem>>, %arg7: memref<1x32xf32, #tpu.memory_space<vmem>>, %arg8: memref<16x32xf32, #tpu.memory_space<vmem>>) attributes {dimension_semantics = [#tpu.dimension_semantics<parallel>], iteration_bounds = array<i64: 1>, scalar_prefetch = 0 : i64, scratch_operands = 0 : i64, tpu.core_type = #tpu.core_type<tc>, window_params = [{transform_indices = @transform_0, window_bounds = array<i64: 16, 32>}, {pipeline_mode = #tpu.pipeline_mode<synchronous>, transform_indices = @transform_1, window_bounds = array<i64: 32, 64>}, {pipeline_mode = #tpu.pipeline_mode<synchronous>, transform_indices = @transform_2, window_bounds = array<i64: 1, 64>}, {pipeline_mode = #tpu.pipeline_mode<synchronous>, transform_indices = @transform_3, window_bounds = array<i64: 64, 32>}, {pipeline_mode = #tpu.pipeline_mode<synchronous>, transform_indices = @transform_4, window_bounds = array<i64: 1, 32>}, {pipeline_mode = #tpu.pipeline_mode<synchronous>, transform_indices = @transform_5, window_bounds = array<i64: 1, 32>}, {pipeline_mode = #tpu.pipeline_mode<synchronous>, transform_indices = @transform_6, window_bounds = array<i64: 1, 32>}, {transform_indices = @transform_7, window_bounds = array<i64: 16, 32>}]} {
    %c0 = arith.constant 0 : index
    %c0_0 = arith.constant 0 : index
    %0 = vector.load %arg1[%c0, %c0_0] : memref<16x32xf32, #tpu.memory_space<vmem>>, vector<16x32xf32>
    %1 = arith.truncf %0 : vector<16x32xf32> to vector<16x32xbf16>
    %c0_1 = arith.constant 0 : index
    %c0_2 = arith.constant 0 : index
    %2 = vector.load %arg2[%c0_1, %c0_2] : memref<32x64xbf16, #tpu.memory_space<vmem>>, vector<32x64xbf16>
    %cst = arith.constant dense<0.000000e+00> : vector<16x64xf32>
    %3 = tpu.matmul %1, %2, %cst {dimension_numbers = #tpu.dot_dimension_numbers<[1], [0], [0], [1], [0, 0, 1, 1], [], []>} : vector<16x32xbf16>, vector<32x64xbf16>, vector<16x64xf32> -> vector<16x64xf32>
    %c0_3 = arith.constant 0 : index
    %c0_4 = arith.constant 0 : index
    %4 = vector.load %arg3[%c0_3, %c0_4] : memref<1x64xf32, #tpu.memory_space<vmem>>, vector<1x64xf32>
    %5 = vector.broadcast %4 : vector<1x64xf32> to vector<16x64xf32>
    %6 = arith.addf %3, %5 : vector<16x64xf32>
    %cst_5 = arith.constant 0.000000e+00 : f32
    %7 = vector.broadcast %cst_5 : f32 to vector<16x64xf32>
    %8 = arith.maximumf %6, %7 : vector<16x64xf32>
    %9 = arith.truncf %8 : vector<16x64xf32> to vector<16x64xbf16>
    %c0_6 = arith.constant 0 : index
    %c0_7 = arith.constant 0 : index
    %10 = vector.load %arg4[%c0_6, %c0_7] : memref<64x32xbf16, #tpu.memory_space<vmem>>, vector<64x32xbf16>
    %cst_8 = arith.constant dense<0.000000e+00> : vector<16x32xf32>
    %11 = tpu.matmul %9, %10, %cst_8 {dimension_numbers = #tpu.dot_dimension_numbers<[1], [0], [0], [1], [0, 0, 1, 1], [], []>} : vector<16x64xbf16>, vector<64x32xbf16>, vector<16x32xf32> -> vector<16x32xf32>
    %c0_9 = arith.constant 0 : index
    %c0_10 = arith.constant 0 : index
    %12 = vector.load %arg5[%c0_9, %c0_10] : memref<1x32xf32, #tpu.memory_space<vmem>>, vector<1x32xf32>
    %13 = vector.broadcast %12 : vector<1x32xf32> to vector<16x32xf32>
    %14 = arith.addf %11, %13 : vector<16x32xf32>
    %15 = arith.addf %0, %14 : vector<16x32xf32>
    %c0_11 = arith.constant 0 : index
    %c0_12 = arith.constant 0 : index
    %16 = vector.load %arg6[%c0_11, %c0_12] : memref<1x32xf32, #tpu.memory_space<vmem>>, vector<1x32xf32>
    %c0_13 = arith.constant 0 : index
    %c0_14 = arith.constant 0 : index
    %17 = vector.load %arg7[%c0_13, %c0_14] : memref<1x32xf32, #tpu.memory_space<vmem>>, vector<1x32xf32>
    %cst_15 = arith.constant dense<0.000000e+00> : vector<16xf32>
    %18 = vector.multi_reduction <add>, %15, %cst_15 [1] : vector<16x32xf32> to vector<16xf32>
    %19 = vector.shape_cast %18 : vector<16xf32> to vector<16x1xf32>
    %cst_16 = arith.constant 3.200000e+01 : f32
    %20 = vector.broadcast %cst_16 : f32 to vector<16x1xf32>
    %21 = arith.divf %19, %20 : vector<16x1xf32>
    %22 = vector.broadcast %21 : vector<16x1xf32> to vector<16x32xf32>
    %23 = arith.subf %15, %22 : vector<16x32xf32>
    %24 = arith.mulf %23, %23 : vector<16x32xf32>
    %cst_17 = arith.constant dense<0.000000e+00> : vector<16xf32>
    %25 = vector.multi_reduction <add>, %24, %cst_17 [1] : vector<16x32xf32> to vector<16xf32>
    %26 = vector.shape_cast %25 : vector<16xf32> to vector<16x1xf32>
    %cst_18 = arith.constant 0.0322580636 : f32
    %27 = vector.broadcast %cst_18 : f32 to vector<16x1xf32>
    %28 = arith.mulf %26, %27 : vector<16x1xf32>
    %29 = math.sqrt %28 : vector<16x1xf32>
    %cst_19 = arith.constant 9.99999996E-13 : f32
    %30 = vector.broadcast %cst_19 : f32 to vector<16x1xf32>
    %31 = arith.addf %29, %30 : vector<16x1xf32>
    %32 = tpu.reciprocal %31 : vector<16x1xf32> -> vector<16x1xf32>
    %33 = vector.broadcast %32 : vector<16x1xf32> to vector<16x32xf32>
    %34 = arith.mulf %23, %33 : vector<16x32xf32>
    %35 = vector.broadcast %16 : vector<1x32xf32> to vector<16x32xf32>
    %36 = arith.mulf %34, %35 : vector<16x32xf32>
    %37 = vector.broadcast %17 : vector<1x32xf32> to vector<16x32xf32>
    %38 = arith.addf %36, %37 : vector<16x32xf32>
    %c0_20 = arith.constant 0 : index
    %c0_21 = arith.constant 0 : index
    %39 = vector.load %arg8[%c0_20, %c0_21] : memref<16x32xf32, #tpu.memory_space<vmem>>, vector<16x32xf32>
    tpu.vector_store %arg8[%c0_20, %c0_21], %38 {strides = array<i32>} : memref<16x32xf32, #tpu.memory_space<vmem>>, vector<16x32xf32>,
    return
  }
  func.func @transform_0(%arg0: i32) -> (i32, i32) {
    %c0_i32 = arith.constant 0 : i32
    %c0_i32_0 = arith.constant 0 : i32
    return %arg0, %c0_i32 : i32, i32
  }
  func.func @transform_1(%arg0: i32) -> (i32, i32) {
    %c0_i32 = arith.constant 0 : i32
    %c0_i32_0 = arith.constant 0 : i32
    %c0_i32_1 = arith.constant 0 : i32
    return %c0_i32, %c0_i32_0 : i32, i32
  }
  func.func @transform_2(%arg0: i32) -> (i32, i32) {
    %c0_i32 = arith.constant 0 : i32
    %c0_i32_0 = arith.constant 0 : i32
    %c0_i32_1 = arith.constant 0 : i32
    return %c0_i32, %c0_i32_0 : i32, i32
  }
  func.func @transform_3(%arg0: i32) -> (i32, i32) {
    %c0_i32 = arith.constant 0 : i32
    %c0_i32_0 = arith.constant 0 : i32
    %c0_i32_1 = arith.constant 0 : i32
    return %c0_i32, %c0_i32_0 : i32, i32
  }
  func.func @transform_4(%arg0: i32) -> (i32, i32) {
    %c0_i32 = arith.constant 0 : i32
    %c0_i32_0 = arith.constant 0 : i32
    %c0_i32_1 = arith.constant 0 : i32
    return %c0_i32, %c0_i32_0 : i32, i32
  }
  func.func @transform_5(%arg0: i32) -> (i32, i32) {
    %c0_i32 = arith.constant 0 : i32
    %c0_i32_0 = arith.constant 0 : i32
    %c0_i32_1 = arith.constant 0 : i32
    return %c0_i32, %c0_i32_0 : i32, i32
  }
  func.func @transform_6(%arg0: i32) -> (i32, i32) {
    %c0_i32 = arith.constant 0 : i32
    %c0_i32_0 = arith.constant 0 : i32
    %c0_i32_1 = arith.constant 0 : i32
    return %c0_i32, %c0_i32_0 : i32, i32
  }
  func.func @transform_7(%arg0: i32) -> (i32, i32) {
    %c0_i32 = arith.constant 0 : i32
    %c0_i32_0 = arith.constant 0 : i32
    return %arg0, %c0_i32 : i32, i32
  }
}

module attributes {stable_mosaic.version = 11 : i64} {
  func.func @_cross_attn_ln_kernel(%arg0: i32, %arg1: memref<1x8x32xf32, #tpu.memory_space<vmem>>, %arg2: memref<1x8x32xbf16, #tpu.memory_space<vmem>>, %arg3: memref<1x1x8xf32, #tpu.memory_space<vmem>>, %arg4: memref<32x32xbf16, #tpu.memory_space<vmem>>, %arg5: memref<1x32xf32, #tpu.memory_space<vmem>>, %arg6: memref<32x64xbf16, #tpu.memory_space<vmem>>, %arg7: memref<1x64xf32, #tpu.memory_space<vmem>>, %arg8: memref<32x32xbf16, #tpu.memory_space<vmem>>, %arg9: memref<1x32xf32, #tpu.memory_space<vmem>>, %arg10: memref<1x32xf32, #tpu.memory_space<vmem>>, %arg11: memref<1x32xf32, #tpu.memory_space<vmem>>, %arg12: memref<1x8x32xf32, #tpu.memory_space<vmem>>) attributes {dimension_semantics = [#tpu.dimension_semantics<parallel>], iteration_bounds = array<i64: 2>, scalar_prefetch = 0 : i64, scratch_operands = 0 : i64, tpu.core_type = #tpu.core_type<tc>, window_params = [{transform_indices = @transform_0, window_bounds = array<i64: 1, 8, 32>}, {transform_indices = @transform_1, window_bounds = array<i64: 1, 8, 32>}, {transform_indices = @transform_2, window_bounds = array<i64: 1, 1, 8>}, {pipeline_mode = #tpu.pipeline_mode<synchronous>, transform_indices = @transform_3, window_bounds = array<i64: 32, 32>}, {pipeline_mode = #tpu.pipeline_mode<synchronous>, transform_indices = @transform_4, window_bounds = array<i64: 1, 32>}, {pipeline_mode = #tpu.pipeline_mode<synchronous>, transform_indices = @transform_5, window_bounds = array<i64: 32, 64>}, {pipeline_mode = #tpu.pipeline_mode<synchronous>, transform_indices = @transform_6, window_bounds = array<i64: 1, 64>}, {pipeline_mode = #tpu.pipeline_mode<synchronous>, transform_indices = @transform_7, window_bounds = array<i64: 32, 32>}, {pipeline_mode = #tpu.pipeline_mode<synchronous>, transform_indices = @transform_8, window_bounds = array<i64: 1, 32>}, {pipeline_mode = #tpu.pipeline_mode<synchronous>, transform_indices = @transform_9, window_bounds = array<i64: 1, 32>}, {pipeline_mode = #tpu.pipeline_mode<synchronous>, transform_indices = @transform_10, window_bounds = array<i64: 1, 32>}, {transform_indices = @transform_11, window_bounds = array<i64: 1, 8, 32>}]} {
    %c0 = arith.constant 0 : index
    %c0_0 = arith.constant 0 : index
    %c0_1 = arith.constant 0 : index
    %0 = vector.load %arg1[%c0, %c0_0, %c0_1] : memref<1x8x32xf32, #tpu.memory_space<vmem>>, vector<1x8x32xf32>
    %1 = vector.shape_cast %0 : vector<1x8x32xf32> to vector<8x32xf32>
    %2 = arith.truncf %1 : vector<8x32xf32> to vector<8x32xbf16>
    %c0_2 = arith.constant 0 : index
    %c0_3 = arith.constant 0 : index
    %3 = vector.load %arg4[%c0_2, %c0_3] : memref<32x32xbf16, #tpu.memory_space<vmem>>, vector<32x32xbf16>
    %cst = arith.constant dense<0.000000e+00> : vector<8x32xf32>
    %4 = tpu.matmul %2, %3, %cst {dimension_numbers = #tpu.dot_dimension_numbers<[1], [0], [0], [1], [0, 0, 1, 1], [], []>} : vector<8x32xbf16>, vector<32x32xbf16>, vector<8x32xf32> -> vector<8x32xf32>
    %c0_4 = arith.constant 0 : index
    %c0_5 = arith.constant 0 : index
    %5 = vector.load %arg5[%c0_4, %c0_5] : memref<1x32xf32, #tpu.memory_space<vmem>>, vector<1x32xf32>
    %6 = vector.broadcast %5 : vector<1x32xf32> to vector<8x32xf32>
    %7 = arith.addf %4, %6 : vector<8x32xf32>
    %cst_6 = arith.constant 0.353553385 : f32
    %8 = vector.broadcast %cst_6 : f32 to vector<8x32xf32>
    %9 = arith.mulf %7, %8 : vector<8x32xf32>
    %c0_7 = arith.constant 0 : index
    %c0_8 = arith.constant 0 : index
    %c0_9 = arith.constant 0 : index
    %10 = vector.load %arg2[%c0_7, %c0_8, %c0_9] : memref<1x8x32xbf16, #tpu.memory_space<vmem>>, vector<1x8x32xbf16>
    %11 = vector.shape_cast %10 : vector<1x8x32xbf16> to vector<8x32xbf16>
    %c0_10 = arith.constant 0 : index
    %c0_11 = arith.constant 0 : index
    %12 = vector.load %arg6[%c0_10, %c0_11] : memref<32x64xbf16, #tpu.memory_space<vmem>>, vector<32x64xbf16>
    %cst_12 = arith.constant dense<0.000000e+00> : vector<8x64xf32>
    %13 = tpu.matmul %11, %12, %cst_12 {dimension_numbers = #tpu.dot_dimension_numbers<[1], [0], [0], [1], [0, 0, 1, 1], [], []>} : vector<8x32xbf16>, vector<32x64xbf16>, vector<8x64xf32> -> vector<8x64xf32>
    %c0_13 = arith.constant 0 : index
    %c0_14 = arith.constant 0 : index
    %14 = vector.load %arg7[%c0_13, %c0_14] : memref<1x64xf32, #tpu.memory_space<vmem>>, vector<1x64xf32>
    %15 = vector.broadcast %14 : vector<1x64xf32> to vector<8x64xf32>
    %16 = arith.addf %13, %15 : vector<8x64xf32>
    %17 = vector.extract_strided_slice %16 {offsets = [0, 0], sizes = [8, 32], strides = [1, 1]} : vector<8x64xf32> to vector<8x32xf32>
    %18 = vector.extract_strided_slice %16 {offsets = [0, 32], sizes = [8, 32], strides = [1, 1]} : vector<8x64xf32> to vector<8x32xf32>
    %c0_15 = arith.constant 0 : index
    %c0_16 = arith.constant 0 : index
    %c0_17 = arith.constant 0 : index
    %19 = vector.load %arg3[%c0_15, %c0_16, %c0_17] : memref<1x1x8xf32, #tpu.memory_space<vmem>>, vector<1x1x8xf32>
    %20 = vector.shape_cast %19 : vector<1x1x8xf32> to vector<1x8xf32>
    %c0_18 = arith.constant 0 : index
    %c0_19 = arith.constant 0 : index
    %21 = vector.load %arg8[%c0_18, %c0_19] : memref<32x32xbf16, #tpu.memory_space<vmem>>, vector<32x32xbf16>
    %22 = arith.truncf %9 : vector<8x32xf32> to vector<8x32xbf16>
    %23 = vector.shape_cast %22 : vector<8x32xbf16> to vector<8x4x8xbf16>
    %24 = tpu.transpose %23, [1, 0, 2] : vector<8x4x8xbf16> -> vector<4x8x8xbf16>
    %25 = arith.truncf %17 : vector<8x32xf32> to vector<8x32xbf16>
    %26 = vector.shape_cast %25 : vector<8x32xbf16> to vector<8x4x8xbf16>
    %27 = tpu.transpose %26, [1, 0, 2] : vector<8x4x8xbf16> -> vector<4x8x8xbf16>
    %28 = arith.truncf %18 : vector<8x32xf32> to vector<8x32xbf16>
    %29 = vector.shape_cast %28 : vector<8x32xbf16> to vector<8x4x8xbf16>
    %30 = tpu.transpose %29, [1, 0, 2] : vector<8x4x8xbf16> -> vector<4x8x8xbf16>
    "tpu.trace_start"() <{level = 10 : i32, message = "hqd,hkd->hqk"}> : () -> ()
    %cst_20 = arith.constant dense<0.000000e+00> : vector<4x8x8xf32>
    %31 = tpu.matmul %24, %27, %cst_20 {dimension_numbers = #tpu.dot_dimension_numbers<[2], [2], [1], [1], [0, 0, 0, 1, 1, 1], [0], [0]>} : vector<4x8x8xbf16>, vector<4x8x8xbf16>, vector<4x8x8xf32> -> vector<4x8x8xf32>
    %cst_21 = arith.constant 0.000000e+00 : f32
    "tpu.trace_stop"() : () -> ()
    %32 = vector.broadcast %cst_21 : f32 to vector<1x8xf32>
    %33 = arith.cmpf oeq, %20, %32 : vector<1x8xf32>
    %cst_22 = arith.constant -1.000000e+10 : f32
    %34 = vector.shape_cast %33 : vector<1x8xi1> to vector<1x1x8xi1>
    %35 = vector.broadcast %34 : vector<1x1x8xi1> to vector<4x8x8xi1>
    %36 = vector.broadcast %cst_22 : f32 to vector<4x8x8xf32>
    %37 = arith.select %35, %36, %31 : vector<4x8x8xi1>, vector<4x8x8xf32>
    %cst_23 = arith.constant dense<0xFF800000> : vector<4x8xf32>
    %38 = vector.multi_reduction <maximumf>, %37, %cst_23 [2] : vector<4x8x8xf32> to vector<4x8xf32>
    %39 = vector.shape_cast %38 : vector<4x8xf32> to vector<4x8x1xf32>
    %40 = vector.broadcast %39 : vector<4x8x1xf32> to vector<4x8x8xf32>
    %41 = arith.subf %37, %40 : vector<4x8x8xf32>
    %42 = math.exp %41 : vector<4x8x8xf32>
    %cst_24 = arith.constant dense<0.000000e+00> : vector<4x8xf32>
    %43 = vector.multi_reduction <add>, %42, %cst_24 [2] : vector<4x8x8xf32> to vector<4x8xf32>
    %44 = vector.shape_cast %43 : vector<4x8xf32> to vector<4x8x1xf32>
    %45 = tpu.reciprocal %44 {approx = true} : vector<4x8x1xf32> -> vector<4x8x1xf32>
    %46 = vector.broadcast %45 : vector<4x8x1xf32> to vector<4x8x8xf32>
    %47 = arith.mulf %42, %46 : vector<4x8x8xf32>
    %48 = arith.truncf %47 : vector<4x8x8xf32> to vector<4x8x8xbf16>
    "tpu.trace_start"() <{level = 10 : i32, message = "hqk,hkd->hqd"}> : () -> ()
    %cst_25 = arith.constant dense<0.000000e+00> : vector<4x8x8xf32>
    %49 = tpu.matmul %48, %30, %cst_25 {dimension_numbers = #tpu.dot_dimension_numbers<[2], [1], [1], [2], [0, 0, 0, 1, 1, 2], [0], [0]>} : vector<4x8x8xbf16>, vector<4x8x8xbf16>, vector<4x8x8xf32> -> vector<4x8x8xf32>
    "tpu.trace_stop"() : () -> ()
    %50 = tpu.transpose %49, [1, 0, 2] : vector<4x8x8xf32> -> vector<8x4x8xf32>
    %51 = vector.shape_cast %50 : vector<8x4x8xf32> to vector<8x32xf32>
    %52 = arith.truncf %51 : vector<8x32xf32> to vector<8x32xbf16>
    %cst_26 = arith.constant dense<0.000000e+00> : vector<8x32xf32>
    %53 = tpu.matmul %52, %21, %cst_26 {dimension_numbers = #tpu.dot_dimension_numbers<[1], [0], [0], [1], [0, 0, 1, 1], [], []>} : vector<8x32xbf16>, vector<32x32xbf16>, vector<8x32xf32> -> vector<8x32xf32>
    %54 = arith.addf %1, %53 : vector<8x32xf32>
    %c0_27 = arith.constant 0 : index
    %c0_28 = arith.constant 0 : index
    %55 = vector.load %arg9[%c0_27, %c0_28] : memref<1x32xf32, #tpu.memory_space<vmem>>, vector<1x32xf32>
    %56 = vector.broadcast %55 : vector<1x32xf32> to vector<8x32xf32>
    %57 = arith.addf %54, %56 : vector<8x32xf32>
    %c0_29 = arith.constant 0 : index
    %c0_30 = arith.constant 0 : index
    %58 = vector.load %arg10[%c0_29, %c0_30] : memref<1x32xf32, #tpu.memory_space<vmem>>, vector<1x32xf32>
    %c0_31 = arith.constant 0 : index
    %c0_32 = arith.constant 0 : index
    %59 = vector.load %arg11[%c0_31, %c0_32] : memref<1x32xf32, #tpu.memory_space<vmem>>, vector<1x32xf32>
    %cst_33 = arith.constant dense<0.000000e+00> : vector<8xf32>
    %60 = vector.multi_reduction <add>, %57, %cst_33 [1] : vector<8x32xf32> to vector<8xf32>
    %61 = vector.shape_cast %60 : vector<8xf32> to vector<8x1xf32>
    %cst_34 = arith.constant 3.200000e+01 : f32
    %62 = vector.broadcast %cst_34 : f32 to vector<8x1xf32>
    %63 = arith.divf %61, %62 : vector<8x1xf32>
    %64 = vector.broadcast %63 : vector<8x1xf32> to vector<8x32xf32>
    %65 = arith.subf %57, %64 : vector<8x32xf32>
    %66 = arith.mulf %65, %65 : vector<8x32xf32>
    %cst_35 = arith.constant dense<0.000000e+00> : vector<8xf32>
    %67 = vector.multi_reduction <add>, %66, %cst_35 [1] : vector<8x32xf32> to vector<8xf32>
    %68 = vector.shape_cast %67 : vector<8xf32> to vector<8x1xf32>
    %cst_36 = arith.constant 0.0322580636 : f32
    %69 = vector.broadcast %cst_36 : f32 to vector<8x1xf32>
    %70 = arith.mulf %68, %69 : vector<8x1xf32>
    %71 = math.sqrt %70 : vector<8x1xf32>
    %cst_37 = arith.constant 9.99999996E-13 : f32
    %72 = vector.broadcast %cst_37 : f32 to vector<8x1xf32>
    %73 = arith.addf %71, %72 : vector<8x1xf32>
    %74 = tpu.reciprocal %73 : vector<8x1xf32> -> vector<8x1xf32>
    %75 = vector.broadcast %74 : vector<8x1xf32> to vector<8x32xf32>
    %76 = arith.mulf %65, %75 : vector<8x32xf32>
    %77 = vector.broadcast %58 : vector<1x32xf32> to vector<8x32xf32>
    %78 = arith.mulf %76, %77 : vector<8x32xf32>
    %79 = vector.broadcast %59 : vector<1x32xf32> to vector<8x32xf32>
    %80 = arith.addf %78, %79 : vector<8x32xf32>
    %c0_38 = arith.constant 0 : index
    %c0_39 = arith.constant 0 : index
    %c0_40 = arith.constant 0 : index
    %81 = vector.load %arg12[%c0_38, %c0_39, %c0_40] : memref<1x8x32xf32, #tpu.memory_space<vmem>>, vector<1x8x32xf32>
    %82 = vector.shape_cast %81 : vector<1x8x32xf32> to vector<8x32xf32>
    %83 = vector.shape_cast %80 : vector<8x32xf32> to vector<1x8x32xf32>
    tpu.vector_store %arg12[%c0_38, %c0_39, %c0_40], %83 {strides = array<i32>} : memref<1x8x32xf32, #tpu.memory_space<vmem>>, vector<1x8x32xf32>,
    return
  }
  func.func @transform_0(%arg0: i32) -> (i32, i32, i32) {
    %c0_i32 = arith.constant 0 : i32
    %c0_i32_0 = arith.constant 0 : i32
    %c0_i32_1 = arith.constant 0 : i32
    return %arg0, %c0_i32, %c0_i32_0 : i32, i32, i32
  }
  func.func @transform_1(%arg0: i32) -> (i32, i32, i32) {
    %c0_i32 = arith.constant 0 : i32
    %c0_i32_0 = arith.constant 0 : i32
    %c0_i32_1 = arith.constant 0 : i32
    return %arg0, %c0_i32, %c0_i32_0 : i32, i32, i32
  }
  func.func @transform_2(%arg0: i32) -> (i32, i32, i32) {
    %c0_i32 = arith.constant 0 : i32
    %c0_i32_0 = arith.constant 0 : i32
    %c0_i32_1 = arith.constant 0 : i32
    return %arg0, %c0_i32, %c0_i32_0 : i32, i32, i32
  }
  func.func @transform_3(%arg0: i32) -> (i32, i32) {
    %c0_i32 = arith.constant 0 : i32
    %c0_i32_0 = arith.constant 0 : i32
    %c0_i32_1 = arith.constant 0 : i32
    return %c0_i32, %c0_i32_0 : i32, i32
  }
  func.func @transform_4(%arg0: i32) -> (i32, i32) {
    %c0_i32 = arith.constant 0 : i32
    %c0_i32_0 = arith.constant 0 : i32
    %c0_i32_1 = arith.constant 0 : i32
    return %c0_i32, %c0_i32_0 : i32, i32
  }
  func.func @transform_5(%arg0: i32) -> (i32, i32) {
    %c0_i32 = arith.constant 0 : i32
    %c0_i32_0 = arith.constant 0 : i32
    %c0_i32_1 = arith.constant 0 : i32
    return %c0_i32, %c0_i32_0 : i32, i32
  }
  func.func @transform_6(%arg0: i32) -> (i32, i32) {
    %c0_i32 = arith.constant 0 : i32
    %c0_i32_0 = arith.constant 0 : i32
    %c0_i32_1 = arith.constant 0 : i32
    return %c0_i32, %c0_i32_0 : i32, i32
  }
  func.func @transform_7(%arg0: i32) -> (i32, i32) {
    %c0_i32 = arith.constant 0 : i32
    %c0_i32_0 = arith.constant 0 : i32
    %c0_i32_1 = arith.constant 0 : i32
    return %c0_i32, %c0_i32_0 : i32, i32
  }
  func.func @transform_8(%arg0: i32) -> (i32, i32) {
    %c0_i32 = arith.constant 0 : i32
    %c0_i32_0 = arith.constant 0 : i32
    %c0_i32_1 = arith.constant 0 : i32
    return %c0_i32, %c0_i32_0 : i32, i32
  }
  func.func @transform_9(%arg0: i32) -> (i32, i32) {
    %c0_i32 = arith.constant 0 : i32
    %c0_i32_0 = arith.constant 0 : i32
    %c0_i32_1 = arith.constant 0 : i32
    return %c0_i32, %c0_i32_0 : i32, i32
  }
  func.func @transform_10(%arg0: i32) -> (i32, i32) {
    %c0_i32 = arith.constant 0 : i32
    %c0_i32_0 = arith.constant 0 : i32
    %c0_i32_1 = arith.constant 0 : i32
    return %c0_i32, %c0_i32_0 : i32, i32
  }
  func.func @transform_11(%arg0: i32) -> (i32, i32, i32) {
    %c0_i32 = arith.constant 0 : i32
    %c0_i32_0 = arith.constant 0 : i32
    %c0_i32_1 = arith.constant 0 : i32
    return %arg0, %c0_i32, %c0_i32_0 : i32, i32, i32
  }
}

module attributes {stable_mosaic.version = 11 : i64} {
  func.func @_pool_head_kernel(%arg0: i32, %arg1: memref<1x8x32xf32, #tpu.memory_space<vmem>>, %arg2: memref<1x8x1xf32, #tpu.memory_space<vmem>>, %arg3: memref<32x256xbf16, #tpu.memory_space<vmem>>, %arg4: memref<1x256xf32, #tpu.memory_space<vmem>>, %arg5: memref<256x64xbf16, #tpu.memory_space<vmem>>, %arg6: memref<1x64xf32, #tpu.memory_space<vmem>>, %arg7: memref<64x32xbf16, #tpu.memory_space<vmem>>, %arg8: memref<1x32xf32, #tpu.memory_space<vmem>>, %arg9: memref<32x1xbf16, #tpu.memory_space<vmem>>, %arg10: memref<1x1xf32, #tpu.memory_space<vmem>>, %arg11: memref<1x1x1xf32, #tpu.memory_space<vmem>>) attributes {dimension_semantics = [#tpu.dimension_semantics<parallel>], iteration_bounds = array<i64: 2>, scalar_prefetch = 0 : i64, scratch_operands = 0 : i64, tpu.core_type = #tpu.core_type<tc>, window_params = [{transform_indices = @transform_0, window_bounds = array<i64: 1, 8, 32>}, {transform_indices = @transform_1, window_bounds = array<i64: 1, 8, 1>}, {pipeline_mode = #tpu.pipeline_mode<synchronous>, transform_indices = @transform_2, window_bounds = array<i64: 32, 256>}, {pipeline_mode = #tpu.pipeline_mode<synchronous>, transform_indices = @transform_3, window_bounds = array<i64: 1, 256>}, {pipeline_mode = #tpu.pipeline_mode<synchronous>, transform_indices = @transform_4, window_bounds = array<i64: 256, 64>}, {pipeline_mode = #tpu.pipeline_mode<synchronous>, transform_indices = @transform_5, window_bounds = array<i64: 1, 64>}, {pipeline_mode = #tpu.pipeline_mode<synchronous>, transform_indices = @transform_6, window_bounds = array<i64: 64, 32>}, {pipeline_mode = #tpu.pipeline_mode<synchronous>, transform_indices = @transform_7, window_bounds = array<i64: 1, 32>}, {pipeline_mode = #tpu.pipeline_mode<synchronous>, transform_indices = @transform_8, window_bounds = array<i64: 32, 1>}, {pipeline_mode = #tpu.pipeline_mode<synchronous>, transform_indices = @transform_9, window_bounds = array<i64: 1, 1>}, {transform_indices = @transform_10, window_bounds = array<i64: 1, 1, 1>}]} {
    %c0 = arith.constant 0 : index
    %c0_0 = arith.constant 0 : index
    %c0_1 = arith.constant 0 : index
    %0 = vector.load %arg1[%c0, %c0_0, %c0_1] : memref<1x8x32xf32, #tpu.memory_space<vmem>>, vector<1x8x32xf32>
    %1 = vector.shape_cast %0 : vector<1x8x32xf32> to vector<8x32xf32>
    %c0_2 = arith.constant 0 : index
    %c0_3 = arith.constant 0 : index
    %c0_4 = arith.constant 0 : index
    %2 = vector.load %arg2[%c0_2, %c0_3, %c0_4] : memref<1x8x1xf32, #tpu.memory_space<vmem>>, vector<1x8x1xf32>
    %3 = vector.shape_cast %2 : vector<1x8x1xf32> to vector<8x1xf32>
    %4 = vector.broadcast %3 : vector<8x1xf32> to vector<8x32xf32>
    %5 = arith.mulf %1, %4 : vector<8x32xf32>
    %cst = arith.constant dense<0.000000e+00> : vector<32xf32>
    %6 = vector.multi_reduction <add>, %5, %cst [0] : vector<8x32xf32> to vector<32xf32>
    %7 = vector.shape_cast %6 : vector<32xf32> to vector<1x32xf32>
    %cst_5 = arith.constant dense<0.000000e+00> : vector<1xf32>
    %8 = vector.multi_reduction <add>, %3, %cst_5 [0] : vector<8x1xf32> to vector<1xf32>
    %9 = vector.shape_cast %8 : vector<1xf32> to vector<1x1xf32>
    %10 = vector.broadcast %9 : vector<1x1xf32> to vector<1x32xf32>
    %11 = arith.divf %7, %10 : vector<1x32xf32>
    %12 = arith.truncf %11 : vector<1x32xf32> to vector<1x32xbf16>
    %c0_6 = arith.constant 0 : index
    %c0_7 = arith.constant 0 : index
    %13 = vector.load %arg3[%c0_6, %c0_7] : memref<32x256xbf16, #tpu.memory_space<vmem>>, vector<32x256xbf16>
    %cst_8 = arith.constant dense<0.000000e+00> : vector<1x256xf32>
    %14 = tpu.matmul %12, %13, %cst_8 {dimension_numbers = #tpu.dot_dimension_numbers<[1], [0], [0], [1], [0, 0, 1, 1], [], []>} : vector<1x32xbf16>, vector<32x256xbf16>, vector<1x256xf32> -> vector<1x256xf32>
    %c0_9 = arith.constant 0 : index
    %c0_10 = arith.constant 0 : index
    %15 = vector.load %arg4[%c0_9, %c0_10] : memref<1x256xf32, #tpu.memory_space<vmem>>, vector<1x256xf32>
    %16 = arith.addf %14, %15 : vector<1x256xf32>
    %cst_11 = arith.constant 0.000000e+00 : f32
    %17 = vector.broadcast %cst_11 : f32 to vector<1x256xf32>
    %18 = arith.maximumf %16, %17 : vector<1x256xf32>
    %19 = arith.truncf %18 : vector<1x256xf32> to vector<1x256xbf16>
    %c0_12 = arith.constant 0 : index
    %c0_13 = arith.constant 0 : index
    %20 = vector.load %arg5[%c0_12, %c0_13] : memref<256x64xbf16, #tpu.memory_space<vmem>>, vector<256x64xbf16>
    %cst_14 = arith.constant dense<0.000000e+00> : vector<1x64xf32>
    %21 = tpu.matmul %19, %20, %cst_14 {dimension_numbers = #tpu.dot_dimension_numbers<[1], [0], [0], [1], [0, 0, 1, 1], [], []>} : vector<1x256xbf16>, vector<256x64xbf16>, vector<1x64xf32> -> vector<1x64xf32>
    %c0_15 = arith.constant 0 : index
    %c0_16 = arith.constant 0 : index
    %22 = vector.load %arg6[%c0_15, %c0_16] : memref<1x64xf32, #tpu.memory_space<vmem>>, vector<1x64xf32>
    %23 = arith.addf %21, %22 : vector<1x64xf32>
    %cst_17 = arith.constant 0.000000e+00 : f32
    %24 = vector.broadcast %cst_17 : f32 to vector<1x64xf32>
    %25 = arith.maximumf %23, %24 : vector<1x64xf32>
    %26 = arith.truncf %25 : vector<1x64xf32> to vector<1x64xbf16>
    %c0_18 = arith.constant 0 : index
    %c0_19 = arith.constant 0 : index
    %27 = vector.load %arg7[%c0_18, %c0_19] : memref<64x32xbf16, #tpu.memory_space<vmem>>, vector<64x32xbf16>
    %cst_20 = arith.constant dense<0.000000e+00> : vector<1x32xf32>
    %28 = tpu.matmul %26, %27, %cst_20 {dimension_numbers = #tpu.dot_dimension_numbers<[1], [0], [0], [1], [0, 0, 1, 1], [], []>} : vector<1x64xbf16>, vector<64x32xbf16>, vector<1x32xf32> -> vector<1x32xf32>
    %c0_21 = arith.constant 0 : index
    %c0_22 = arith.constant 0 : index
    %29 = vector.load %arg8[%c0_21, %c0_22] : memref<1x32xf32, #tpu.memory_space<vmem>>, vector<1x32xf32>
    %30 = arith.addf %28, %29 : vector<1x32xf32>
    %cst_23 = arith.constant 0.000000e+00 : f32
    %31 = vector.broadcast %cst_23 : f32 to vector<1x32xf32>
    %32 = arith.maximumf %30, %31 : vector<1x32xf32>
    %33 = arith.truncf %32 : vector<1x32xf32> to vector<1x32xbf16>
    %c0_24 = arith.constant 0 : index
    %c0_25 = arith.constant 0 : index
    %34 = vector.load %arg9[%c0_24, %c0_25] : memref<32x1xbf16, #tpu.memory_space<vmem>>, vector<32x1xbf16>
    %cst_26 = arith.constant dense<0.000000e+00> : vector<1x1xf32>
    %35 = tpu.matmul %33, %34, %cst_26 {dimension_numbers = #tpu.dot_dimension_numbers<[1], [0], [0], [1], [0, 0, 1, 1], [], []>} : vector<1x32xbf16>, vector<32x1xbf16>, vector<1x1xf32> -> vector<1x1xf32>
    %c0_27 = arith.constant 0 : index
    %c0_28 = arith.constant 0 : index
    %36 = vector.load %arg10[%c0_27, %c0_28] : memref<1x1xf32, #tpu.memory_space<vmem>>, vector<1x1xf32>
    %37 = arith.addf %35, %36 : vector<1x1xf32>
    %c0_29 = arith.constant 0 : index
    %c0_30 = arith.constant 0 : index
    %c0_31 = arith.constant 0 : index
    %38 = vector.load %arg11[%c0_29, %c0_30, %c0_31] : memref<1x1x1xf32, #tpu.memory_space<vmem>>, vector<1x1x1xf32>
    %39 = vector.shape_cast %38 : vector<1x1x1xf32> to vector<1x1xf32>
    %40 = vector.shape_cast %37 : vector<1x1xf32> to vector<1x1x1xf32>
    tpu.vector_store %arg11[%c0_29, %c0_30, %c0_31], %40 {strides = array<i32>} : memref<1x1x1xf32, #tpu.memory_space<vmem>>, vector<1x1x1xf32>,
    return
  }
  func.func @transform_0(%arg0: i32) -> (i32, i32, i32) {
    %c0_i32 = arith.constant 0 : i32
    %c0_i32_0 = arith.constant 0 : i32
    %c0_i32_1 = arith.constant 0 : i32
    return %arg0, %c0_i32, %c0_i32_0 : i32, i32, i32
  }
  func.func @transform_1(%arg0: i32) -> (i32, i32, i32) {
    %c0_i32 = arith.constant 0 : i32
    %c0_i32_0 = arith.constant 0 : i32
    %c0_i32_1 = arith.constant 0 : i32
    return %arg0, %c0_i32, %c0_i32_0 : i32, i32, i32
  }
  func.func @transform_2(%arg0: i32) -> (i32, i32) {
    %c0_i32 = arith.constant 0 : i32
    %c0_i32_0 = arith.constant 0 : i32
    %c0_i32_1 = arith.constant 0 : i32
    return %c0_i32, %c0_i32_0 : i32, i32
  }
  func.func @transform_3(%arg0: i32) -> (i32, i32) {
    %c0_i32 = arith.constant 0 : i32
    %c0_i32_0 = arith.constant 0 : i32
    %c0_i32_1 = arith.constant 0 : i32
    return %c0_i32, %c0_i32_0 : i32, i32
  }
  func.func @transform_4(%arg0: i32) -> (i32, i32) {
    %c0_i32 = arith.constant 0 : i32
    %c0_i32_0 = arith.constant 0 : i32
    %c0_i32_1 = arith.constant 0 : i32
    return %c0_i32, %c0_i32_0 : i32, i32
  }
  func.func @transform_5(%arg0: i32) -> (i32, i32) {
    %c0_i32 = arith.constant 0 : i32
    %c0_i32_0 = arith.constant 0 : i32
    %c0_i32_1 = arith.constant 0 : i32
    return %c0_i32, %c0_i32_0 : i32, i32
  }
  func.func @transform_6(%arg0: i32) -> (i32, i32) {
    %c0_i32 = arith.constant 0 : i32
    %c0_i32_0 = arith.constant 0 : i32
    %c0_i32_1 = arith.constant 0 : i32
    return %c0_i32, %c0_i32_0 : i32, i32
  }
  func.func @transform_7(%arg0: i32) -> (i32, i32) {
    %c0_i32 = arith.constant 0 : i32
    %c0_i32_0 = arith.constant 0 : i32
    %c0_i32_1 = arith.constant 0 : i32
    return %c0_i32, %c0_i32_0 : i32, i32
  }
  func.func @transform_8(%arg0: i32) -> (i32, i32) {
    %c0_i32 = arith.constant 0 : i32
    %c0_i32_0 = arith.constant 0 : i32
    %c0_i32_1 = arith.constant 0 : i32
    return %c0_i32, %c0_i32_0 : i32, i32
  }
  func.func @transform_9(%arg0: i32) -> (i32, i32) {
    %c0_i32 = arith.constant 0 : i32
    %c0_i32_0 = arith.constant 0 : i32
    %c0_i32_1 = arith.constant 0 : i32
    return %c0_i32, %c0_i32_0 : i32, i32
  }
  func.func @transform_10(%arg0: i32) -> (i32, i32, i32) {
    %c0_i32 = arith.constant 0 : i32
    %c0_i32_0 = arith.constant 0 : i32
    %c0_i32_1 = arith.constant 0 : i32
    return %arg0, %c0_i32, %c0_i32_0 : i32, i32, i32
  }
}

</mosaic_0001>

<bundles_post_ra>
// kernel: decoder_forward.8
= control target key start
LH: loop header
LB: loop body
LE: loop exit
PB: predicated region body
PF: predicated region fallthrough
CT: control target
= control target key end

     0   :  { %8 = vsyncpa [#allocation3], 0  ;;  %s116_s15 = smov [#allocation2]   ;;  %s158_s0 = inlined_call_operand.vmem [shape: f32[16,32], index: 0, kind: input, shape index: {}]   ;;  %s159_s1 = inlined_call_operand.vmem [shape: bf16[32,32], index: 1, kind: input, shape index: {}]   ;;  %s160_s2 = inlined_call_operand.hbm [shape: f32[1,32], index: 2, kind: input, shape index: {}]   ;;  %s161_s3 = inlined_call_operand.vmem [shape: f32[16,32], index: 3, kind: output, shape index: {}]  }
   0x1   :  { %s18_s14 = sshll.u32 %s160_s2, 4  ;;  %s20_s16 = sshll.u32 %s116_s15, 4  ;;  %s19_s14 = int_to_ptr.hbm [resolvable:$true] %s18_s14  ;;  %s21_s16 = int_to_ptr.vmem [resolvable:$true] %s20_s16 }
   0x2   :  { %23 = dma.hbm_to_vmem [thread:$0]  %s19_s14, 16, %s21_s16, [#allocation3]  }
   0x3   :  { %114 = dma.done.wait [#allocation3], 16  }
   0x4   :  { %115 = vsyncadd [#allocation3], 4294967280  ;;  %v87_v0 = vld [vmem:[%s159_s1 + $0x8] sm:$0xff]  ;;  %v86_v1 = vld [vmem:[%s159_s1] sm:$0xff]  ;;  %vm52_vm0 = vcmask 261120  }
   0x5   :  { %62 = vmatpush.bf16.msra.mxu0 %v87_v0  ;;  %v29_v2 = vld [vmem:[%s158_s0] sm:$0xff]  ;;  %v30_v3 = vld [vmem:[%s158_s0 + $0x8] sm:$0xff] }
   0x6   :  { %v31_v4 = vpack.c.bf16 %v30_v3, %v29_v2  ;;  %v89_v5 = vld [vmem:[#allocation2] ss:$0 sm:$0xff] }
   0x9   :  { %63 = vmatpush.bf16.msra.mxu0 %v86_v1 }
   0xc   :  { %85 = vmatmul.msk.bf16.vlgmr.msra.gmra.mxu0 %vm52_vm0, %v31_v4 }
  0x89   :  { %v65_v6 = vpop.f32.mrf.mxu0 }
  0x8a   :  { %v66_v7 = vadd.f32 %v89_v5, %v65_v6 }
  0x8c   :  { %70 = vst.msk [vmem:[%s161_s3] sm:$0xff] %vm52_vm0, %v66_v7 }
  0x91   :  { %v67_v8 = vpop.f32.mrf.mxu0 }
  0x92   :  { %v68_v9 = vadd.f32 %v89_v5, %v67_v8 }
  0x94   :  { %71 = vst.msk [vmem:[%s161_s3 + $0x8] sm:$0xff] %vm52_vm0, %v68_v9 }
  0x95   :  { %76 = vsyncpa [#allocation3], 1 }

// kernel: decoder_forward.9
= control target key start
LH: loop header
LB: loop body
LE: loop exit
PB: predicated region body
PF: predicated region fallthrough
CT: control target
= control target key end

     0   :  { %13 = vsyncpa [#allocation3], 0  ;;  %s2035_s0 = inlined_call_operand.vmem [shape: f32[2,8,32], index: 0, kind: input, shape index: {}]   ;;  %s2036_s1 = inlined_call_operand.vmem [shape: f32[2,8,1], index: 1, kind: input, shape index: {}]   ;;  %s2037_s2 = inlined_call_operand.hbm [shape: bf16[32,96], index: 2, kind: input, shape index: {}]   ;;  %s2038_s3 = inlined_call_operand.vmem [shape: f32[1,96], index: 3, kind: input, shape index: {}]   ;;  %s2039_s4 = inlined_call_operand.hbm [shape: bf16[32,32], index: 4, kind: input, shape index: {}]   ;;  %s2040_s5 = inlined_call_operand.hbm [shape: f32[1,32], index: 5, kind: input, shape index: {}]   ;;  %s2041_s6 = inlined_call_operand.hbm [shape: f32[1,32], index: 6, kind: input, shape index: {}]   ;;  %s2042_s7 = inlined_call_operand.hbm [shape: f32[1,32], index: 7, kind: input, shape index: {}]   ;;  %s2043_s8 = inlined_call_operand.vmem [shape: f32[2,8,32], index: 8, kind: output, shape index: {}]  }
   0x1   :  { %14 = vsyncpa [#allocation5], 0 }
   0x2   :  { %15 = vsyncpa [#allocation8], 0  ;;  %s1747_s27 = smov 0  }
   0x3 LB: > { %s1753_s28 = sadd.s32 4294967295, %s1681_s27   ;;  %p1364_p0 = scmp.ge.s32.totalorder %s1681_s27, 1  ;;  %s1681_s27 = sphi %s1747_s27, %s21_s27  }
   0x4   : > { %p230_p1 = scmp.lt.s32.totalorder %s1681_s27, 3  ;;  %p1448_p2 = scmp.eq.s32.totalorder %s1753_s28, 0 }
   0x5   : > { %s258_s9 = sshll.u32 %s2039_s4, 4  ;;  %s285_s13 = sshll.u32 %s2041_s6, 4  ;;  %s259_s9 = int_to_ptr.hbm [resolvable:$true] %s258_s9  ;;  %s286_s13 = int_to_ptr.hbm [resolvable:$true] %s285_s13 }
   0x6   : > { %p1761_p3 = pnand %p1364_p0, %p230_p1  ;;  %s1683_s14 = smov [#allocation4]  }
   0x7   : > { %s260_s15 = sshll.u32 %s1683_s14, 4  ;;  %s1684_s17 = smov [#allocation7]   ;;  %s261_s15 = int_to_ptr.vmem [resolvable:$true] %s260_s15 }
   0x8   : > { %p1432_p4 = pneg %p1761_p3  ;;  %s287_s18 = sshll.u32 %s1684_s17, 4  ;;  %s288_s18 = int_to_ptr.vmem [resolvable:$true] %s287_s18 }
   0x9   : > { %s241_s21 = sshll.u32 %s2037_s2, 4  ;;  %s1685_s22 = smov 64   ;;  %s242_s21 = int_to_ptr.hbm [resolvable:$true] %s241_s21 }
   0xa   : > { %p1772_p5 = pnand %p1448_p2, %p1432_p4  ;;  %s1686_s23 = smov 4  }
   0xb   : > { %s1687_s24 = smov [#allocation2]   ;;  %s273_s30 = sshll.u32 %s2040_s5, 4  ;;  %s274_s30 = int_to_ptr.hbm [resolvable:$true] %s273_s30 }
   0xc   : > { %1438 = dma.hbm_to_vmem [thread:$0]  (!%p1772_p5), %s259_s9, 256, %s261_s15, [#allocation5], %s1685_s22, %s1685_s22, %s1686_s23  }
   0xd   : > { %1444 = dma.hbm_to_vmem [thread:$0]  (!%p1772_p5), %s286_s13, 16, %s288_s18, [#allocation8]  }
   0xe   : > { %s243_s25 = sshll.u32 %s1687_s24, 4  ;;  %s297_s14 = sshll.u32 %s2042_s7, 4  ;;  %s244_s25 = int_to_ptr.vmem [resolvable:$true] %s243_s25  ;;  %s298_s14 = int_to_ptr.hbm [resolvable:$true] %s297_s14 }
   0xf   : > { %1435 = dma.hbm_to_vmem [thread:$0]  (!%p1772_p5), %s242_s21, 256, %s244_s25, [#allocation3], %s1685_s22, %s1685_s22, %s1686_s23  }
  0x10   : > { %s1688_s17 = smov [#allocation6]   ;;  %s1689_s13 = smov [#allocation9]  }
  0x11   : > { %s275_s9 = sshll.u32 %s1688_s17, 4  ;;  %s299_s15 = sshll.u32 %s1689_s13, 4  ;;  %s276_s9 = int_to_ptr.vmem [resolvable:$true] %s275_s9  ;;  %s300_s15 = int_to_ptr.vmem [resolvable:$true] %s299_s15 }
  0x12   : > { %1441 = dma.hbm_to_vmem [thread:$0]  (!%p1772_p5), %s274_s30, 16, %s276_s9, [#allocation5]  }
  0x13   : > { %1447 = dma.hbm_to_vmem [thread:$0]  (!%p1772_p5), %s298_s14, 16, %s300_s15, [#allocation8]  }
  0x14   : > { %326 = sbr.rel (%p1761_p3) target bundleno = 1526 (0x5f6), region = 52 }
  0x19   : > { %1668 = dma.done.wait (%p1448_p2), [#allocation3], 256  }
  0x1a   : > { %1670 = vsyncadd (%p1448_p2), [#allocation3], 4294967040 }
  0x1b   : > { %1672 = dma.done.wait (%p1448_p2), [#allocation5], 272  }
  0x1c   : > { %1674 = vsyncadd (%p1448_p2), [#allocation5], 4294967024 }
  0x1d   : > { %1676 = dma.done.wait (%p1448_p2), [#allocation8], 32  }
  0x1e   : > { %1678 = vsyncadd (%p1448_p2), [#allocation8], 4294967264  ;;  %p383_p6 = scmp.lt.s32.totalorder %s1753_s28, 1  ;;  %v1409_v0 = vld [vmem:[#allocation2 + $0x8] sm:$0xff]  ;;  %v1408_v1 = vld [vmem:[#allocation2] sm:$0xff]  ;;  %vm418_vm0 = vcmask 261120  }
  0x1f   : > { %428 = vmatpush.bf16.msra.mxu0 %v1409_v0  ;;  %v1487_v4 = vld [vmem:[%s2038_s3] ss:$0 sm:$0xff]  ;;  %s1690_s21 = smov 104   ;;  %s1691_s22 = smov 120   ;;  %v1694_v16 = vmov 1983009808  }
  0x20   : > { %s2047_s28 = smov (!%p383_p6, %s1753_s28), 1  ;;  %s1692_s23 = smov 96   ;;  %v463_v17 = vunpack.c.l.s4 %v1694_v16  ;;  %v1695_v26 = vmov 1934713408   ;;  %vm472_vm1 = vcmask 1047556   ;;  %vm816_vm3 = vcmask 64512  }
  0x21   : > { %s1811_s10 = sshll.u32 %s2047_s28, 3  ;;  %s1693_s24 = smov 112   ;;  %v477_v27 = vunpack.c.l.s4 %v1695_v26  ;;  %vm954_vm5 = vcmask 1043456   ;;  %vm1152_vm6 = vcmask 130048   ;;  %vm1154_vm7 = vcmask 195584  }
  0x22   : > { %s386_s19 = scalar_lea.vmem %s2035_s0, %s1811_s10  ;;  %v1840_v23 = vunpack.c.0.s8 %v463_v17  ;;  %s390_s29 = scalar_lea.vmem %s2036_s1, %s1811_s10 }
  0x23   : > { %v1817_v2 = vld [vmem:[%s386_s19] sm:$0xff]  ;;  %429 = vmatpush.bf16.msra.mxu0 %v1408_v1  ;;  %v1845_v37 = vunpack.c.0.s8 %v477_v27  ;;  %v1696_v1 = vmov 0   ;;  %s1697_s30 = smov 64   ;;  %s1698_s11 = smov 16  }
  0x24   : > { %v397_v3 = vpack.c.bf16 %v1817_v2, %v1817_v2  ;;  %1485 = vset.pattern.permute.xlu1 %v1696_v1  ;;  %1486 = vset.pattern.permute.xlu0 %v1696_v1  ;;  %s1699_s12 = smov 24   ;;  %s1700_s14 = smov 8  }
  0x25   : > { %s394_s13 = scalar_lea.vmem %s2043_s8, %s1811_s10 }
  0x26   : > { %1388 = vmatmul.msk.bf16.vlgmr.msra.gmra.mxu0 %vm418_vm0, %v397_v3 }
  0xa3   : > { %v431_v5 = vpop.f32.mrf.mxu0 }
  0xa4   : > { %v432_v6 = vadd.f32 %v1487_v4, %v431_v5 }
  0xa6   : > { %v1825_v7 = vpack.c.bf16 %v432_v6, %v432_v6  ;;  %v435_v9 = vmul.f32 0.35355338, %v432_v6 }
  0xa8   : > { %570 = vrot.lane.b32.xlu1 %v1825_v7, %s1690_s21  ;;  %566 = vrot.lane.b32.xlu0 %v1825_v7, %s1691_s22  ;;  %v441_v10 = vpack.c.bf16 %v435_v9, %v435_v9 }
  0xaa   : > { %v452_v30 = vshrl.u32 %v441_v10, 16 }
  0xab   : > { %v433_v8 = vpop.f32.mrf.mxu0 }
  0xb0   : > { %572 = vrot.lane.b32.xlu1 %v1825_v7, %s1692_s23  ;;  %568 = vrot.lane.b32.xlu0 %v1825_v7, %s1693_s24 }
  0xb8   : > { %443 = vrot.lane.b32.xlu1 %v441_v10, %s1691_s22 }
 0x11a   : > { %v1831_v11 = vpop.permute.xlu1 %570  ;;  %v1833_v12 = vpop.permute.xlu0 %566 }
 0x11b   : > { %578 = vrot.lane.b32.xlu0 %v1831_v11, %s1692_s23  ;;  %574 = vrot.lane.b32.xlu2 %v1833_v12, %s1692_s23 }
 0x122   : > { %v1837_v13 = vpop.permute.xlu0 %568  ;;  %v573_v14 = vpop.permute.xlu1 %572 }
 0x123   : > { %576 = vrot.lane.b32.xlu2 %v1837_v13, %s1692_s23  ;;  %447 = vrot.lane.b32.xlu0 %v441_v10, %s1690_s21  ;;  %v583_v19 = vshrl.u32 %v573_v14, 16 }
 0x12a   : > { %v444_v20 = vpop.permute.xlu1 %443 }
 0x12b   : > { %445 = vrot.lane.b32.xlu2 %v441_v10, %s1693_s24  ;;  %v451_v25 = vpack.i.b16 %v444_v20, %v441_v10  ;;  %v453_v28 = vshrl.u32 %v444_v20, 16 }
 0x12d   : > { %v465_v36 = vperm.slane %v451_v25, %v1840_v23  ;;  %v454_v38 = vpack.i.b16 %v453_v28, %v452_v30 }
 0x12f   : > { %v474_v47 = vrot.slane %v465_v36, 4  ;;  %v492_v49 = vperm.slane %v454_v38, %v1840_v23 }
 0x131   : > { %v500_v3 = vrot.slane %v492_v49, 4 }
 0x175   : > { %v575_v15 = vpop.permute.xlu2 %574 }
 0x176   : > { %v584_v18 = vshrl.u32 %v575_v15, 16  ;;  %v582_v21 = vpack.i.b16 %v575_v15, %v573_v14 }
 0x178   : > { %v585_v24 = vpack.i.b16 %v584_v18, %v583_v19  ;;  %v596_v29 = vperm.slane %v582_v21, %v1840_v23 }
 0x17a   : > { %v622_v32 = vperm.slane %v585_v24, %v1840_v23  ;;  %v604_v39 = vrot.slane %v596_v29, 4 }
 0x17c   : > { %v630_v42 = vrot.slane %v622_v32, 4 }
 0x17d   : > { %v577_v22 = vpop.permute.xlu2 %576 }
 0x17e   : > { %v589_v33 = vshrl.u32 %v577_v22, 16 }
 0x185   : > { %v446_v43 = vpop.permute.xlu2 %445 }
 0x186   : > { %v458_v53 = vshrl.u32 %v446_v43, 16 }
 0x18d   : > { %v579_v31 = vpop.permute.xlu0 %578 }
 0x18e   : > { %v588_v34 = vpack.i.b16 %v579_v31, %v577_v22  ;;  %v590_v35 = vshrl.u32 %v579_v31, 16 }
 0x190   : > { %v591_v40 = vpack.i.b16 %v590_v35, %v589_v33  ;;  %v601_v41 = vperm.slane %v588_v34, %v1840_v23 }
 0x192   : > { %v602_v44 = vrot.slane %v601_v41, 4  ;;  %v605_v45 = vsel %vm472_vm1, %v601_v41, %v604_v39  ;;  %v627_v46 = vperm.slane %v591_v40, %v1840_v23 }
 0x193   : > { %v613_v48 = vperm.slane %v605_v45, %v1845_v37 }
 0x194   : > { %v603_v50 = vsel %vm472_vm1, %v602_v44, %v596_v29  ;;  %v628_v51 = vrot.slane %v627_v46, 4  ;;  %v631_v52 = vsel %vm472_vm1, %v627_v46, %v630_v42 }
 0x195   : > { %v609_v54 = vperm.slane %v603_v50, %v1845_v37  ;;  %v616_v55 = vrot.slane %v613_v48, 4  ;;  %v639_v56 = vperm.slane %v631_v52, %v1845_v37  ;;  %v448_v57 = vpop.permute.xlu0 %447 }
 0x196   : > { %v629_v58 = vsel %vm472_vm1, %v628_v51, %v622_v32  ;;  %v457_v59 = vpack.i.b16 %v448_v57, %v446_v43  ;;  %v459_v60 = vshrl.u32 %v448_v57, 16  ;;  %v436_v32 = vld [vmem:[%s390_s29] sm:$0xff] }
 0x197   : > { %v614_v61 = vrot.slane %v609_v54, 4  ;;  %v617_v62 = vsel %vm472_vm1, 0, %v616_v55  ;;  %v635_v63 = vperm.slane %v629_v58, %v1845_v37  ;;  %v642_v0 = vrot.slane %v639_v56, 4 }
 0x198   : > { %v649_v4 = vrot.slane %v617_v62, 4  ;;  %v460_v5 = vpack.i.b16 %v459_v60, %v458_v53  ;;  %v470_v6 = vperm.slane %v457_v59, %v1840_v23  ;;  %v644_v14 = vsel %vm472_vm1, %v616_v55, %v609_v54 }
 0x199   : > { %v615_v8 = vsel %vm472_vm1, 0, %v614_v61  ;;  %v640_v9 = vrot.slane %v635_v63, 4  ;;  %v643_v10 = vsel %vm472_vm1, 0, %v642_v0  ;;  %v663_v22 = vsel %vm472_vm1, %v642_v0, %v635_v63 }
 0x19a   : > { %v668_v15 = vrot.slane %v643_v10, 4  ;;  %v471_v16 = vrot.slane %v470_v6, 4  ;;  %v475_v17 = vsel %vm472_vm1, %v470_v6, %v474_v47  ;;  %v497_v18 = vperm.slane %v460_v5, %v1840_v23 }
 0x19b   : > { %v483_v19 = vperm.slane %v475_v17, %v1845_v37  ;;  %v641_v20 = vsel %vm472_vm1, 0, %v640_v9  ;;  %v650_v21 = vsel %vm472_vm1, %v649_v4, %v615_v8  ;;  %v648_v31 = vperm.slane %v644_v14, %v1840_v23 }
 0x19c   : > { %v473_v24 = vsel %vm472_vm1, %v471_v16, %v465_v36  ;;  %v498_v25 = vrot.slane %v497_v18, 4  ;;  %v501_v26 = vsel %vm472_vm1, %v497_v18, %v500_v3  ;;  %v654_v27 = vperm.slane %v650_v21, %v1840_v23 }
 0x19d   : > { %v479_v28 = vperm.slane %v473_v24, %v1845_v37  ;;  %v486_v29 = vrot.slane %v483_v19, 4  ;;  %v509_v30 = vperm.slane %v501_v26, %v1845_v37  ;;  %v667_v35 = vperm.slane %v663_v22, %v1840_v23 }
 0x19e   : > { %v499_v33 = vsel %vm472_vm1, %v498_v25, %v492_v49  ;;  %v655_v34 = vrot.slane %v654_v27, 4  ;;  %v669_v36 = vsel %vm472_vm1, %v668_v15, %v641_v20  ;;  %vm893_vm2 = vcmp.eq.f32.partialorder %v436_v32, 0.0 }
 0x19f   : > { %v484_v38 = vrot.slane %v479_v28, 4  ;;  %v487_v39 = vsel %vm472_vm1, 0, %v486_v29  ;;  %v505_v40 = vperm.slane %v499_v33, %v1845_v37  ;;  %v512_v41 = vrot.slane %v509_v30, 4 }
 0x1a0   : > { %v519_v42 = vrot.slane %v487_v39, 4  ;;  %v656_v43 = vsel %vm472_vm1, %v655_v34, %v648_v31  ;;  %v673_v44 = vperm.slane %v669_v36, %v1840_v23  ;;  %v514_v49 = vsel %vm472_vm1, %v486_v29, %v479_v28 }
 0x1a1   : > { %v485_v45 = vsel %vm472_vm1, 0, %v484_v38  ;;  %v510_v46 = vrot.slane %v505_v40, 4  ;;  %v513_v47 = vsel %vm472_vm1, 0, %v512_v41  ;;  %v660_v48 = vperm.slane %v656_v43, %v1845_v37 }
 0x1a2   : > { %v538_v50 = vrot.slane %v513_v47, 4  ;;  %v674_v51 = vrot.slane %v673_v44, 4  ;;  %v520_v52 = vsel %vm472_vm1, %v519_v42, %v485_v45  ;;  %v894_v58 = vsel %vm893_vm2, 1, %v1696_v1 }
 0x1a3   : > { %v511_v53 = vsel %vm472_vm1, 0, %v510_v46  ;;  %v661_v54 = vrot.slane %v660_v48, 4  ;;  %v524_v55 = vperm.slane %v520_v52, %v1840_v23  ;;  %v518_v60 = vperm.slane %v514_v49, %v1840_v23  ;;  %896 = vperm.xlu1 %1485, %v894_v58  }
 0x1a4   : > { %v675_v56 = vsel %vm472_vm1, %v674_v51, %v667_v35  ;;  %v539_v57 = vsel %vm472_vm1, %v538_v50, %v511_v53  ;;  %v533_v62 = vsel %vm472_vm1, %v512_v41, %v505_v40  ;;  %v685_v63 = vshrl.u32 %v660_v48, 16 }
 0x1a5   : > { %v679_v59 = vperm.slane %v675_v56, %v1845_v37  ;;  %v525_v61 = vrot.slane %v524_v55, 4  ;;  %v662_v0 = vsel %vm472_vm1, 0, %v661_v54  ;;  %v543_v3 = vperm.slane %v539_v57, %v1840_v23 }
 0x1a6   : > { %v537_v9 = vperm.slane %v533_v62, %v1840_v23  ;;  %v691_v18 = vshrl.u32 %v662_v0, 16 }
 0x1a7   : > { %v684_v4 = vpack.i.b16 %v679_v59, %v660_v48  ;;  %v686_v5 = vshrl.u32 %v679_v59, 16  ;;  %v680_v6 = vrot.slane %v679_v59, 4  ;;  %v526_v8 = vsel %vm472_vm1, %v525_v61, %v518_v60 }
 0x1a8   : > { %v530_v1 = vperm.slane %v526_v8, %v1845_v37  ;;  %v544_v10 = vrot.slane %v543_v3, 4 }
 0x1a9   : > { %v821_v14 = vsel %vm816_vm3, %v684_v4, 0  ;;  %v687_v15 = vpack.i.b16 %v686_v5, %v685_v63  ;;  %v681_v16 = vsel %vm472_vm1, 0, %v680_v6 }
 0x1aa   : > { %830 = vmatpush.bf16.xpose.msra.mxu1 %v821_v14  ;;  %v690_v17 = vpack.i.b16 %v681_v16, %v662_v0  ;;  %v692_v19 = vshrl.u32 %v681_v16, 16  ;;  %v545_v20 = vsel %vm472_vm1, %v544_v10, %v537_v9  ;;  %v531_v24 = vrot.slane %v530_v1, 4 }
 0x1ab   : > { %v840_v21 = vsel %vm816_vm3, %v687_v15, 0  ;;  %v549_v22 = vperm.slane %v545_v20, %v1845_v37  ;;  %v555_v27 = vshrl.u32 %v530_v1, 16 }
 0x1ac   : > { %849 = vmatpush.bf16.xpose.msra.mxu2 %v840_v21  ;;  %v859_v25 = vsel %vm816_vm3, %v690_v17, 0  ;;  %v693_v26 = vpack.i.b16 %v692_v19, %v691_v18  ;;  %v532_v30 = vsel %vm472_vm1, 0, %v531_v24 }
 0x1ad   : > { %868 = vmatpush.bf16.xpose.msra.mxu3 %v859_v25  ;;  %v554_v28 = vpack.i.b16 %v549_v22, %v530_v1  ;;  %v556_v29 = vshrl.u32 %v549_v22, 16  ;;  %v550_v31 = vrot.slane %v549_v22, 4  ;;  %v561_v36 = vshrl.u32 %v532_v30, 16 }
 0x1ae   : > { %v878_v32 = vsel %vm816_vm3, %v693_v26, 0 }
 0x1af   : > { %887 = vmatpush.bf16.xpose.msrb.mxu0 %v878_v32  ;;  %v557_v33 = vpack.i.b16 %v556_v29, %v555_v27  ;;  %v551_v34 = vsel %vm472_vm1, 0, %v550_v31 }
 0x1b0   : > { %v560_v35 = vpack.i.b16 %v551_v34, %v532_v30  ;;  %v562_v38 = vshrl.u32 %v551_v34, 16 }
 0x1b1   : > { %1389 = vmatmul.msk.bf16.vlgmr.msra.gmra.mxu1 %vm816_vm3, %v554_v28 }
 0x1b2   : > { %v563_v39 = vpack.i.b16 %v562_v38, %v561_v36 }
 0x1b3   : > { %1390 = vmatmul.msk.bf16.vlgmr.msra.gmra.mxu2 %vm816_vm3, %v557_v33 }
 0x1b4   : > { %1391 = vmatmul.msk.bf16.vlgmr.msra.gmra.mxu3 %vm816_vm3, %v560_v35 }
 0x1b6   : > { %1392 = vmatmul.msk.bf16.vlgmr.msrb.gmra.mxu0 %vm816_vm3, %v563_v39 }
 0x215   : > { %v897_v40 = vpop.permute.xlu1 %896 }
 0x216   : > { %vm898_vm4 = vcmp.eq.s32.totalorder %v897_v40, 1 }
 0x22e   : > { %v832_v41 = vpop.f32.mrf.mxu1 }
 0x22f   : > { %v899_v42 = vsel %vm898_vm4, -1e+10, %v832_v41 }
 0x230   : > { %v903_v43 = vsel %vm816_vm3, %v899_v42, -inf }
 0x231   : > { %904 = vmax.xlane.f32.xlu1 %v903_v43 }
 0x233   : > { %v889_v44 = vpop.f32.mrf.mxu0 }
 0x234   : > { %v902_v45 = vsel %vm898_vm4, -1e+10, %v889_v44 }
 0x235   : > { %v912_v46 = vsel %vm816_vm3, %v902_v45, -inf }
 0x236   : > { %v834_v47 = vpop.f32.mrf.mxu1  ;;  %v851_v48 = vpop.f32.mrf.mxu2  ;;  %913 = vmax.xlane.f32.xlu2 %v912_v46 }
 0x237   : > { %v900_v49 = vsel %vm898_vm4, -1e+10, %v851_v48  ;;  %v870_v50 = vpop.f32.mrf.mxu3 }
 0x238   : > { %v906_v51 = vsel %vm816_vm3, %v900_v49, -inf  ;;  %v901_v52 = vsel %vm898_vm4, -1e+10, %v870_v50 }
 0x239   : > { %907 = vmax.xlane.f32.xlu0 %v906_v51  ;;  %v909_v54 = vsel %vm816_vm3, %v901_v52, -inf }
 0x23b   : > { %v891_v53 = vpop.f32.mrf.mxu0 }
 0x23e   : > { %v853_v55 = vpop.f32.mrf.mxu2  ;;  %910 = vmax.xlane.f32.xlu2 %v909_v54 }
 0x23f   : > { %v872_v56 = vpop.f32.mrf.mxu3 }
 0x24a   : > { %698 = vrot.lane.b32.xlu1 %v1837_v13, %s1697_s30 }
 0x24d   : > { %696 = vrot.lane.b32.xlu0 %v1833_v12, %s1697_s30 }
 0x255   : > { %700 = vrot.lane.b32.xlu0 %v1831_v11, %s1697_s30 }
 0x256   : > { %694 = vrot.lane.b32.xlu2 %v1825_v7, %s1697_s30 }
 0x2a4   : > { %v905_v57 = vpop.xlane.xlu1 %904 }
 0x2a5   : > { %v915_v58 = vsub.f32 %v899_v42, %v905_v57 }
 0x2a7   : > { %v919_v59 = vmul.f32 1.442695, %v915_v58 }
 0x2a9   : > { %1491 = vpow2.f32 %v919_v59  ;;  %v914_v60 = vpop.xlane.xlu2 %913 }
 0x2aa   : > { %v918_v11 = vsub.f32 %v902_v45, %v914_v60 }
 0x2ac   : > { %v908_v61 = vpop.xlane.xlu0 %907  ;;  %v925_v5 = vmul.f32 1.442695, %v918_v11 }
 0x2ad   : > { %v916_v62 = vsub.f32 %v900_v49, %v908_v61 }
 0x2af   : > { %v1924_v63 = vpop.eup %1491  ;;  %v921_v0 = vmul.f32 1.442695, %v916_v62 }
 0x2b0   : > { %v927_v3 = vsel %vm816_vm3, %v1924_v63, 0.0 }
 0x2b1   : > { %1493 = vpow2.f32 %v921_v0  ;;  %928 = vadd.xlane.f32.xlu0 %v927_v3  ;;  %v911_v12 = vpop.xlane.xlu2 %910 }
 0x2b2   : > { %v917_v13 = vsub.f32 %v901_v52, %v911_v12 }
 0x2b4   : > { %v923_v4 = vmul.f32 1.442695, %v917_v13 }
 0x2b6   : > { %1495 = vpow2.f32 %v923_v4 }
 0x2b7   : > { %v1928_v7 = vpop.eup %1493  ;;  %1497 = vpow2.f32 %v925_v5 }
 0x2b8   : > { %v930_v6 = vsel %vm816_vm3, %v1928_v7, 0.0 }
 0x2b9   : > { %931 = vadd.xlane.f32.xlu1 %v930_v6  ;;  %v695_v9 = vpop.permute.xlu2 %694 }
 0x2ba   : > { %v705_v16 = vshrl.u32 %v695_v9, 16 }
 0x2bc   : > { %v1932_v8 = vpop.eup %1495  ;;  %v699_v19 = vpop.permute.xlu1 %698 }
 0x2bd   : > { %v933_v1 = vsel %vm816_vm3, %v1932_v8, 0.0  ;;  %v1936_v15 = vpop.eup %1497  ;;  %v711_v24 = vshrl.u32 %v699_v19, 16 }
 0x2be   : > { %934 = vadd.xlane.f32.xlu2 %v933_v1  ;;  %v936_v20 = vsel %vm816_vm3, %v1936_v15, 0.0 }
 0x2bf   : > { %v697_v10 = vpop.permute.xlu0 %696 }
 0x2c0   : > { %v706_v14 = vshrl.u32 %v697_v10, 16  ;;  %v704_v17 = vpack.i.b16 %v697_v10, %v695_v9 }
 0x2c2   : > { %v707_v18 = vpack.i.b16 %v706_v14, %v705_v16  ;;  %v718_v21 = vperm.slane %v704_v17, %v1840_v23 }
 0x2c4   : > { %v744_v25 = vperm.slane %v707_v18, %v1840_v23  ;;  %v726_v28 = vrot.slane %v718_v21, 4 }
 0x2c6   : > { %937 = vadd.xlane.f32.xlu2 %v936_v20  ;;  %v752_v31 = vrot.slane %v744_v25, 4 }
 0x2c7   : > { %v701_v22 = vpop.permute.xlu0 %700 }
 0x2c8   : > { %v710_v26 = vpack.i.b16 %v701_v22, %v699_v19  ;;  %v712_v27 = vshrl.u32 %v701_v22, 16 }
 0x2ca   : > { %v713_v29 = vpack.i.b16 %v712_v27, %v711_v24  ;;  %v723_v30 = vperm.slane %v710_v26, %v1840_v23 }
 0x2cc   : > { %v724_v32 = vrot.slane %v723_v30, 4  ;;  %v727_v33 = vsel %vm472_vm1, %v723_v30, %v726_v28  ;;  %v749_v34 = vperm.slane %v713_v29, %v1840_v23 }
 0x2cd   : > { %v735_v35 = vperm.slane %v727_v33, %v1845_v37 }
 0x2ce   : > { %v725_v36 = vsel %vm472_vm1, %v724_v32, %v718_v21  ;;  %v750_v38 = vrot.slane %v749_v34, 4  ;;  %v753_v39 = vsel %vm472_vm1, %v749_v34, %v752_v31 }
 0x2cf   : > { %v731_v40 = vperm.slane %v725_v36, %v1845_v37  ;;  %v738_v41 = vrot.slane %v735_v35, 4  ;;  %v761_v42 = vperm.slane %v753_v39, %v1845_v37 }
 0x2d0   : > { %v751_v43 = vsel %vm472_vm1, %v750_v38, %v744_v25 }
 0x2d1   : > { %v736_v44 = vrot.slane %v731_v40, 4  ;;  %v739_v45 = vsel %vm472_vm1, 0, %v738_v41  ;;  %v757_v46 = vperm.slane %v751_v43, %v1845_v37  ;;  %v764_v47 = vrot.slane %v761_v42, 4 }
 0x2d2   : > { %v771_v48 = vrot.slane %v739_v45, 4  ;;  %v766_v53 = vsel %vm472_vm1, %v738_v41, %v731_v40 }
 0x2d3   : > { %v737_v49 = vsel %vm472_vm1, 0, %v736_v44  ;;  %v762_v50 = vrot.slane %v757_v46, 4  ;;  %v765_v51 = vsel %vm472_vm1, 0, %v764_v47  ;;  %v785_v57 = vsel %vm472_vm1, %v764_v47, %v757_v46 }
 0x2d4   : > { %v790_v52 = vrot.slane %v765_v51, 4  ;;  %v772_v54 = vsel %vm472_vm1, %v771_v48, %v737_v49  ;;  %v770_v59 = vperm.slane %v766_v53, %v1840_v23  ;;  %v789_v0 = vperm.slane %v785_v57, %v1840_v23 }
 0x2d5   : > { %v763_v55 = vsel %vm472_vm1, 0, %v762_v50  ;;  %v776_v56 = vperm.slane %v772_v54, %v1840_v23 }
 0x2d6   : > { %v791_v58 = vsel %vm472_vm1, %v790_v52, %v763_v55 }
 0x2d7   : > { %v777_v60 = vrot.slane %v776_v56, 4  ;;  %v795_v61 = vperm.slane %v791_v58, %v1840_v23 }
 0x2d9   : > { %v778_v62 = vsel %vm472_vm1, %v777_v60, %v770_v59  ;;  %v796_v3 = vrot.slane %v795_v61, 4 }
 0x2da   : > { %v782_v12 = vperm.slane %v778_v62, %v1845_v37 }
 0x2db   : > { %v797_v13 = vsel %vm472_vm1, %v796_v3, %v789_v0 }
 0x2dc   : > { %v801_v11 = vperm.slane %v797_v13, %v1845_v37  ;;  %v783_v4 = vrot.slane %v782_v12, 4  ;;  %v807_v5 = vshrl.u32 %v782_v12, 16 }
 0x2de   : > { %v806_v6 = vpack.i.b16 %v801_v11, %v782_v12  ;;  %v808_v1 = vshrl.u32 %v801_v11, 16  ;;  %v784_v9 = vsel %vm472_vm1, 0, %v783_v4  ;;  %v802_v10 = vrot.slane %v801_v11, 4 }
 0x2df   : > { %v813_v19 = vshrl.u32 %v784_v9, 16 }
 0x2e0   : > { %v956_v14 = vsel %vm954_vm5, %v806_v6, 0  ;;  %v809_v16 = vpack.i.b16 %v808_v1, %v807_v5  ;;  %v803_v17 = vsel %vm472_vm1, 0, %v802_v10 }
 0x2e1   : > { %965 = vmatpush.bf16.msrb.mxu1 %v956_v14  ;;  %v812_v18 = vpack.i.b16 %v803_v17, %v784_v9  ;;  %v814_v20 = vshrl.u32 %v803_v17, 16 }
 0x2e2   : > { %v975_v21 = vsel %vm954_vm5, %v809_v16, 0 }
 0x2e3   : > { %984 = vmatpush.bf16.msrb.mxu2 %v975_v21  ;;  %v994_v22 = vsel %vm954_vm5, %v812_v18, 0  ;;  %v815_v24 = vpack.i.b16 %v814_v20, %v813_v19 }
 0x2e4   : > { %1003 = vmatpush.bf16.msrb.mxu3 %v994_v22 }
 0x2e5   : > { %v1013_v25 = vsel %vm954_vm5, %v815_v24, 0 }
 0x2e6   : > { %1022 = vmatpush.bf16.msra.mxu0 %v1013_v25 }
 0x324   : > { %v929_v26 = vpop.xlane.xlu0 %928 }
 0x325   : > { %1499 = vrcp.f32 %v929_v26 }
 0x32b   : > { %v1500_v27 = vpop.eup %1499 }
 0x32c   : > { %v943_v28 = vmul.f32 %v1500_v27, %v1924_v63  ;;  %v932_v29 = vpop.xlane.xlu1 %931 }
 0x32d   : > { %1501 = vrcp.f32 %v932_v29 }
 0x32e   : > { %v947_v30 = vpack.c.bf16 %v943_v28, %v943_v28 }
 0x330   : > { %1393 = vmatmul.msk.bf16.vlgmr.msrb.gmra.mxu1 %vm816_vm3, %v947_v30 }
 0x331   : > { %v935_v31 = vpop.xlane.xlu2 %934 }
 0x332   : > { %1503 = vrcp.f32 %v935_v31 }
 0x333   : > { %v1502_v32 = vpop.eup %1501 }
 0x334   : > { %v944_v33 = vmul.f32 %v1502_v32, %v1928_v7 }
 0x336   : > { %v948_v34 = vpack.c.bf16 %v944_v33, %v944_v33 }
 0x338   : > { %v1504_v35 = vpop.eup %1503  ;;  %1394 = vmatmul.msk.bf16.vlgmr.msrb.gmra.mxu2 %vm816_vm3, %v948_v34 }
 0x339   : > { %v945_v36 = vmul.f32 %v1504_v35, %v1932_v8  ;;  %v938_v38 = vpop.xlane.xlu2 %937 }
 0x33a   : > { %1505 = vrcp.f32 %v938_v38 }
 0x33b   : > { %v949_v39 = vpack.c.bf16 %v945_v36, %v945_v36 }
 0x33d   : > { %1395 = vmatmul.msk.bf16.vlgmr.msrb.gmra.mxu3 %vm816_vm3, %v949_v39 }
 0x340   : > { %v1506_v63 = vpop.eup %1505 }
 0x341   : > { %v946_v40 = vmul.f32 %v1506_v63, %v1936_v15 }
 0x343   : > { %v950_v41 = vpack.c.bf16 %v946_v40, %v946_v40 }
 0x345   : > { %1396 = vmatmul.msk.bf16.vlgmr.msra.gmra.mxu0 %vm816_vm3, %v950_v41 }
 0x3ad   : > { %v967_v42 = vpop.f32.mrf.mxu1 }
 0x3ae   : > { %v1031_v44 = vrot.slane %v967_v42, 4 }
 0x3b5   : > { %v969_v43 = vpop.f32.mrf.mxu1 }
 0x3bb   : > { %v986_v7 = vpop.f32.mrf.mxu2 }
 0x3bc   : > { %v1043_v46 = vrot.slane %v986_v7, 4 }
 0x3c0   : > { %v1005_v45 = vpop.f32.mrf.mxu3 }
 0x3c1   : > { %v1028_v47 = vrot.slane %v1005_v45, 4  ;;  %v1032_v8 = vsel %vm472_vm1, %v1005_v45, %v1031_v44 }
 0x3c2   : > { %v1040_v48 = vperm.slane %v1032_v8, %v1840_v23  ;;  %v1024_v49 = vpop.f32.mrf.mxu0 }
 0x3c3   : > { %v1030_v50 = vsel %vm472_vm1, %v1028_v47, %v967_v42  ;;  %v1041_v51 = vrot.slane %v1024_v49, 4  ;;  %v1044_v15 = vsel %vm472_vm1, %v1024_v49, %v1043_v46  ;;  %v988_v52 = vpop.f32.mrf.mxu2  ;;  %v1410_v49 = vld [vmem:[#allocation4] sm:$0xff] }
 0x3c4   : > { %v1036_v53 = vperm.slane %v1030_v50, %v1840_v23  ;;  %v1067_v54 = vrot.slane %v1040_v48, 4  ;;  %v1052_v55 = vperm.slane %v1044_v15, %v1840_v23 }
 0x3c5   : > { %v1042_v56 = vsel %vm472_vm1, %v1041_v51, %v986_v7 }
 0x3c6   : > { %v1055_v57 = vrot.slane %v1036_v53, 4  ;;  %v1048_v58 = vperm.slane %v1042_v56, %v1840_v23  ;;  %v1065_v59 = vrot.slane %v1052_v55, 4  ;;  %v1068_v60 = vsel %vm472_vm1, %v1052_v55, %v1067_v54  ;;  %v1488_v55 = vld [vmem:[#allocation6] ss:$0 sm:$0xff] }
 0x3c7   : > { %v1076_v61 = vperm.slane %v1068_v60, %v1845_v37 }
 0x3c8   : > { %v1053_v62 = vrot.slane %v1048_v58, 4  ;;  %v1056_v0 = vsel %vm472_vm1, %v1048_v58, %v1055_v57  ;;  %v1066_v3 = vsel %vm472_vm1, %v1065_v59, %v1040_v48  ;;  %v1007_v12 = vpop.f32.mrf.mxu3  ;;  %v1411_v48 = vld [vmem:[#allocation4 + $0x8] sm:$0xff] }
 0x3c9   : > { %v1064_v13 = vperm.slane %v1056_v0, %v1845_v37  ;;  %v1072_v11 = vperm.slane %v1066_v3, %v1845_v37  ;;  %v1083_v4 = vrot.slane %v1076_v61, 4  ;;  %1178 = vmatpush.bf16.msra.mxu1 %v1411_v48  ;;  %v1701_v61 = vmov 32.0  }
 0x3ca   : > { %v1054_v5 = vsel %vm472_vm1, %v1053_v62, %v1036_v53  ;;  %v1026_v6 = vpop.f32.mrf.mxu0  ;;  %1507 = vrcp.f32 %v1701_v61 }
 0x3cb   : > { %v1060_v1 = vperm.slane %v1054_v5, %v1845_v37  ;;  %v1079_v9 = vrot.slane %v1064_v13, 4  ;;  %v1081_v10 = vrot.slane %v1072_v11, 4  ;;  %v1084_v14 = vsel %vm472_vm1, 0.0, %v1083_v4 }
 0x3cc   : > { %v1096_v16 = vsel %vm472_vm1, %v1083_v4, %v1072_v11  ;;  %v1101_v17 = vrot.slane %v1084_v14, 4 }
 0x3cd   : > { %v1077_v18 = vrot.slane %v1060_v1, 4  ;;  %v1080_v19 = vsel %vm472_vm1, 0.0, %v1079_v9  ;;  %v1082_v20 = vsel %vm472_vm1, 0.0, %v1081_v10  ;;  %v1100_v21 = vperm.slane %v1096_v16, %v1840_v23  ;;  %1179 = vmatpush.bf16.msra.mxu1 %v1410_v49 }
 0x3ce   : > { %v1090_v22 = vrot.slane %v1080_v19, 4  ;;  %v1085_v24 = vsel %vm472_vm1, %v1079_v9, %v1060_v1  ;;  %v1102_v25 = vsel %vm472_vm1, %v1101_v17, %v1082_v20 }
 0x3cf   : > { %v1078_v26 = vsel %vm472_vm1, 0.0, %v1077_v18  ;;  %v1089_v27 = vperm.slane %v1085_v24, %v1840_v23  ;;  %v1106_v28 = vperm.slane %v1102_v25, %v1840_v23  ;;  %v1121_v29 = vrot.slane %v1100_v21, 4 }
 0x3d0   : > { %v1091_v30 = vsel %vm472_vm1, %v1090_v22, %v1078_v26  ;;  %v1508_v62 = vpop.eup %1507 }
 0x3d1   : > { %v1095_v31 = vperm.slane %v1091_v30, %v1840_v23  ;;  %v1109_v32 = vrot.slane %v1089_v27, 4  ;;  %v1122_v33 = vsel %vm472_vm1, %v1106_v28, %v1121_v29  ;;  %v1119_v34 = vrot.slane %v1106_v28, 4 }
 0x3d2   : > { %v1130_v35 = vperm.slane %v1122_v33, %v1845_v37  ;;  %v1197_v0 = vmul.f32 32.0, %v1508_v62  ;;  %vm1201_vm8 = vweird.f32 %v1508_v62 }
 0x3d3   : > { %v1110_v36 = vsel %vm472_vm1, %v1095_v31, %v1109_v32  ;;  %v1107_v38 = vrot.slane %v1095_v31, 4  ;;  %v1120_v39 = vsel %vm472_vm1, %v1119_v34, %v1100_v21 }
 0x3d4   : > { %v1118_v63 = vperm.slane %v1110_v36, %v1845_v37  ;;  %v1135_v40 = vrot.slane %v1130_v35, 4  ;;  %v1126_v41 = vperm.slane %v1120_v39, %v1845_v37  ;;  %v1198_v3 = vsub.f32 1.0, %v1197_v0  ;;  %v1490_v39 = vld [vmem:[#allocation9] ss:$0 sm:$0xff] }
 0x3d5   : > { %v1108_v42 = vsel %vm472_vm1, %v1107_v38, %v1089_v27 }
 0x3d6   : > { %v1136_v23 = vsel %vm472_vm1, %v1135_v40, %v1118_v63  ;;  %v1137_v43 = vrot.slane %v1118_v63, 4  ;;  %v1114_v7 = vperm.slane %v1108_v42, %v1845_v37  ;;  %v1131_v44 = vrot.slane %v1126_v41, 4 }
 0x3d7   : > { %1144 = vrot.lane.b32.xlu0 %v1136_v23, %s1698_s11  ;;  %v1199_v12 = vmul.f32 %v1508_v62, %v1198_v3 }
 0x3d8   : > { %v1138_v45 = vsel %vm472_vm1, %v1130_v35, %v1137_v43  ;;  %v1133_v46 = vrot.slane %v1114_v7, 4  ;;  %v1132_v47 = vsel %vm472_vm1, %v1131_v44, %v1114_v7  ;;  %v1489_v35 = vld [vmem:[#allocation7] ss:$0 sm:$0xff] }
 0x3d9   : > { %1148 = vrot.lane.b32.xlu2 %v1138_v45, %s1699_s12  ;;  %v1200_v13 = vadd.f32 %v1508_v62, %v1199_v12 }
 0x3da   : > { %v1134_v8 = vsel %vm472_vm1, %v1126_v41, %v1133_v46 }
 0x3db   : > { %1140 = vrot.lane.b32.xlu1 %v1134_v8, %s1700_s14  ;;  %v1202_v11 = vsel %vm1201_vm8, %v1508_v62, %v1200_v13 }
 0x433   : > { %v1149_v15 = vpop.permute.xlu2 %1148 }
 0x449   : > { %v1145_v50 = vpop.permute.xlu0 %1144 }
 0x44d   : > { %v1141_v37 = vpop.permute.xlu1 %1140 }
 0x44e   : > { %v1151_v51 = vsel %vm816_vm3, %v1132_v47, %v1141_v37 }
 0x44f   : > { %v1153_v52 = vsel %vm1152_vm6, %v1151_v51, %v1145_v50 }
 0x450   : > { %v1155_v53 = vsel %vm1154_vm7, %v1153_v52, %v1149_v15 }
 0x451   : > { %v1156_v54 = vpack.c.bf16 %v1155_v53, %v1155_v53 }
 0x453   : > { %1405 = vmatmul.msk.bf16.vlgmr.msra.gmra.mxu1 %vm418_vm0, %v1156_v54 }
 0x4d0   : > { %v1181_v56 = vpop.f32.mrf.mxu1 }
 0x4d1   : > { %v1185_v57 = vadd.f32 %v1181_v56, %v1817_v2 }
 0x4d3   : > { %v1190_v58 = vadd.f32 %v1488_v55, %v1185_v57 }
 0x4d5   : > { %v1193_v59 = vsel %vm418_vm0, %v1190_v58, 0.0 }
 0x4d6   : > { %1194 = vadd.xlane.f32.xlu0 %v1193_v59 }
 0x4d8   : > { %v1183_v60 = vpop.f32.mrf.mxu1 }
 0x549   : > { %v1195_v4 = vpop.xlane.xlu0 %1194 }
 0x54a   : > { %v1203_v5 = vmul.f32 %v1202_v11, %v1195_v4 }
 0x54c   : > { %v1204_v6 = vsub.f32 %v1190_v58, %v1203_v5 }
 0x54e   : > { %v1205_v1 = vmul.f32 %v1204_v6, %v1204_v6 }
 0x550   : > { %v1206_v2 = vsel %vm418_vm0, %v1205_v1, 0.0 }
 0x551   : > { %1207 = vadd.xlane.f32.xlu1 %v1206_v2 }
 0x5c4   : > { %v1208_v9 = vpop.xlane.xlu1 %1207 }
 0x5c5   : > { %v1209_v10 = vmul.f32 0.032258064, %v1208_v9 }
 0x5c7   : > { %1509 = vrsqrt.f32 %v1209_v10  ;;  %vm1217_vm9 = vcmp.eq.f32.partialorder %v1209_v10, inf  ;;  %v1220_v22 = vand.u32 2147483648, %v1209_v10  ;;  %vm1219_vm10 = vcmp.eq.f32.partialorder %v1209_v10, 0.0 }
 0x5cd   : > { %v1510_v14 = vpop.eup %1509 }
 0x5ce   : > { %v1211_v16 = vmul.f32 %v1510_v14, %v1209_v10 }
 0x5d0   : > { %v1212_v17 = vmul.f32 %v1510_v14, %v1211_v16 }
 0x5d2   : > { %v1213_v18 = vmul.f32 0.5, %v1212_v17 }
 0x5d4   : > { %v1214_v19 = vsub.f32 1.5, %v1213_v18 }
 0x5d6   : > { %v1215_v20 = vmul.f32 %v1510_v14, %v1214_v19 }
 0x5d8   : > { %v1216_v21 = vmul.f32 %v1215_v20, %v1209_v10 }
 0x5da   : > { %v1218_v24 = vsel %vm1217_vm9, %v1209_v10, %v1216_v21 }
 0x5db   : > { %v1221_v25 = vsel %vm1219_vm10, %v1220_v22, %v1218_v24 }
 0x5dc   : > { %v1222_v26 = vadd.f32 1e-12, %v1221_v25 }
 0x5de   : > { %1511 = vrcp.f32 %v1222_v26  ;;  %v1234_v30 = vand.u32 2147483648, %v1222_v26  ;;  %v1232_v32 = vand.u32 2147483647, %v1222_v26  ;;  %vm1228_vm12 = vweird.f32 %v1222_v26 }
 0x5e0   : > { %v1235_v34 = vor.u32 1.1754944e-38, %v1234_v30  ;;  %vm1233_vm14 = vcmp.eq.f32.partialorder %v1232_v32, 8.507059e+37 }
 0x5e4   : > { %v1512_v27 = vpop.eup %1511 }
 0x5e5   : > { %v1224_v28 = vmul.f32 %v1512_v27, %v1222_v26  ;;  %vm1229_vm11 = vweird.f32 %v1512_v27 }
 0x5e6   : > { %vm1230_vm13 = vmor %vm1228_vm12, %vm1229_vm11 }
 0x5e7   : > { %v1225_v29 = vsub.f32 1.0, %v1224_v28 }
 0x5e9   : > { %v1226_v31 = vmul.f32 %v1512_v27, %v1225_v29 }
 0x5eb   : > { %v1227_v33 = vadd.f32 %v1512_v27, %v1226_v31 }
 0x5ed   : > { %v1231_v36 = vsel %vm1230_vm13, %v1512_v27, %v1227_v33 }
 0x5ee   : > { %v1236_v38 = vsel %vm1233_vm14, %v1235_v34, %v1231_v36 }
 0x5ef   : > { %v1237_v63 = vmul.f32 %v1236_v38, %v1204_v6 }
 0x5f1   : > { %v1241_v40 = vmul.f32 %v1489_v35, %v1237_v63 }
 0x5f3   : > { %v1245_v41 = vadd.f32 %v1490_v39, %v1241_v40 }
 0x5f5   : > { %1246 = vst.msk [vmem:[%s394_s13] sm:$0xff] %vm418_vm0, %v1245_v41 }
 0x5f6 PF: > { %s21_s27 = sadd.s32 1, %s1681_s27  }
 0x5f7   : > { %p18_p7 = scmp.ge.s32.totalorder %s21_s27, 4  }
 0x5f9   :  { %20 = sbr.rel (!%p18_p7) target bundleno = 3 (0x3), region = 106 }
 0x5fe   :  { %1266 = vsyncpa [#allocation3], 1 }
 0x5ff   :  { %1268 = vsyncpa [#allocation3 + $0x1], 1 }
 0x600   :  { %1269 = vsyncpa [#allocation5], 1 }
 0x601   :  { %1270 = vsyncpa [#allocation8], 1 }

// kernel: decoder_forward.10
= control target key start
LH: loop header
LB: loop body
LE: loop exit
PB: predicated region body
PF: predicated region fallthrough
CT: control target
= control target key end

     0   :  { %16 = vsyncpa [#allocation3], 0  ;;  %s2429_s0 = inlined_call_operand.vmem [shape: f32[2,8,32], index: 0, kind: input, shape index: {}]   ;;  %s2430_s1 = inlined_call_operand.vmem [shape: bf16[2,8,32], index: 1, kind: input, shape index: {}]   ;;  %s2431_s2 = inlined_call_operand.vmem [shape: f32[2,1,8], index: 2, kind: input, shape index: {}]   ;;  %s2432_s3 = inlined_call_operand.hbm [shape: bf16[32,32], index: 3, kind: input, shape index: {}]   ;;  %s2433_s4 = inlined_call_operand.hbm [shape: f32[1,32], index: 4, kind: input, shape index: {}]   ;;  %s2434_s5 = inlined_call_operand.hbm [shape: bf16[32,64], index: 5, kind: input, shape index: {}]   ;;  %s2435_s6 = inlined_call_operand.hbm [shape: f32[1,64], index: 6, kind: input, shape index: {}]   ;;  %s2436_s7 = inlined_call_operand.hbm [shape: bf16[32,32], index: 7, kind: input, shape index: {}]   ;;  %s2437_s8 = inlined_call_operand.hbm [shape: f32[1,32], index: 8, kind: input, shape index: {}]   ;;  %s2438_s9 = inlined_call_operand.hbm [shape: f32[1,32], index: 9, kind: input, shape index: {}]   ;;  %s2439_s10 = inlined_call_operand.hbm [shape: f32[1,32], index: 10, kind: input, shape index: {}]   ;;  %s2440_s11 = inlined_call_operand.vmem [shape: f32[2,8,32], index: 11, kind: output, shape index: {}]  }
   0x1   :  { %17 = vsyncpa [#allocation5], 0 }
   0x2   :  { %18 = vsyncpa [#allocation8], 0 }
   0x3   :  { %19 = vsyncpa [#allocation11], 0 }
   0x4   :  { %20 = vsyncpa [#allocation14], 0  ;;  %s2113_s17 = smov 0  }
   0x5 LB: > { %s329_s20 = sshll.u32 %s2433_s4, 4  ;;  %s2122_s21 = sadd.s32 4294967295, %s2030_s17   ;;  %s2030_s17 = sphi %s2113_s17, %s26_s17   ;;  %s330_s20 = int_to_ptr.hbm [resolvable:$true] %s329_s20 }
   0x6   : > { %p1570_p0 = scmp.ge.s32.totalorder %s2030_s17, 1  ;;  %p303_p1 = scmp.lt.s32.totalorder %s2030_s17, 3 }
   0x7   : > { %p1692_p2 = scmp.eq.s32.totalorder %s2122_s21, 0  ;;  %s2032_s23 = smov [#allocation4]  }
   0x8   : > { %p2127_p3 = pnand %p1570_p0, %p303_p1  ;;  %s331_s24 = sshll.u32 %s2032_s23, 4  ;;  %s332_s24 = int_to_ptr.vmem [resolvable:$true] %s331_s24 }
   0x9   : > { %s355_s27 = sshll.u32 %s2435_s6, 4  ;;  %s381_s30 = sshll.u32 %s2437_s8, 4  ;;  %s356_s27 = int_to_ptr.hbm [resolvable:$true] %s355_s27  ;;  %s382_s30 = int_to_ptr.hbm [resolvable:$true] %s381_s30 }
   0xa   : > { %p1667_p4 = pneg %p2127_p3  ;;  %s2033_s13 = smov [#allocation7]  }
   0xb   : > { %s357_s14 = sshll.u32 %s2033_s13, 4  ;;  %s2034_s15 = smov [#allocation10]   ;;  %s358_s14 = int_to_ptr.vmem [resolvable:$true] %s357_s14 }
   0xc   : > { %p2141_p5 = pnand %p1692_p2, %p1667_p4  ;;  %s383_s16 = sshll.u32 %s2034_s15, 4  ;;  %s384_s16 = int_to_ptr.vmem [resolvable:$true] %s383_s16 }
   0xd   : > { %s314_s23 = sshll.u32 %s2432_s3, 4  ;;  %s2035_s25 = smov [#allocation2]   ;;  %s315_s23 = int_to_ptr.hbm [resolvable:$true] %s314_s23 }
   0xe   : > { %1673 = dma.hbm_to_vmem [thread:$0]  (!%p2141_p5), %s330_s20, 16, %s332_s24, [#allocation5]  }
   0xf   : > { %1679 = dma.hbm_to_vmem [thread:$0]  (!%p2141_p5), %s356_s27, 16, %s358_s14, [#allocation8]  }
  0x10   : > { %1685 = dma.hbm_to_vmem [thread:$0]  (!%p2141_p5), %s382_s30, 16, %s384_s16, [#allocation11]  }
  0x11   : > { %s316_s26 = sshll.u32 %s2035_s25, 4  ;;  %s340_s20 = sshll.u32 %s2434_s5, 4  ;;  %s317_s26 = int_to_ptr.vmem [resolvable:$true] %s316_s26  ;;  %s341_s20 = int_to_ptr.hbm [resolvable:$true] %s340_s20 }
  0x12   : > { %s2036_s24 = smov 64   ;;  %s2037_s27 = smov 4  }
  0x13   : > { %1670 = dma.hbm_to_vmem [thread:$0]  (!%p2141_p5), %s315_s23, 256, %s317_s26, [#allocation3], %s2036_s24, %s2036_s24, %s2037_s27  }
  0x14   : > { %s2038_s13 = smov [#allocation6]   ;;  %s366_s30 = sshll.u32 %s2436_s7, 4  ;;  %s367_s30 = int_to_ptr.hbm [resolvable:$true] %s366_s30 }
  0x15   : > { %s342_s14 = sshll.u32 %s2038_s13, 4  ;;  %s393_s25 = sshll.u32 %s2438_s9, 4  ;;  %s343_s14 = int_to_ptr.vmem [resolvable:$true] %s342_s14  ;;  %s394_s25 = int_to_ptr.hbm [resolvable:$true] %s393_s25 }
  0x16   : > { %1676 = dma.hbm_to_vmem [thread:$0]  (!%p2141_p5), %s341_s20, 256, %s343_s14, [#allocation5], %s2036_s24, %s2036_s24, %s2037_s27  }
  0x17   : > { %s2039_s28 = smov [#allocation9]   ;;  %s2040_s23 = smov [#allocation12]  }
  0x18   : > { %s368_s29 = sshll.u32 %s2039_s28, 4  ;;  %s395_s26 = sshll.u32 %s2040_s23, 4  ;;  %s369_s29 = int_to_ptr.vmem [resolvable:$true] %s368_s29  ;;  %s396_s26 = int_to_ptr.vmem [resolvable:$true] %s395_s26 }
  0x19   : > { %1682 = dma.hbm_to_vmem [thread:$0]  (!%p2141_p5), %s367_s30, 256, %s369_s29, [#allocation8], %s2036_s24, %s2036_s24, %s2037_s27  }
  0x1a   : > { %s405_s18 = sshll.u32 %s2439_s10, 4  ;;  %s2041_s20 = smov [#allocation13]   ;;  %s406_s18 = int_to_ptr.hbm [resolvable:$true] %s405_s18 }
  0x1b   : > { %1688 = dma.hbm_to_vmem [thread:$0]  (!%p2141_p5), %s394_s25, 16, %s396_s26, [#allocation11]  }
  0x1c   : > { %s407_s14 = sshll.u32 %s2041_s20, 4  ;;  %440 = sbr.rel (%p2127_p3) target bundleno = 1428 (0x594), region = 64  ;;  %s408_s14 = int_to_ptr.vmem [resolvable:$true] %s407_s14 }
  0x1d   : > { %1691 = dma.hbm_to_vmem [thread:$0]  (!%p2141_p5), %s406_s18, 16, %s408_s14, [#allocation14]  }
  0x21   : > { %2009 = dma.done.wait (%p1692_p2), [#allocation3], 256  }
  0x22   : > { %2011 = vsyncadd (%p1692_p2), [#allocation3], 4294967040 }
  0x23   : > { %2013 = dma.done.wait (%p1692_p2), [#allocation5], 272  }
  0x24   : > { %2015 = vsyncadd (%p1692_p2), [#allocation5], 4294967024 }
  0x25   : > { %2017 = dma.done.wait (%p1692_p2), [#allocation8], 272  }
  0x26   : > { %2019 = vsyncadd (%p1692_p2), [#allocation8], 4294967024 }
  0x27   : > { %2021 = dma.done.wait (%p1692_p2), [#allocation11], 32  }
  0x28   : > { %2023 = vsyncadd (%p1692_p2), [#allocation11], 4294967264 }
  0x29   : > { %2025 = dma.done.wait (%p1692_p2), [#allocation14], 16  }
  0x2a   : > { %2027 = vsyncadd (%p1692_p2), [#allocation14], 4294967280  ;;  %p521_p6 = scmp.lt.s32.totalorder %s2122_s21, 1  ;;  %v1632_v0 = vld [vmem:[#allocation6 + $0x8] sm:$0xff]  ;;  %v1630_v1 = vld [vmem:[#allocation2 + $0x8] sm:$0xff]  ;;  %vm559_vm0 = vcmask 261120  }
  0x2b   : > { %v1631_v2 = vld [vmem:[#allocation6] sm:$0xff]  ;;  %v1629_v3 = vld [vmem:[#allocation2] sm:$0xff]  ;;  %607 = vmatpush.bf16.msra.mxu1 %v1632_v0  ;;  %569 = vmatpush.bf16.msra.mxu0 %v1630_v1  ;;  %v1738_v8 = vld [vmem:[#allocation4] ss:$0 sm:$0xff]  ;;  %s2042_s28 = smov 104   ;;  %s2043_s29 = smov 120  }
  0x2c   : > { %s2444_s21 = smov (!%p521_p6, %s2122_s21), 1  ;;  %v1737_v7 = vld [vmem:[#allocation7] ss:$0 sm:$0xff]  ;;  %s2044_s23 = smov 112   ;;  %v2046_v19 = vmov 1983009808  }
  0x2d   : > { %s1589_s22 = sshll.u32 %s2444_s21, 3  ;;  %s1590_s30 = sshll.u32 %s2444_s21, 2  ;;  %v641_v20 = vunpack.c.l.s4 %v2046_v19  ;;  %v2047_v35 = vmov 1934713408   ;;  %vm650_vm1 = vcmask 1047556   ;;  %vm986_vm2 = vcmask 64512  }
  0x2e   : > { %s524_s27 = scalar_lea.vmem %s2429_s0, %s1589_s22  ;;  %s528_s25 = scalar_lea.vmem %s2430_s1, %s1590_s30  ;;  %v655_v36 = vunpack.c.l.s4 %v2047_v35  ;;  %vm1122_vm5 = vcmask 1043456   ;;  %vm1320_vm6 = vcmask 130048   ;;  %vm1322_vm7 = vcmask 195584  }
  0x2f   : > { %v2209_v4 = vld [vmem:[%s524_s27] sm:$0xff]  ;;  %608 = vmatpush.bf16.msra.mxu1 %v1631_v2  ;;  %570 = vmatpush.bf16.msra.mxu0 %v1629_v3  ;;  %s2045_s26 = smov 96   ;;  %v2223_v24 = vunpack.c.0.s8 %v641_v20  ;;  %s531_s18 = scalar_lea.vmem %s2431_s2, %s2444_s21 }
  0x30   : > { %v538_v5 = vpack.c.bf16 %v2209_v4, %v2209_v4  ;;  %v577_v6 = vld [vmem:[%s528_s25] sm:$0xf]  ;;  %v2237_v49 = vunpack.c.0.s8 %v655_v36  ;;  %s2049_s20 = smov 24   ;;  %s2050_s14 = smov 16  }
  0x31   : > { %s2051_s12 = smov 8   ;;  %s535_s30 = scalar_lea.vmem %s2440_s11, %s1589_s22 }
  0x32   : > { %1609 = vmatmul.msk.bf16.vlgmr.msra.gmra.mxu1 %vm559_vm0, %v577_v6  ;;  %1600 = vmatmul.msk.bf16.vlgmr.msra.gmra.mxu0 %vm559_vm0, %v538_v5 }
  0xaf   : > { %v610_v9 = vpop.f32.mrf.mxu1  ;;  %v572_v10 = vpop.f32.mrf.mxu0 }
  0xb0   : > { %v611_v11 = vadd.f32 %v1737_v7, %v610_v9  ;;  %v573_v12 = vadd.f32 %v1738_v8, %v572_v10 }
  0xb2   : > { %v742_v13 = vpack.c.bf16 %v611_v11, %v611_v11  ;;  %v576_v14 = vmul.f32 0.35355338, %v573_v12 }
  0xb4   : > { %748 = vrot.lane.b32.xlu1 %v742_v13, %s2042_s28  ;;  %744 = vrot.lane.b32.xlu0 %v742_v13, %s2043_s29  ;;  %v619_v15 = vpack.c.bf16 %v576_v14, %v576_v14  ;;  %v753_v25 = vshrl.u32 %v742_v13, 16 }
  0xb6   : > { %623 = vrot.lane.b32.xlu2 %v619_v15, %s2044_s23  ;;  %v630_v41 = vshrl.u32 %v619_v15, 16 }
  0xb7   : > { %v612_v16 = vpop.f32.mrf.mxu1  ;;  %v574_v17 = vpop.f32.mrf.mxu0 }
  0xbc   : > { %746 = vrot.lane.b32.xlu0 %v742_v13, %s2044_s23  ;;  %621 = vrot.lane.b32.xlu1 %v619_v15, %s2043_s29 }
  0xbe   : > { %625 = vrot.lane.b32.xlu2 %v619_v15, %s2042_s28 }
  0xc4   : > { %864 = vrot.lane.b32.xlu0 %v742_v13, %s2045_s26 }
 0x110   : > { %v624_v18 = vpop.permute.xlu2 %623 }
 0x111   : > { %v636_v27 = vshrl.u32 %v624_v18, 16 }
 0x118   : > { %v626_v21 = vpop.permute.xlu2 %625 }
 0x119   : > { %v635_v28 = vpack.i.b16 %v626_v21, %v624_v18  ;;  %v637_v29 = vshrl.u32 %v626_v21, 16 }
 0x11b   : > { %v638_v32 = vpack.i.b16 %v637_v29, %v636_v27  ;;  %v648_v33 = vperm.slane %v635_v28, %v2223_v24 }
 0x11d   : > { %v649_v46 = vrot.slane %v648_v33, 4  ;;  %v675_v47 = vperm.slane %v638_v32, %v2223_v24 }
 0x11f   : > { %v676_v59 = vrot.slane %v675_v47, 4 }
 0x126   : > { %v2219_v22 = vpop.permute.xlu1 %748  ;;  %v2221_v23 = vpop.permute.xlu0 %744 }
 0x127   : > { %v754_v26 = vshrl.u32 %v2221_v23, 16  ;;  %v752_v30 = vpack.i.b16 %v2221_v23, %v742_v13  ;;  %v760_v37 = vshrl.u32 %v2219_v22, 16 }
 0x129   : > { %v755_v31 = vpack.i.b16 %v754_v26, %v753_v25  ;;  %v766_v34 = vperm.slane %v752_v30, %v2223_v24 }
 0x12b   : > { %v792_v38 = vperm.slane %v755_v31, %v2223_v24  ;;  %v774_v48 = vrot.slane %v766_v34, 4 }
 0x12d   : > { %v800_v54 = vrot.slane %v792_v38, 4 }
 0x12e   : > { %v2231_v39 = vpop.permute.xlu0 %746  ;;  %v622_v40 = vpop.permute.xlu1 %621 }
 0x12f   : > { %v758_v42 = vpack.i.b16 %v2219_v22, %v2231_v39  ;;  %v759_v43 = vshrl.u32 %v2231_v39, 16  ;;  %v629_v44 = vpack.i.b16 %v622_v40, %v619_v15  ;;  %v631_v45 = vshrl.u32 %v622_v40, 16 }
 0x131   : > { %v761_v50 = vpack.i.b16 %v760_v37, %v759_v43  ;;  %v771_v51 = vperm.slane %v758_v42, %v2223_v24  ;;  %v632_v52 = vpack.i.b16 %v631_v45, %v630_v41  ;;  %v643_v53 = vperm.slane %v629_v44, %v2223_v24 }
 0x133   : > { %v772_v55 = vrot.slane %v771_v51, 4  ;;  %v775_v56 = vsel %vm650_vm1, %v771_v51, %v774_v48  ;;  %v797_v57 = vperm.slane %v761_v50, %v2223_v24  ;;  %v651_v58 = vsel %vm650_vm1, %v649_v46, %v643_v53 }
 0x134   : > { %v783_v60 = vperm.slane %v775_v56, %v2237_v49  ;;  %v652_v61 = vrot.slane %v643_v53, 4  ;;  %v670_v62 = vperm.slane %v632_v52, %v2223_v24  ;;  %v657_v2 = vperm.slane %v651_v58, %v2237_v49 }
 0x135   : > { %v773_v63 = vsel %vm650_vm1, %v772_v55, %v766_v34  ;;  %v798_v0 = vrot.slane %v797_v57, 4  ;;  %v801_v1 = vsel %vm650_vm1, %v797_v57, %v800_v54 }
 0x136   : > { %v779_v3 = vperm.slane %v773_v63, %v2237_v49  ;;  %v786_v5 = vrot.slane %v783_v60, 4  ;;  %v809_v6 = vperm.slane %v801_v1, %v2237_v49  ;;  %v653_v7 = vsel %vm650_vm1, %v648_v33, %v652_v61 }
 0x137   : > { %v799_v8 = vsel %vm650_vm1, %v798_v0, %v792_v38  ;;  %v661_v9 = vperm.slane %v653_v7, %v2237_v49  ;;  %v677_v10 = vsel %vm650_vm1, %v676_v59, %v670_v62  ;;  %v678_v17 = vrot.slane %v670_v62, 4 }
 0x138   : > { %v784_v11 = vrot.slane %v779_v3, 4  ;;  %v787_v12 = vsel %vm650_vm1, 0, %v786_v5  ;;  %v805_v13 = vperm.slane %v799_v8, %v2237_v49  ;;  %v812_v14 = vrot.slane %v809_v6, 4 }
 0x139   : > { %v819_v15 = vrot.slane %v787_v12, 4  ;;  %v664_v16 = vrot.slane %v661_v9, 4  ;;  %v662_v20 = vrot.slane %v657_v2, 4  ;;  %v683_v21 = vperm.slane %v677_v10, %v2237_v49 }
 0x13a   : > { %v810_v18 = vrot.slane %v805_v13, 4  ;;  %v813_v19 = vsel %vm650_vm1, 0, %v812_v14  ;;  %v679_v27 = vsel %vm650_vm1, %v675_v47, %v678_v17  ;;  %v785_v30 = vsel %vm650_vm1, 0, %v784_v11 }
 0x13b   : > { %v838_v25 = vrot.slane %v813_v19, 4  ;;  %v665_v26 = vsel %vm650_vm1, 0, %v664_v16  ;;  %v687_v28 = vperm.slane %v679_v27, %v2237_v49  ;;  %v688_v31 = vrot.slane %v683_v21, 4 }
 0x13c   : > { %v697_v29 = vrot.slane %v665_v26, 4  ;;  %v811_v32 = vsel %vm650_vm1, 0, %v810_v18  ;;  %v814_v33 = vsel %vm650_vm1, %v786_v5, %v779_v3  ;;  %v820_v34 = vsel %vm650_vm1, %v819_v15, %v785_v30 }
 0x13d   : > { %v663_v35 = vsel %vm650_vm1, 0, %v662_v20  ;;  %v690_v36 = vrot.slane %v687_v28, 4  ;;  %v824_v37 = vperm.slane %v820_v34, %v2223_v24  ;;  %v833_v38 = vsel %vm650_vm1, %v812_v14, %v805_v13 }
 0x13e   : > { %v692_v40 = vsel %vm650_vm1, %v664_v16, %v657_v2  ;;  %v818_v41 = vperm.slane %v814_v33, %v2223_v24  ;;  %v839_v42 = vsel %vm650_vm1, %v838_v25, %v811_v32  ;;  %v698_v43 = vsel %vm650_vm1, %v697_v29, %v663_v35 }
 0x13f   : > { %v691_v44 = vsel %vm650_vm1, 0, %v690_v36  ;;  %v825_v45 = vrot.slane %v824_v37, 4  ;;  %v843_v46 = vperm.slane %v839_v42, %v2223_v24  ;;  %v702_v47 = vperm.slane %v698_v43, %v2223_v24 }
 0x140   : > { %v689_v48 = vsel %vm650_vm1, 0, %v688_v31  ;;  %v716_v50 = vrot.slane %v691_v44, 4  ;;  %v837_v51 = vperm.slane %v833_v38, %v2223_v24  ;;  %v696_v54 = vperm.slane %v692_v40, %v2223_v24 }
 0x141   : > { %v826_v52 = vsel %vm650_vm1, %v825_v45, %v818_v41  ;;  %v844_v53 = vrot.slane %v843_v46, 4  ;;  %v703_v55 = vrot.slane %v702_v47, 4  ;;  %v711_v57 = vsel %vm650_vm1, %v690_v36, %v683_v21  ;;  %v614_v36 = vld [vmem:[%s531_s18] sm:$0x1] }
 0x142   : > { %v830_v56 = vperm.slane %v826_v52, %v2237_v49  ;;  %v717_v58 = vsel %vm650_vm1, %v716_v50, %v689_v48  ;;  %v715_v2 = vperm.slane %v711_v57, %v2223_v24  ;;  %vm1063_vm3 = vcmp.eq.f32.partialorder %v614_v36, 0.0 }
 0x143   : > { %v845_v59 = vsel %vm650_vm1, %v844_v53, %v837_v51  ;;  %v704_v60 = vsel %vm650_vm1, %v703_v55, %v696_v54  ;;  %v721_v61 = vperm.slane %v717_v58, %v2223_v24  ;;  %v2048_v37 = vmov 0   ;;  %v865_v58 = vpop.permute.xlu0 %864 }
 0x144   : > { %v849_v62 = vperm.slane %v845_v59, %v2237_v49  ;;  %v831_v63 = vrot.slane %v830_v56, 4  ;;  %v855_v0 = vshrl.u32 %v830_v56, 16  ;;  %v708_v1 = vperm.slane %v704_v60, %v2237_v49 }
 0x145   : > { %v722_v3 = vrot.slane %v721_v61, 4  ;;  %v1064_v38 = vsel %vm1063_vm3, 1, %v2048_v37 }
 0x146   : > { %v854_v5 = vpack.i.b16 %v849_v62, %v830_v56  ;;  %v856_v6 = vshrl.u32 %v849_v62, 16  ;;  %v832_v7 = vsel %vm650_vm1, 0, %v831_v63  ;;  %v850_v8 = vrot.slane %v849_v62, 4 }
 0x147   : > { %v723_v9 = vsel %vm650_vm1, %v722_v3, %v715_v2  ;;  %v861_v15 = vshrl.u32 %v832_v7, 16  ;;  %v709_v18 = vrot.slane %v708_v1, 4  ;;  %v733_v29 = vshrl.u32 %v708_v1, 16 }
 0x148   : > { %v991_v10 = vsel %vm986_vm2, %v854_v5, 0  ;;  %v857_v11 = vpack.i.b16 %v856_v6, %v855_v0  ;;  %v851_v12 = vsel %vm650_vm1, 0, %v850_v8  ;;  %v727_v13 = vperm.slane %v723_v9, %v2237_v49 }
 0x149   : > { %1000 = vmatpush.bf16.xpose.msra.mxu2 %v991_v10  ;;  %v860_v14 = vpack.i.b16 %v851_v12, %v832_v7  ;;  %v862_v16 = vshrl.u32 %v851_v12, 16  ;;  %v710_v30 = vsel %vm650_vm1, 0, %v709_v18  ;;  %v1065_v40 = vperm.slane %v1064_v38, 0 }
 0x14a   : > { %v1010_v17 = vsel %vm986_vm2, %v857_v11, 0  ;;  %v728_v19 = vrot.slane %v727_v13, 4  ;;  %v734_v25 = vshrl.u32 %v727_v13, 16  ;;  %v732_v28 = vpack.i.b16 %v727_v13, %v708_v1 }
 0x14b   : > { %1019 = vmatpush.bf16.xpose.msra.mxu3 %v1010_v17  ;;  %v1029_v20 = vsel %vm986_vm2, %v860_v14, 0  ;;  %v863_v21 = vpack.i.b16 %v862_v16, %v861_v15  ;;  %v739_v34 = vshrl.u32 %v710_v30, 16  ;;  %vm1066_vm4 = vcmp.eq.s32.totalorder %v1065_v40, 1 }
 0x14c   : > { %1038 = vmatpush.bf16.xpose.msrb.mxu0 %v1029_v20  ;;  %v729_v26 = vsel %vm650_vm1, 0, %v728_v19  ;;  %v735_v32 = vpack.i.b16 %v734_v25, %v733_v29 }
 0x14d   : > { %v1048_v27 = vsel %vm986_vm2, %v863_v21, 0  ;;  %v740_v31 = vshrl.u32 %v729_v26, 16  ;;  %v738_v33 = vpack.i.b16 %v729_v26, %v710_v30  ;;  %v875_v21 = vshrl.u32 %v865_v58, 16 }
 0x14e   : > { %1057 = vmatpush.bf16.xpose.msrb.mxu1 %v1048_v27 }
 0x14f   : > { %v741_v35 = vpack.i.b16 %v740_v31, %v739_v34 }
 0x150   : > { %1610 = vmatmul.msk.bf16.vlgmr.msra.gmra.mxu2 %vm986_vm2, %v732_v28 }
 0x152   : > { %1611 = vmatmul.msk.bf16.vlgmr.msra.gmra.mxu3 %vm986_vm2, %v735_v32 }
 0x153   : > { %1612 = vmatmul.msk.bf16.vlgmr.msrb.gmra.mxu0 %vm986_vm2, %v738_v33 }
 0x155   : > { %1613 = vmatmul.msk.bf16.vlgmr.msrb.gmra.mxu1 %vm986_vm2, %v741_v35 }
 0x1d0   : > { %v1040_v41 = vpop.f32.mrf.mxu0 }
 0x1d1   : > { %v1069_v42 = vsel %vm1066_vm4, -1e+10, %v1040_v41 }
 0x1d2   : > { %v1059_v43 = vpop.f32.mrf.mxu1  ;;  %v1077_v44 = vsel %vm986_vm2, %v1069_v42, -inf }
 0x1d3   : > { %v1002_v45 = vpop.f32.mrf.mxu2  ;;  %1078 = vmax.xlane.f32.xlu2 %v1077_v44  ;;  %v1070_v51 = vsel %vm1066_vm4, -1e+10, %v1059_v43 }
 0x1d4   : > { %v1067_v46 = vsel %vm1066_vm4, -1e+10, %v1002_v45  ;;  %v1080_v55 = vsel %vm986_vm2, %v1070_v51, -inf }
 0x1d5   : > { %v1021_v47 = vpop.f32.mrf.mxu3  ;;  %v1071_v48 = vsel %vm986_vm2, %v1067_v46, -inf }
 0x1d6   : > { %v1068_v50 = vsel %vm1066_vm4, -1e+10, %v1021_v47  ;;  %1072 = vmax.xlane.f32.xlu0 %v1071_v48 }
 0x1d7   : > { %v1074_v52 = vsel %vm986_vm2, %v1068_v50, -inf }
 0x1d8   : > { %1075 = vmax.xlane.f32.xlu1 %v1074_v52  ;;  %v1042_v53 = vpop.f32.mrf.mxu0 }
 0x1da   : > { %v1061_v54 = vpop.f32.mrf.mxu1 }
 0x1db   : > { %v1004_v56 = vpop.f32.mrf.mxu2  ;;  %1081 = vmax.xlane.f32.xlu2 %v1080_v55 }
 0x1dd   : > { %v1023_v57 = vpop.f32.mrf.mxu3 }
 0x1ea   : > { %870 = vrot.lane.b32.xlu0 %v2219_v22, %s2045_s26 }
 0x1f1   : > { %866 = vrot.lane.b32.xlu1 %v2221_v23, %s2045_s26 }
 0x1f3   : > { %868 = vrot.lane.b32.xlu2 %v2231_v39, %s2045_s26 }
 0x246   : > { %v1079_v59 = vpop.xlane.xlu2 %1078 }
 0x247   : > { %v1085_v60 = vsub.f32 %v1069_v42, %v1079_v59 }
 0x249   : > { %v1091_v61 = vmul.f32 1.442695, %v1085_v60  ;;  %v1073_v62 = vpop.xlane.xlu0 %1072 }
 0x24a   : > { %v1083_v63 = vsub.f32 %v1067_v46, %v1073_v62 }
 0x24b   : > { %1742 = vpow2.f32 %v1091_v61  ;;  %v1076_v0 = vpop.xlane.xlu1 %1075 }
 0x24c   : > { %v1087_v1 = vmul.f32 1.442695, %v1083_v63  ;;  %v1084_v2 = vsub.f32 %v1068_v50, %v1076_v0 }
 0x24e   : > { %1744 = vpow2.f32 %v1087_v1  ;;  %v1089_v3 = vmul.f32 1.442695, %v1084_v2  ;;  %v1082_v5 = vpop.xlane.xlu2 %1081 }
 0x24f   : > { %v1086_v22 = vsub.f32 %v1070_v51, %v1082_v5 }
 0x250   : > { %1746 = vpow2.f32 %v1089_v3 }
 0x251   : > { %v2317_v6 = vpop.eup %1742  ;;  %v1093_v23 = vmul.f32 1.442695, %v1086_v22 }
 0x252   : > { %v1101_v39 = vsel %vm986_vm2, %v2317_v6, 0.0 }
 0x253   : > { %1102 = vadd.xlane.f32.xlu2 %v1101_v39  ;;  %1748 = vpow2.f32 %v1093_v23 }
 0x254   : > { %v2321_v7 = vpop.eup %1744 }
 0x255   : > { %v1095_v8 = vsel %vm986_vm2, %v2321_v7, 0.0 }
 0x256   : > { %v2325_v9 = vpop.eup %1746  ;;  %1096 = vadd.xlane.f32.xlu1 %v1095_v8  ;;  %v869_v12 = vpop.permute.xlu2 %868 }
 0x257   : > { %v1098_v10 = vsel %vm986_vm2, %v2325_v9, 0.0  ;;  %v881_v16 = vshrl.u32 %v869_v12, 16 }
 0x258   : > { %1099 = vadd.xlane.f32.xlu0 %v1098_v10 }
 0x259   : > { %v2329_v11 = vpop.eup %1748 }
 0x25a   : > { %v1104_v15 = vsel %vm986_vm2, %v2329_v11, 0.0 }
 0x25c   : > { %v871_v13 = vpop.permute.xlu0 %870 }
 0x25d   : > { %v882_v14 = vshrl.u32 %v871_v13, 16  ;;  %v880_v17 = vpack.i.b16 %v871_v13, %v869_v12 }
 0x25e   : > { %1105 = vadd.xlane.f32.xlu1 %v1104_v15 }
 0x25f   : > { %v883_v18 = vpack.i.b16 %v882_v14, %v881_v16  ;;  %v893_v19 = vperm.slane %v880_v17, %v2223_v24 }
 0x261   : > { %v919_v25 = vperm.slane %v883_v18, %v2223_v24  ;;  %v894_v28 = vrot.slane %v893_v19, 4 }
 0x263   : > { %v867_v20 = vpop.permute.xlu1 %866  ;;  %v920_v31 = vrot.slane %v919_v25, 4 }
 0x264   : > { %v874_v26 = vpack.i.b16 %v867_v20, %v865_v58  ;;  %v876_v27 = vshrl.u32 %v867_v20, 16 }
 0x266   : > { %v877_v29 = vpack.i.b16 %v876_v27, %v875_v21  ;;  %v888_v30 = vperm.slane %v874_v26, %v2223_v24 }
 0x268   : > { %v895_v32 = vsel %vm650_vm1, %v894_v28, %v888_v30  ;;  %v896_v33 = vrot.slane %v888_v30, 4  ;;  %v914_v34 = vperm.slane %v877_v29, %v2223_v24 }
 0x269   : > { %v901_v35 = vperm.slane %v895_v32, %v2237_v49 }
 0x26a   : > { %v897_v36 = vsel %vm650_vm1, %v893_v19, %v896_v33  ;;  %v921_v37 = vsel %vm650_vm1, %v920_v31, %v914_v34  ;;  %v922_v38 = vrot.slane %v914_v34, 4 }
 0x26b   : > { %v905_v40 = vperm.slane %v897_v36, %v2237_v49  ;;  %v927_v41 = vperm.slane %v921_v37, %v2237_v49  ;;  %v906_v43 = vrot.slane %v901_v35, 4 }
 0x26c   : > { %v923_v42 = vsel %vm650_vm1, %v919_v25, %v922_v38 }
 0x26d   : > { %v908_v44 = vrot.slane %v905_v40, 4  ;;  %v931_v45 = vperm.slane %v923_v42, %v2237_v49  ;;  %v932_v47 = vrot.slane %v927_v41, 4  ;;  %v907_v51 = vsel %vm650_vm1, 0, %v906_v43 }
 0x26f   : > { %v909_v46 = vsel %vm650_vm1, 0, %v908_v44  ;;  %v934_v48 = vrot.slane %v931_v45, 4  ;;  %v936_v54 = vsel %vm650_vm1, %v908_v44, %v901_v35  ;;  %v933_v56 = vsel %vm650_vm1, 0, %v932_v47 }
 0x270   : > { %v941_v50 = vrot.slane %v909_v46, 4  ;;  %v940_v60 = vperm.slane %v936_v54, %v2223_v24 }
 0x271   : > { %v935_v52 = vsel %vm650_vm1, 0, %v934_v48  ;;  %v955_v58 = vsel %vm650_vm1, %v934_v48, %v927_v41 }
 0x272   : > { %v960_v53 = vrot.slane %v935_v52, 4  ;;  %v942_v55 = vsel %vm650_vm1, %v941_v50, %v907_v51  ;;  %v959_v0 = vperm.slane %v955_v58, %v2223_v24 }
 0x273   : > { %v946_v57 = vperm.slane %v942_v55, %v2223_v24 }
 0x274   : > { %v961_v59 = vsel %vm650_vm1, %v960_v53, %v933_v56 }
 0x275   : > { %v947_v61 = vrot.slane %v946_v57, 4  ;;  %v965_v62 = vperm.slane %v961_v59, %v2223_v24 }
 0x277   : > { %v948_v63 = vsel %vm650_vm1, %v947_v61, %v940_v60  ;;  %v966_v1 = vrot.slane %v965_v62, 4 }
 0x278   : > { %v952_v2 = vperm.slane %v948_v63, %v2237_v49 }
 0x279   : > { %v967_v3 = vsel %vm650_vm1, %v966_v1, %v959_v0 }
 0x27a   : > { %v971_v5 = vperm.slane %v967_v3, %v2237_v49  ;;  %v953_v22 = vrot.slane %v952_v2, 4  ;;  %v977_v23 = vshrl.u32 %v952_v2, 16 }
 0x27c   : > { %v976_v39 = vpack.i.b16 %v971_v5, %v952_v2  ;;  %v978_v8 = vshrl.u32 %v971_v5, 16  ;;  %v954_v10 = vsel %vm650_vm1, 0, %v953_v22  ;;  %v972_v12 = vrot.slane %v971_v5, 4 }
 0x27d   : > { %v983_v17 = vshrl.u32 %v954_v10, 16 }
 0x27e   : > { %v1124_v13 = vsel %vm1122_vm5, %v976_v39, 0  ;;  %v979_v14 = vpack.i.b16 %v978_v8, %v977_v23  ;;  %v973_v15 = vsel %vm650_vm1, 0, %v972_v12 }
 0x27f   : > { %1133 = vmatpush.bf16.msrb.mxu2 %v1124_v13  ;;  %v982_v16 = vpack.i.b16 %v973_v15, %v954_v10  ;;  %v984_v18 = vshrl.u32 %v973_v15, 16 }
 0x280   : > { %v1143_v19 = vsel %vm1122_vm5, %v979_v14, 0 }
 0x281   : > { %1152 = vmatpush.bf16.msrb.mxu3 %v1143_v19  ;;  %v1162_v20 = vsel %vm1122_vm5, %v982_v16, 0  ;;  %v985_v21 = vpack.i.b16 %v984_v18, %v983_v17 }
 0x282   : > { %1171 = vmatpush.bf16.msra.mxu0 %v1162_v20 }
 0x283   : > { %v1181_v25 = vsel %vm1122_vm5, %v985_v21, 0 }
 0x284   : > { %1190 = vmatpush.bf16.msra.mxu1 %v1181_v25 }
 0x2c6   : > { %v1103_v26 = vpop.xlane.xlu2 %1102 }
 0x2c7   : > { %1750 = vrcp.f32 %v1103_v26 }
 0x2c9   : > { %v1097_v27 = vpop.xlane.xlu1 %1096 }
 0x2ca   : > { %1752 = vrcp.f32 %v1097_v27 }
 0x2cb   : > { %v1100_v28 = vpop.xlane.xlu0 %1099 }
 0x2cc   : > { %1754 = vrcp.f32 %v1100_v28 }
 0x2cd   : > { %v1751_v29 = vpop.eup %1750 }
 0x2ce   : > { %v1113_v30 = vmul.f32 %v1751_v29, %v2317_v6 }
 0x2d0   : > { %v1753_v31 = vpop.eup %1752  ;;  %v1117_v32 = vpack.c.bf16 %v1113_v30, %v1113_v30 }
 0x2d1   : > { %v1111_v33 = vmul.f32 %v1753_v31, %v2321_v7  ;;  %v1106_v34 = vpop.xlane.xlu1 %1105 }
 0x2d2   : > { %v1755_v35 = vpop.eup %1754  ;;  %1756 = vrcp.f32 %v1106_v34  ;;  %1616 = vmatmul.msk.bf16.vlgmr.msra.gmra.mxu0 %vm986_vm2, %v1117_v32 }
 0x2d3   : > { %v1112_v36 = vmul.f32 %v1755_v35, %v2325_v9  ;;  %v1115_v37 = vpack.c.bf16 %v1111_v33, %v1111_v33 }
 0x2d5   : > { %1614 = vmatmul.msk.bf16.vlgmr.msrb.gmra.mxu2 %vm986_vm2, %v1115_v37  ;;  %v1116_v38 = vpack.c.bf16 %v1112_v36, %v1112_v36 }
 0x2d7   : > { %1615 = vmatmul.msk.bf16.vlgmr.msrb.gmra.mxu3 %vm986_vm2, %v1116_v38 }
 0x2d8   : > { %v1757_v40 = vpop.eup %1756 }
 0x2d9   : > { %v1114_v6 = vmul.f32 %v1757_v40, %v2329_v11 }
 0x2db   : > { %v1118_v41 = vpack.c.bf16 %v1114_v6, %v1114_v6 }
 0x2dd   : > { %1617 = vmatmul.msk.bf16.vlgmr.msra.gmra.mxu1 %vm986_vm2, %v1118_v41 }
 0x34f   : > { %v1173_v7 = vpop.f32.mrf.mxu0 }
 0x350   : > { %v1196_v42 = vrot.slane %v1173_v7, 4 }
 0x357   : > { %v1175_v43 = vpop.f32.mrf.mxu0 }
 0x358   : > { %v1135_v44 = vpop.f32.mrf.mxu2 }
 0x359   : > { %v1198_v45 = vsel %vm650_vm1, %v1196_v42, %v1135_v44  ;;  %v1199_v46 = vrot.slane %v1135_v44, 4 }
 0x35a   : > { %v1204_v9 = vperm.slane %v1198_v45, %v2223_v24  ;;  %v1154_v47 = vpop.f32.mrf.mxu3  ;;  %v1192_v48 = vpop.f32.mrf.mxu1 }
 0x35b   : > { %v1200_v50 = vsel %vm650_vm1, %v1173_v7, %v1199_v46  ;;  %v1211_v51 = vrot.slane %v1154_v47, 4  ;;  %v1209_v52 = vrot.slane %v1192_v48, 4 }
 0x35c   : > { %v1208_v11 = vperm.slane %v1200_v50, %v2223_v24  ;;  %v1223_v55 = vrot.slane %v1204_v9, 4  ;;  %v1633_v50 = vld [vmem:[#allocation9] sm:$0xff] }
 0x35d   : > { %v1210_v53 = vsel %vm650_vm1, %v1209_v52, %v1154_v47  ;;  %v1212_v54 = vsel %vm650_vm1, %v1192_v48, %v1211_v51  ;;  %v1634_v48 = vld [vmem:[#allocation9 + $0x8] sm:$0xff] }
 0x35e   : > { %v1235_v56 = vrot.slane %v1208_v11, 4  ;;  %v1216_v57 = vperm.slane %v1210_v53, %v2223_v24  ;;  %v1220_v58 = vperm.slane %v1212_v54, %v2223_v24  ;;  %1346 = vmatpush.bf16.msra.mxu2 %v1634_v48 }
 0x360   : > { %v1221_v59 = vrot.slane %v1216_v57, 4  ;;  %v1224_v60 = vsel %vm650_vm1, %v1216_v57, %v1223_v55  ;;  %v1233_v61 = vrot.slane %v1220_v58, 4  ;;  %v1236_v62 = vsel %vm650_vm1, %v1220_v58, %v1235_v56  ;;  %v1137_v63 = vpop.f32.mrf.mxu2  ;;  %v1739_v56 = vld [vmem:[#allocation10] ss:$0 sm:$0xff] }
 0x361   : > { %v1232_v0 = vperm.slane %v1224_v60, %v2237_v49  ;;  %v1244_v1 = vperm.slane %v1236_v62, %v2237_v49  ;;  %v2052_v62 = vmov 32.0  }
 0x362   : > { %v1222_v2 = vsel %vm650_vm1, %v1221_v59, %v1204_v9  ;;  %v1234_v3 = vsel %vm650_vm1, %v1233_v61, %v1208_v11  ;;  %v1156_v5 = vpop.f32.mrf.mxu3  ;;  %v1194_v22 = vpop.f32.mrf.mxu1  ;;  %1347 = vmatpush.bf16.msra.mxu2 %v1633_v50  ;;  %1758 = vrcp.f32 %v2052_v62 }
 0x363   : > { %v1228_v23 = vperm.slane %v1222_v2, %v2237_v49  ;;  %v1240_v39 = vperm.slane %v1234_v3, %v2237_v49  ;;  %v1247_v8 = vrot.slane %v1232_v0, 4  ;;  %v1251_v10 = vrot.slane %v1244_v1, 4 }
 0x365   : > { %v1245_v12 = vrot.slane %v1228_v23, 4  ;;  %v1248_v13 = vsel %vm650_vm1, 0.0, %v1247_v8  ;;  %v1249_v14 = vrot.slane %v1240_v39, 4  ;;  %v1252_v15 = vsel %vm650_vm1, 0.0, %v1251_v10 }
 0x366   : > { %v1258_v16 = vrot.slane %v1248_v13, 4  ;;  %v1264_v17 = vsel %vm650_vm1, %v1251_v10, %v1240_v39  ;;  %v1269_v18 = vrot.slane %v1252_v15, 4  ;;  %v1253_v19 = vsel %vm650_vm1, %v1247_v8, %v1228_v23 }
 0x367   : > { %v1250_v20 = vsel %vm650_vm1, 0.0, %v1249_v14  ;;  %v1246_v21 = vsel %vm650_vm1, 0.0, %v1245_v12  ;;  %v1257_v25 = vperm.slane %v1253_v19, %v2223_v24  ;;  %v1268_v26 = vperm.slane %v1264_v17, %v2223_v24 }
 0x368   : > { %v1259_v27 = vsel %vm650_vm1, %v1258_v16, %v1246_v21  ;;  %v1270_v28 = vsel %vm650_vm1, %v1269_v18, %v1250_v20  ;;  %v1759_v63 = vpop.eup %1758 }
 0x369   : > { %v1263_v29 = vperm.slane %v1259_v27, %v2223_v24  ;;  %v1274_v30 = vperm.slane %v1270_v28, %v2223_v24  ;;  %v1277_v31 = vrot.slane %v1257_v25, 4  ;;  %v1289_v32 = vrot.slane %v1268_v26, 4 }
 0x36a   : > { %v1365_v0 = vmul.f32 32.0, %v1759_v63  ;;  %vm1369_vm8 = vweird.f32 %v1759_v63 }
 0x36b   : > { %v1278_v33 = vsel %vm650_vm1, %v1263_v29, %v1277_v31  ;;  %v1290_v34 = vsel %vm650_vm1, %v1274_v30, %v1289_v32  ;;  %v1275_v35 = vrot.slane %v1263_v29, 4  ;;  %v1287_v36 = vrot.slane %v1274_v30, 4 }
 0x36c   : > { %v1286_v37 = vperm.slane %v1278_v33, %v2237_v49  ;;  %v1298_v38 = vperm.slane %v1290_v34, %v2237_v49  ;;  %v1366_v1 = vsub.f32 1.0, %v1365_v0 }
 0x36d   : > { %v1276_v40 = vsel %vm650_vm1, %v1275_v35, %v1257_v25  ;;  %v1288_v6 = vsel %vm650_vm1, %v1287_v36, %v1268_v26  ;;  %v1740_v35 = vld [vmem:[#allocation12] ss:$0 sm:$0xff] }
 0x36e   : > { %v1305_v41 = vrot.slane %v1286_v37, 4  ;;  %v1303_v7 = vrot.slane %v1298_v38, 4  ;;  %v1282_v24 = vperm.slane %v1276_v40, %v2237_v49  ;;  %v1294_v42 = vperm.slane %v1288_v6, %v2237_v49 }
 0x36f   : > { %v1367_v2 = vmul.f32 %v1759_v63, %v1366_v1 }
 0x370   : > { %v1306_v43 = vsel %vm650_vm1, %v1298_v38, %v1305_v41  ;;  %v1304_v44 = vsel %vm650_vm1, %v1303_v7, %v1286_v37  ;;  %v1299_v45 = vrot.slane %v1294_v42, 4  ;;  %v1301_v46 = vrot.slane %v1282_v24, 4  ;;  %v1741_v38 = vld [vmem:[#allocation13] ss:$0 sm:$0xff] }
 0x371   : > { %1316 = vrot.lane.b32.xlu1 %v1306_v43, %s2049_s20  ;;  %1312 = vrot.lane.b32.xlu2 %v1304_v44, %s2050_s14  ;;  %v1368_v3 = vadd.f32 %v1759_v63, %v1367_v2 }
 0x372   : > { %v1302_v9 = vsel %vm650_vm1, %v1294_v42, %v1301_v46  ;;  %v1300_v47 = vsel %vm650_vm1, %v1299_v45, %v1282_v24 }
 0x373   : > { %1308 = vrot.lane.b32.xlu0 %v1302_v9, %s2051_s12  ;;  %v1370_v5 = vsel %vm1369_vm8, %v1759_v63, %v1368_v3 }
 0x3cb   : > { %v1313_v51 = vpop.permute.xlu2 %1312 }
 0x3e3   : > { %v1317_v11 = vpop.permute.xlu1 %1316 }
 0x3e5   : > { %v1309_v49 = vpop.permute.xlu0 %1308 }
 0x3e6   : > { %v1319_v52 = vsel %vm986_vm2, %v1300_v47, %v1309_v49 }
 0x3e7   : > { %v1321_v53 = vsel %vm1320_vm6, %v1319_v52, %v1313_v51 }
 0x3e8   : > { %v1323_v54 = vsel %vm1322_vm7, %v1321_v53, %v1317_v11 }
 0x3e9   : > { %v1324_v55 = vpack.c.bf16 %v1323_v54, %v1323_v54 }
 0x3eb   : > { %1626 = vmatmul.msk.bf16.vlgmr.msra.gmra.mxu2 %vm559_vm0, %v1324_v55 }
 0x46e   : > { %v1349_v57 = vpop.f32.mrf.mxu2 }
 0x46f   : > { %v1353_v58 = vadd.f32 %v1349_v57, %v2209_v4 }
 0x471   : > { %v1358_v59 = vadd.f32 %v1739_v56, %v1353_v58 }
 0x473   : > { %v1361_v60 = vsel %vm559_vm0, %v1358_v59, 0.0 }
 0x474   : > { %1362 = vadd.xlane.f32.xlu0 %v1361_v60 }
 0x476   : > { %v1351_v61 = vpop.f32.mrf.mxu2 }
 0x4e7   : > { %v1363_v22 = vpop.xlane.xlu0 %1362 }
 0x4e8   : > { %v1371_v23 = vmul.f32 %v1370_v5, %v1363_v22 }
 0x4ea   : > { %v1372_v39 = vsub.f32 %v1358_v59, %v1371_v23 }
 0x4ec   : > { %v1373_v8 = vmul.f32 %v1372_v39, %v1372_v39 }
 0x4ee   : > { %v1374_v4 = vsel %vm559_vm0, %v1373_v8, 0.0 }
 0x4ef   : > { %1375 = vadd.xlane.f32.xlu2 %v1374_v4 }
 0x562   : > { %v1376_v10 = vpop.xlane.xlu2 %1375 }
 0x563   : > { %v1377_v12 = vmul.f32 0.032258064, %v1376_v10 }
 0x565   : > { %1760 = vrsqrt.f32 %v1377_v12  ;;  %vm1385_vm9 = vcmp.eq.f32.partialorder %v1377_v12, inf  ;;  %v1388_v20 = vand.u32 2147483648, %v1377_v12  ;;  %vm1387_vm10 = vcmp.eq.f32.partialorder %v1377_v12, 0.0 }
 0x56b   : > { %v1761_v13 = vpop.eup %1760 }
 0x56c   : > { %v1379_v14 = vmul.f32 %v1761_v13, %v1377_v12 }
 0x56e   : > { %v1380_v15 = vmul.f32 %v1761_v13, %v1379_v14 }
 0x570   : > { %v1381_v16 = vmul.f32 0.5, %v1380_v15 }
 0x572   : > { %v1382_v17 = vsub.f32 1.5, %v1381_v16 }
 0x574   : > { %v1383_v18 = vmul.f32 %v1761_v13, %v1382_v17 }
 0x576   : > { %v1384_v19 = vmul.f32 %v1383_v18, %v1377_v12 }
 0x578   : > { %v1386_v21 = vsel %vm1385_vm9, %v1377_v12, %v1384_v19 }
 0x579   : > { %v1389_v25 = vsel %vm1387_vm10, %v1388_v20, %v1386_v21 }
 0x57a   : > { %v1390_v26 = vadd.f32 1e-12, %v1389_v25 }
 0x57c   : > { %1762 = vrcp.f32 %v1390_v26  ;;  %v1402_v30 = vand.u32 2147483648, %v1390_v26  ;;  %v1400_v32 = vand.u32 2147483647, %v1390_v26  ;;  %vm1396_vm12 = vweird.f32 %v1390_v26 }
 0x57e   : > { %v1403_v34 = vor.u32 1.1754944e-38, %v1402_v30  ;;  %vm1401_vm14 = vcmp.eq.f32.partialorder %v1400_v32, 8.507059e+37 }
 0x582   : > { %v1763_v27 = vpop.eup %1762 }
 0x583   : > { %v1392_v28 = vmul.f32 %v1763_v27, %v1390_v26  ;;  %vm1397_vm11 = vweird.f32 %v1763_v27 }
 0x584   : > { %vm1398_vm13 = vmor %vm1396_vm12, %vm1397_vm11 }
 0x585   : > { %v1393_v29 = vsub.f32 1.0, %v1392_v28 }
 0x587   : > { %v1394_v31 = vmul.f32 %v1763_v27, %v1393_v29 }
 0x589   : > { %v1395_v33 = vadd.f32 %v1763_v27, %v1394_v31 }
 0x58b   : > { %v1399_v36 = vsel %vm1398_vm13, %v1763_v27, %v1395_v33 }
 0x58c   : > { %v1404_v37 = vsel %vm1401_vm14, %v1403_v34, %v1399_v36 }
 0x58d   : > { %v1405_v40 = vmul.f32 %v1404_v37, %v1372_v39 }
 0x58f   : > { %v1409_v6 = vmul.f32 %v1740_v35, %v1405_v40 }
 0x591   : > { %v1413_v41 = vadd.f32 %v1741_v38, %v1409_v6 }
 0x593   : > { %1414 = vst.msk [vmem:[%s535_s30] sm:$0xff] %vm559_vm0, %v1413_v41 }
 0x594 PF: > { %s26_s17 = sadd.s32 1, %s2030_s17  }
 0x595   : > { %p23_p7 = scmp.ge.s32.totalorder %s26_s17, 4  }
 0x597   :  { %25 = sbr.rel (!%p23_p7) target bundleno = 5 (0x5), region = 133 }
 0x59c   :  { %1434 = vsyncpa [#allocation3], 1 }
 0x59d   :  { %1436 = vsyncpa [#allocation3 + $0x1], 1 }
 0x59e   :  { %1437 = vsyncpa [#allocation5], 1 }
 0x59f   :  { %1438 = vsyncpa [#allocation8], 1 }
 0x5a0   :  { %1439 = vsyncpa [#allocation11], 1 }
 0x5a1   :  { %1440 = vsyncpa [#allocation14], 1 }

// kernel: decoder_forward.11
= control target key start
LH: loop header
LB: loop body
LE: loop exit
PB: predicated region body
PF: predicated region fallthrough
CT: control target
= control target key end

     0   :  { %12 = vsyncpa [#allocation3], 0  ;;  %s495_s0 = inlined_call_operand.vmem [shape: f32[16,32], index: 0, kind: input, shape index: {}]   ;;  %s496_s1 = inlined_call_operand.vmem [shape: bf16[32,64], index: 1, kind: input, shape index: {}]   ;;  %s497_s2 = inlined_call_operand.vmem [shape: f32[1,64], index: 2, kind: input, shape index: {}]   ;;  %s498_s3 = inlined_call_operand.vmem [shape: bf16[64,32], index: 3, kind: input, shape index: {}]   ;;  %s499_s4 = inlined_call_operand.hbm [shape: f32[1,32], index: 4, kind: input, shape index: {}]   ;;  %s500_s5 = inlined_call_operand.hbm [shape: f32[1,32], index: 5, kind: input, shape index: {}]   ;;  %s501_s6 = inlined_call_operand.hbm [shape: f32[1,32], index: 6, kind: input, shape index: {}]   ;;  %s502_s7 = inlined_call_operand.vmem [shape: f32[16,32], index: 7, kind: output, shape index: {}]  }
   0x1   :  { %13 = vsyncpa [#allocation5], 0  ;;  %s38_s26 = sshll.u32 %s500_s5, 4  ;;  %s397_s27 = smov [#allocation4]   ;;  %s39_s26 = int_to_ptr.hbm [resolvable:$true] %s38_s26 }
   0x2   :  { %s40_s28 = sshll.u32 %s397_s27, 4  ;;  %s27_s8 = sshll.u32 %s499_s4, 4  ;;  %s41_s28 = int_to_ptr.vmem [resolvable:$true] %s40_s28  ;;  %s28_s8 = int_to_ptr.hbm [resolvable:$true] %s27_s8 }
   0x3   :  { %43 = dma.hbm_to_vmem [thread:$0]  %s39_s26, 16, %s41_s28, [#allocation5]  }
   0x4   :  { %s398_s9 = smov [#allocation2]   ;;  %s49_s13 = sshll.u32 %s501_s6, 4  ;;  %s50_s13 = int_to_ptr.hbm [resolvable:$true] %s49_s13 }
   0x5   :  { %s29_s10 = sshll.u32 %s398_s9, 4  ;;  %s399_s5 = smov [#allocation6]   ;;  %s30_s10 = int_to_ptr.vmem [resolvable:$true] %s29_s10 }
   0x6   :  { %32 = dma.hbm_to_vmem [thread:$0]  %s28_s8, 16, %s30_s10, [#allocation3]  }
   0x7   :  { %s51_s14 = sshll.u32 %s399_s5, 4  ;;  %s52_s14 = int_to_ptr.vmem [resolvable:$true] %s51_s14 }
   0x8   :  { %54 = dma.hbm_to_vmem [thread:$0]  %s50_s13, 16, %s52_s14, [#allocation5]  }
   0x9   :  { %393 = dma.done.wait [#allocation3], 16  }
   0xa   :  { %394 = vsyncadd [#allocation3], 4294967280 }
   0xb   :  { %395 = dma.done.wait [#allocation5], 32  }
   0xc   :  { %396 = vsyncadd [#allocation5], 4294967264  ;;  %v298_v0 = vld [vmem:[%s496_s1 + $0x8] sm:$0xff]  ;;  %v297_v1 = vld [vmem:[%s496_s1] sm:$0xff]  ;;  %vm91_vm0 = vcmask 261120   ;;  %vm148_vm1 = vcmask 523264  }
   0xd   :  { %v68_v2 = vld [vmem:[%s495_s0] sm:$0xff]  ;;  %v69_v3 = vld [vmem:[%s495_s0 + $0x8] sm:$0xff]  ;;  %101 = vmatpush.bf16.msra.mxu0 %v298_v0  ;;  %v302_v5 = vld [vmem:[%s498_s3 + $0x18] sm:$0xff]  ;;  %v400_v26 = vmov 32.0  }
   0xe   :  { %v70_v4 = vpack.c.bf16 %v69_v3, %v68_v2  ;;  %156 = vmatpush.bf16.msra.mxu1 %v302_v5  ;;  %v301_v6 = vld [vmem:[%s498_s3 + $0x10] sm:$0xff]  ;;  %v300_v7 = vld [vmem:[%s498_s3 + $0x8] sm:$0xff]  ;;  %v299_v8 = vld [vmem:[%s498_s3] sm:$0xff]  ;;  %311 = vrcp.f32 %v400_v26 }
   0xf   :  { %v307_v10 = vld [vmem:[%s497_s2] ss:$0 sm:$0xff] }
  0x10   :  { %v308_v17 = vld [vmem:[#allocation2] ss:$0 sm:$0xff] }
  0x11   :  { %102 = vmatpush.bf16.msra.mxu0 %v297_v1 }
  0x12   :  { %157 = vmatpush.bf16.msra.mxu1 %v301_v6 }
  0x14   :  { %279 = vmatmul.msk.bf16.vlgmr.msra.gmra.mxu0 %vm91_vm0, %v70_v4  ;;  %v312_v27 = vpop.eup %311 }
  0x15   :  { %v177_v28 = vmul.f32 32.0, %v312_v27  ;;  %vm181_vm2 = vweird.f32 %v312_v27 }
  0x16   :  { %158 = vmatpush.bf16.msra.mxu1 %v300_v7 }
  0x17   :  { %v178_v29 = vsub.f32 1.0, %v177_v28 }
  0x19   :  { %v179_v30 = vmul.f32 %v312_v27, %v178_v29 }
  0x1a   :  { %159 = vmatpush.bf16.msra.mxu1 %v299_v8 }
  0x1b   :  { %v180_v31 = vadd.f32 %v312_v27, %v179_v30 }
  0x1d   :  { %v182_v32 = vsel %vm181_vm2, %v312_v27, %v180_v31 }
  0x91   :  { %v104_v9 = vpop.f32.mrf.mxu0 }
  0x92   :  { %v105_v11 = vadd.f32 %v307_v10, %v104_v9 }
  0x94   :  { %v109_v14 = vmax.f32 %v105_v11, 0.0 }
  0x99   :  { %v106_v12 = vpop.f32.mrf.mxu0 }
  0x9a   :  { %v107_v13 = vadd.f32 %v307_v10, %v106_v12 }
  0x9c   :  { %v110_v15 = vmax.f32 %v107_v13, 0.0 }
  0x9e   :  { %v111_v16 = vpack.c.bf16 %v110_v15, %v109_v14  ;;  %v309_v14 = vld [vmem:[#allocation4] ss:$0 sm:$0xff] }
  0xa0   :  { %296 = vmatmul.msk.bf16.vlgmr.msra.gmra.mxu1 %vm148_vm1, %v111_v16 }
 0x11d   :  { %v161_v18 = vpop.f32.mrf.mxu1 }
 0x11e   :  { %v162_v19 = vadd.f32 %v308_v17, %v161_v18  ;;  %v310_v18 = vld [vmem:[#allocation6] ss:$0 sm:$0xff] }
 0x120   :  { %v166_v20 = vadd.f32 %v162_v19, %v68_v2 }
 0x122   :  { %v170_v21 = vsel %vm91_vm0, %v166_v20, 0.0 }
 0x123   :  { %171 = vadd.xlane.f32.xlu0 %v170_v21 }
 0x125   :  { %v163_v22 = vpop.f32.mrf.mxu1 }
 0x126   :  { %v164_v23 = vadd.f32 %v308_v17, %v163_v22 }
 0x128   :  { %v167_v24 = vadd.f32 %v164_v23, %v69_v3 }
 0x12a   :  { %v173_v25 = vsel %vm91_vm0, %v167_v24, 0.0 }
 0x12b   :  { %174 = vadd.xlane.f32.xlu0 %v173_v25 }
 0x196   :  { %v172_v33 = vpop.xlane.xlu0 %171 }
 0x197   :  { %v183_v34 = vmul.f32 %v182_v32, %v172_v33 }
 0x199   :  { %v185_v35 = vsub.f32 %v166_v20, %v183_v34 }
 0x19b   :  { %v187_v36 = vmul.f32 %v185_v35, %v185_v35 }
 0x19d   :  { %v189_v37 = vsel %vm91_vm0, %v187_v36, 0.0 }
 0x19e   :  { %190 = vadd.xlane.f32.xlu1 %v189_v37  ;;  %v175_v38 = vpop.xlane.xlu0 %174 }
 0x19f   :  { %v184_v39 = vmul.f32 %v182_v32, %v175_v38 }
 0x1a1   :  { %v481_v40 = vsub.f32 %v167_v24, %v184_v39 }
 0x1a3   :  { %v188_v41 = vmul.f32 %v481_v40, %v481_v40 }
 0x1a5   :  { %v192_v42 = vsel %vm91_vm0, %v188_v41, 0.0 }
 0x1a6   :  { %193 = vadd.xlane.f32.xlu1 %v192_v42 }
 0x211   :  { %v191_v43 = vpop.xlane.xlu1 %190 }
 0x212   :  { %v195_v44 = vmul.f32 0.032258064, %v191_v43 }
 0x214   :  { %313 = vrsqrt.f32 %v195_v44  ;;  %vm204_vm3 = vcmp.eq.f32.partialorder %v195_v44, inf  ;;  %v207_v57 = vand.u32 2147483648, %v195_v44  ;;  %vm206_vm4 = vcmp.eq.f32.partialorder %v195_v44, 0.0 }
 0x219   :  { %v194_v45 = vpop.xlane.xlu1 %193 }
 0x21a   :  { %v314_v46 = vpop.eup %313  ;;  %v196_v47 = vmul.f32 0.032258064, %v194_v45 }
 0x21b   :  { %v198_v48 = vmul.f32 %v314_v46, %v195_v44 }
 0x21c   :  { %315 = vrsqrt.f32 %v196_v47  ;;  %vm216_vm5 = vcmp.eq.f32.partialorder %v196_v47, inf  ;;  %v219_v1 = vand.u32 2147483648, %v196_v47  ;;  %vm218_vm6 = vcmp.eq.f32.partialorder %v196_v47, 0.0 }
 0x21d   :  { %v199_v49 = vmul.f32 %v314_v46, %v198_v48 }
 0x21f   :  { %v200_v50 = vmul.f32 0.5, %v199_v49 }
 0x221   :  { %v201_v51 = vsub.f32 1.5, %v200_v50 }
 0x222   :  { %v316_v52 = vpop.eup %315 }
 0x223   :  { %v202_v53 = vmul.f32 %v314_v46, %v201_v51  ;;  %v210_v54 = vmul.f32 %v316_v52, %v196_v47 }
 0x225   :  { %v203_v55 = vmul.f32 %v202_v53, %v195_v44  ;;  %v211_v56 = vmul.f32 %v316_v52, %v210_v54 }
 0x227   :  { %v205_v58 = vsel %vm204_vm3, %v195_v44, %v203_v55  ;;  %v212_v59 = vmul.f32 0.5, %v211_v56 }
 0x228   :  { %v208_v60 = vsel %vm206_vm4, %v207_v57, %v205_v58 }
 0x229   :  { %v221_v61 = vadd.f32 1e-12, %v208_v60  ;;  %v213_v62 = vsub.f32 1.5, %v212_v59 }
 0x22b   :  { %317 = vrcp.f32 %v221_v61  ;;  %v214_v63 = vmul.f32 %v316_v52, %v213_v62  ;;  %v234_v8 = vand.u32 2147483648, %v221_v61  ;;  %v232_v10 = vand.u32 2147483647, %v221_v61 }
 0x22c   :  { %vm228_vm8 = vweird.f32 %v221_v61 }
 0x22d   :  { %v215_v0 = vmul.f32 %v214_v63, %v196_v47  ;;  %v235_v12 = vor.u32 1.1754944e-38, %v234_v8  ;;  %vm233_vm10 = vcmp.eq.f32.partialorder %v232_v10, 8.507059e+37 }
 0x22f   :  { %v217_v2 = vsel %vm216_vm5, %v196_v47, %v215_v0 }
 0x230   :  { %v220_v4 = vsel %vm218_vm6, %v219_v1, %v217_v2 }
 0x231   :  { %v318_v3 = vpop.eup %317  ;;  %v222_v6 = vadd.f32 1e-12, %v220_v4 }
 0x232   :  { %v224_v5 = vmul.f32 %v318_v3, %v221_v61  ;;  %vm229_vm7 = vweird.f32 %v318_v3 }
 0x233   :  { %319 = vrcp.f32 %v222_v6  ;;  %vm230_vm9 = vmor %vm228_vm8, %vm229_vm7  ;;  %v248_v22 = vand.u32 2147483648, %v222_v6  ;;  %v246_v24 = vand.u32 2147483647, %v222_v6  ;;  %vm242_vm12 = vweird.f32 %v222_v6 }
 0x234   :  { %v225_v7 = vsub.f32 1.0, %v224_v5 }
 0x235   :  { %v249_v27 = vor.u32 1.1754944e-38, %v248_v22  ;;  %vm247_vm14 = vcmp.eq.f32.partialorder %v246_v24, 8.507059e+37 }
 0x236   :  { %v226_v9 = vmul.f32 %v318_v3, %v225_v7 }
 0x238   :  { %v227_v11 = vadd.f32 %v318_v3, %v226_v9 }
 0x239   :  { %v320_v13 = vpop.eup %319 }
 0x23a   :  { %v231_v15 = vsel %vm230_vm9, %v318_v3, %v227_v11  ;;  %v238_v17 = vmul.f32 %v320_v13, %v222_v6  ;;  %vm243_vm11 = vweird.f32 %v320_v13 }
 0x23b   :  { %v236_v16 = vsel %vm233_vm10, %v235_v12, %v231_v15  ;;  %vm244_vm13 = vmor %vm242_vm12, %vm243_vm11 }
 0x23c   :  { %v251_v19 = vmul.f32 %v236_v16, %v185_v35  ;;  %v239_v20 = vsub.f32 1.0, %v238_v17 }
 0x23e   :  { %v256_v21 = vmul.f32 %v309_v14, %v251_v19  ;;  %v240_v23 = vmul.f32 %v320_v13, %v239_v20 }
 0x240   :  { %v261_v25 = vadd.f32 %v310_v18, %v256_v21  ;;  %v241_v26 = vadd.f32 %v320_v13, %v240_v23 }
 0x242   :  { %263 = vst.msk [vmem:[%s502_s7] sm:$0xff] %vm91_vm0, %v261_v25  ;;  %v245_v28 = vsel %vm244_vm13, %v320_v13, %v241_v26 }
 0x243   :  { %v250_v29 = vsel %vm247_vm14, %v249_v27, %v245_v28 }
 0x244   :  { %v252_v30 = vmul.f32 %v250_v29, %v481_v40 }
 0x246   :  { %v257_v31 = vmul.f32 %v309_v14, %v252_v30 }
 0x248   :  { %v262_v32 = vadd.f32 %v310_v18, %v257_v31 }
 0x24a   :  { %264 = vst.msk [vmem:[%s502_s7 + $0x8] sm:$0xff] %vm91_vm0, %v262_v32 }
 0x24b   :  { %269 = vsyncpa [#allocation3], 1 }
 0x24c   :  { %270 = vsyncpa [#allocation5], 1 }

// kernel: decoder_forward.14
= control target key start
LH: loop header
LB: loop body
LE: loop exit
PB: predicated region body
PF: predicated region fallthrough
CT: control target
= control target key end

     0   :  { %vm50_vm0 = vcmask 261120   ;;  %vm107_vm1 = vcmask 523264   ;;  %v275_v26 = vmov 32.0   ;;  %s370_s1 = inlined_call_operand.vmem [shape: bf16[32,64], index: 1, kind: input, shape index: {}]   ;;  %s371_s0 = inlined_call_operand.vmem [shape: f32[16,32], index: 0, kind: input, shape index: {}]   ;;  %s372_s2 = inlined_call_operand.vmem [shape: f32[1,64], index: 2, kind: input, shape index: {}]   ;;  %s373_s4 = inlined_call_operand.vmem [shape: f32[1,32], index: 4, kind: input, shape index: {}]   ;;  %s374_s3 = inlined_call_operand.vmem [shape: bf16[64,32], index: 3, kind: input, shape index: {}]   ;;  %s375_s5 = inlined_call_operand.vmem [shape: f32[1,32], index: 5, kind: input, shape index: {}]   ;;  %s376_s6 = inlined_call_operand.vmem [shape: f32[1,32], index: 6, kind: input, shape index: {}]   ;;  %s377_s7 = inlined_call_operand.vmem [shape: f32[16,32], index: 7, kind: output, shape index: {}]  }
   0x1   :  { %v255_v0 = vld [vmem:[%s370_s1 + $0x8] sm:$0xff]  ;;  %v254_v1 = vld [vmem:[%s370_s1] sm:$0xff]  ;;  %v259_v5 = vld [vmem:[%s374_s3 + $0x18] sm:$0xff]  ;;  %265 = vrcp.f32 %v275_v26 }
   0x2   :  { %60 = vmatpush.bf16.msra.mxu0 %v255_v0  ;;  %v27_v2 = vld [vmem:[%s371_s0] sm:$0xff]  ;;  %v28_v3 = vld [vmem:[%s371_s0 + $0x8] sm:$0xff]  ;;  %115 = vmatpush.bf16.msra.mxu1 %v259_v5  ;;  %v258_v6 = vld [vmem:[%s374_s3 + $0x10] sm:$0xff] }
   0x3   :  { %v29_v4 = vpack.c.bf16 %v28_v3, %v27_v2  ;;  %v257_v7 = vld [vmem:[%s374_s3 + $0x8] sm:$0xff]  ;;  %v256_v8 = vld [vmem:[%s374_s3] sm:$0xff] }
   0x4   :  { %v261_v10 = vld [vmem:[%s372_s2] ss:$0 sm:$0xff] }
   0x5   :  { %v262_v17 = vld [vmem:[%s373_s4] ss:$0 sm:$0xff] }
   0x6   :  { %61 = vmatpush.bf16.msra.mxu0 %v254_v1  ;;  %116 = vmatpush.bf16.msra.mxu1 %v258_v6 }
   0x7   :  { %v266_v27 = vpop.eup %265 }
   0x8   :  { %v136_v28 = vmul.f32 32.0, %v266_v27  ;;  %vm140_vm2 = vweird.f32 %v266_v27 }
   0x9   :  { %236 = vmatmul.msk.bf16.vlgmr.msra.gmra.mxu0 %vm50_vm0, %v29_v4 }
   0xa   :  { %117 = vmatpush.bf16.msra.mxu1 %v257_v7  ;;  %v137_v29 = vsub.f32 1.0, %v136_v28 }
   0xc   :  { %v138_v30 = vmul.f32 %v266_v27, %v137_v29 }
   0xe   :  { %118 = vmatpush.bf16.msra.mxu1 %v256_v8  ;;  %v139_v31 = vadd.f32 %v266_v27, %v138_v30 }
  0x10   :  { %v141_v32 = vsel %vm140_vm2, %v266_v27, %v139_v31 }
  0x86   :  { %v63_v9 = vpop.f32.mrf.mxu0 }
  0x87   :  { %v64_v11 = vadd.f32 %v261_v10, %v63_v9 }
  0x89   :  { %v68_v14 = vmax.f32 %v64_v11, 0.0 }
  0x8e   :  { %v65_v12 = vpop.f32.mrf.mxu0 }
  0x8f   :  { %v66_v13 = vadd.f32 %v261_v10, %v65_v12 }
  0x91   :  { %v69_v15 = vmax.f32 %v66_v13, 0.0 }
  0x93   :  { %v70_v16 = vpack.c.bf16 %v69_v15, %v68_v14  ;;  %v263_v14 = vld [vmem:[%s375_s5] ss:$0 sm:$0xff] }
  0x95   :  { %253 = vmatmul.msk.bf16.vlgmr.msra.gmra.mxu1 %vm107_vm1, %v70_v16 }
 0x112   :  { %v120_v18 = vpop.f32.mrf.mxu1 }
 0x113   :  { %v121_v19 = vadd.f32 %v262_v17, %v120_v18  ;;  %v264_v18 = vld [vmem:[%s376_s6] ss:$0 sm:$0xff] }
 0x115   :  { %v125_v20 = vadd.f32 %v121_v19, %v27_v2 }
 0x117   :  { %v129_v21 = vsel %vm50_vm0, %v125_v20, 0.0 }
 0x118   :  { %130 = vadd.xlane.f32.xlu0 %v129_v21 }
 0x11a   :  { %v122_v22 = vpop.f32.mrf.mxu1 }
 0x11b   :  { %v123_v23 = vadd.f32 %v262_v17, %v122_v22 }
 0x11d   :  { %v126_v24 = vadd.f32 %v123_v23, %v28_v3 }
 0x11f   :  { %v132_v25 = vsel %vm50_vm0, %v126_v24, 0.0 }
 0x120   :  { %133 = vadd.xlane.f32.xlu0 %v132_v25 }
 0x18b   :  { %v131_v33 = vpop.xlane.xlu0 %130 }
 0x18c   :  { %v142_v34 = vmul.f32 %v141_v32, %v131_v33 }
 0x18e   :  { %v144_v35 = vsub.f32 %v125_v20, %v142_v34 }
 0x190   :  { %v146_v36 = vmul.f32 %v144_v35, %v144_v35 }
 0x192   :  { %v148_v37 = vsel %vm50_vm0, %v146_v36, 0.0 }
 0x193   :  { %149 = vadd.xlane.f32.xlu1 %v148_v37  ;;  %v134_v38 = vpop.xlane.xlu0 %133 }
 0x194   :  { %v143_v39 = vmul.f32 %v141_v32, %v134_v38 }
 0x196   :  { %v350_v40 = vsub.f32 %v126_v24, %v143_v39 }
 0x198   :  { %v147_v41 = vmul.f32 %v350_v40, %v350_v40 }
 0x19a   :  { %v151_v42 = vsel %vm50_vm0, %v147_v41, 0.0 }
 0x19b   :  { %152 = vadd.xlane.f32.xlu1 %v151_v42 }
 0x206   :  { %v150_v43 = vpop.xlane.xlu1 %149 }
 0x207   :  { %v154_v44 = vmul.f32 0.032258064, %v150_v43 }
 0x209   :  { %267 = vrsqrt.f32 %v154_v44  ;;  %vm163_vm3 = vcmp.eq.f32.partialorder %v154_v44, inf  ;;  %v166_v57 = vand.u32 2147483648, %v154_v44  ;;  %vm165_vm4 = vcmp.eq.f32.partialorder %v154_v44, 0.0 }
 0x20e   :  { %v153_v45 = vpop.xlane.xlu1 %152 }
 0x20f   :  { %v268_v46 = vpop.eup %267  ;;  %v155_v47 = vmul.f32 0.032258064, %v153_v45 }
 0x210   :  { %v157_v48 = vmul.f32 %v268_v46, %v154_v44 }
 0x211   :  { %269 = vrsqrt.f32 %v155_v47  ;;  %vm175_vm5 = vcmp.eq.f32.partialorder %v155_v47, inf  ;;  %v178_v1 = vand.u32 2147483648, %v155_v47  ;;  %vm177_vm6 = vcmp.eq.f32.partialorder %v155_v47, 0.0 }
 0x212   :  { %v158_v49 = vmul.f32 %v268_v46, %v157_v48 }
 0x214   :  { %v159_v50 = vmul.f32 0.5, %v158_v49 }
 0x216   :  { %v160_v51 = vsub.f32 1.5, %v159_v50 }
 0x217   :  { %v270_v52 = vpop.eup %269 }
 0x218   :  { %v161_v53 = vmul.f32 %v268_v46, %v160_v51  ;;  %v169_v54 = vmul.f32 %v270_v52, %v155_v47 }
 0x21a   :  { %v162_v55 = vmul.f32 %v161_v53, %v154_v44  ;;  %v170_v56 = vmul.f32 %v270_v52, %v169_v54 }
 0x21c   :  { %v164_v58 = vsel %vm163_vm3, %v154_v44, %v162_v55  ;;  %v171_v59 = vmul.f32 0.5, %v170_v56 }
 0x21d   :  { %v167_v60 = vsel %vm165_vm4, %v166_v57, %v164_v58 }
 0x21e   :  { %v180_v61 = vadd.f32 1e-12, %v167_v60  ;;  %v172_v62 = vsub.f32 1.5, %v171_v59 }
 0x220   :  { %271 = vrcp.f32 %v180_v61  ;;  %v173_v63 = vmul.f32 %v270_v52, %v172_v62  ;;  %v193_v8 = vand.u32 2147483648, %v180_v61  ;;  %v191_v10 = vand.u32 2147483647, %v180_v61 }
 0x221   :  { %vm187_vm8 = vweird.f32 %v180_v61 }
 0x222   :  { %v174_v0 = vmul.f32 %v173_v63, %v155_v47  ;;  %v194_v12 = vor.u32 1.1754944e-38, %v193_v8  ;;  %vm192_vm10 = vcmp.eq.f32.partialorder %v191_v10, 8.507059e+37 }
 0x224   :  { %v176_v2 = vsel %vm175_vm5, %v155_v47, %v174_v0 }
 0x225   :  { %v179_v4 = vsel %vm177_vm6, %v178_v1, %v176_v2 }
 0x226   :  { %v272_v3 = vpop.eup %271  ;;  %v181_v6 = vadd.f32 1e-12, %v179_v4 }
 0x227   :  { %v183_v5 = vmul.f32 %v272_v3, %v180_v61  ;;  %vm188_vm7 = vweird.f32 %v272_v3 }
 0x228   :  { %273 = vrcp.f32 %v181_v6  ;;  %vm189_vm9 = vmor %vm187_vm8, %vm188_vm7  ;;  %v207_v22 = vand.u32 2147483648, %v181_v6  ;;  %v205_v24 = vand.u32 2147483647, %v181_v6  ;;  %vm201_vm12 = vweird.f32 %v181_v6 }
 0x229   :  { %v184_v7 = vsub.f32 1.0, %v183_v5 }
 0x22a   :  { %v208_v27 = vor.u32 1.1754944e-38, %v207_v22  ;;  %vm206_vm14 = vcmp.eq.f32.partialorder %v205_v24, 8.507059e+37 }
 0x22b   :  { %v185_v9 = vmul.f32 %v272_v3, %v184_v7 }
 0x22d   :  { %v186_v11 = vadd.f32 %v272_v3, %v185_v9 }
 0x22e   :  { %v274_v13 = vpop.eup %273 }
 0x22f   :  { %v190_v15 = vsel %vm189_vm9, %v272_v3, %v186_v11  ;;  %v197_v17 = vmul.f32 %v274_v13, %v181_v6  ;;  %vm202_vm11 = vweird.f32 %v274_v13 }
 0x230   :  { %v195_v16 = vsel %vm192_vm10, %v194_v12, %v190_v15  ;;  %vm203_vm13 = vmor %vm201_vm12, %vm202_vm11 }
 0x231   :  { %v210_v19 = vmul.f32 %v195_v16, %v144_v35  ;;  %v198_v20 = vsub.f32 1.0, %v197_v17 }
 0x233   :  { %v215_v21 = vmul.f32 %v263_v14, %v210_v19  ;;  %v199_v23 = vmul.f32 %v274_v13, %v198_v20 }
 0x235   :  { %v220_v25 = vadd.f32 %v264_v18, %v215_v21  ;;  %v200_v26 = vadd.f32 %v274_v13, %v199_v23 }
 0x237   :  { %222 = vst.msk [vmem:[%s377_s7] sm:$0xff] %vm50_vm0, %v220_v25  ;;  %v204_v28 = vsel %vm203_vm13, %v274_v13, %v200_v26 }
 0x238   :  { %v209_v29 = vsel %vm206_vm14, %v208_v27, %v204_v28 }
 0x239   :  { %v211_v30 = vmul.f32 %v209_v29, %v350_v40 }
 0x23b   :  { %v216_v31 = vmul.f32 %v263_v14, %v211_v30 }
 0x23d   :  { %v221_v32 = vadd.f32 %v264_v18, %v216_v31 }
 0x23f   :  { %223 = vst.msk [vmem:[%s377_s7 + $0x8] sm:$0xff] %vm50_vm0, %v221_v32 }

// kernel: decoder_forward.12
= control target key start
LH: loop header
LB: loop body
LE: loop exit
PB: predicated region body
PF: predicated region fallthrough
CT: control target
= control target key end

     0   :  { %13 = vsyncpa [#allocation3], 0  ;;  %s1804_s0 = inlined_call_operand.vmem [shape: f32[2,8,32], index: 0, kind: input, shape index: {}]   ;;  %s1805_s1 = inlined_call_operand.vmem [shape: f32[2,8,1], index: 1, kind: input, shape index: {}]   ;;  %s1806_s2 = inlined_call_operand.vmem [shape: bf16[32,96], index: 2, kind: input, shape index: {}]   ;;  %s1807_s3 = inlined_call_operand.vmem [shape: f32[1,96], index: 3, kind: input, shape index: {}]   ;;  %s1808_s4 = inlined_call_operand.hbm [shape: bf16[32,32], index: 4, kind: input, shape index: {}]   ;;  %s1809_s5 = inlined_call_operand.vmem [shape: f32[1,32], index: 5, kind: input, shape index: {}]   ;;  %s1810_s6 = inlined_call_operand.vmem [shape: f32[1,32], index: 6, kind: input, shape index: {}]   ;;  %s1811_s7 = inlined_call_operand.hbm [shape: f32[1,32], index: 7, kind: input, shape index: {}]   ;;  %s1812_s8 = inlined_call_operand.vmem [shape: f32[2,8,32], index: 8, kind: output, shape index: {}]  }
   0x1   :  { %14 = vsyncpa [#allocation5], 0  ;;  %s1541_s27 = smov 0  }
   0x2 LB: > { %s246_s30 = sshll.u32 %s1808_s4, 4  ;;  %s1289_s9 = sadd.s32 4294967295, %s1478_s27   ;;  %s1478_s27 = sphi %s1541_s27, %s20_s27   ;;  %s247_s30 = int_to_ptr.hbm [resolvable:$true] %s246_s30 }
   0x3   : > { %p1291_p0 = scmp.ge.s32.totalorder %s1478_s27, 1  ;;  %p229_p1 = scmp.lt.s32.totalorder %s1478_s27, 3 }
   0x4   : > { %p1348_p2 = scmp.eq.s32.totalorder %s1289_s9, 0  ;;  %s1480_s11 = smov [#allocation2]  }
   0x5   : > { %p1552_p3 = pnand %p1291_p0, %p229_p1  ;;  %s248_s12 = sshll.u32 %s1480_s11, 4  ;;  %s249_s12 = int_to_ptr.vmem [resolvable:$true] %s248_s12 }
   0x6   : > { %s267_s15 = sshll.u32 %s1811_s7, 4  ;;  %s1481_s16 = smov [#allocation4]   ;;  %s268_s15 = int_to_ptr.hbm [resolvable:$true] %s267_s15 }
   0x7   : > { %p1341_p4 = pneg %p1552_p3  ;;  %s269_s17 = sshll.u32 %s1481_s16, 4  ;;  %s270_s17 = int_to_ptr.vmem [resolvable:$true] %s269_s17 }
   0x8   : > { %s1482_s18 = smov 64   ;;  %s1483_s19 = smov 4  }
   0x9   : > { %p1342_p5 = pnand %p1348_p2, %p1341_p4  ;;  %296 = sbr.rel (%p1552_p3) target bundleno = 1513 (0x5e9), region = 52 }
   0xb   : > { %1344 = dma.hbm_to_vmem [thread:$0]  (!%p1342_p5), %s247_s30, 256, %s249_s12, [#allocation3], %s1482_s18, %s1482_s18, %s1483_s19  }
   0xc   : > { %1347 = dma.hbm_to_vmem [thread:$0]  (!%p1342_p5), %s268_s15, 16, %s270_s17, [#allocation5]  }
   0xe   : > { %1469 = dma.done.wait (%p1348_p2), [#allocation3], 256  }
   0xf   : > { %1471 = vsyncadd (%p1348_p2), [#allocation3], 4294967040 }
  0x10   : > { %1473 = dma.done.wait (%p1348_p2), [#allocation5], 16  }
  0x11   : > { %1475 = vsyncadd (%p1348_p2), [#allocation5], 4294967280  ;;  %p338_p6 = scmp.lt.s32.totalorder %s1289_s9, 1  ;;  %v1330_v0 = vld [vmem:[%s1806_s2 + $0x8] sm:$0xff]  ;;  %v1329_v1 = vld [vmem:[%s1806_s2] sm:$0xff]  ;;  %vm373_vm0 = vcmask 261120  }
  0x12   : > { %383 = vmatpush.bf16.msra.mxu0 %v1330_v0  ;;  %v1378_v4 = vld [vmem:[%s1807_s3] ss:$0 sm:$0xff]  ;;  %s1485_s10 = smov 120   ;;  %s1486_s11 = smov 96   ;;  %v1488_v16 = vmov 1983009808  }
  0x13   : > { %s1815_s9 = smov (!%p338_p6, %s1289_s9), 1  ;;  %s1487_s12 = smov 112   ;;  %v418_v17 = vunpack.c.l.s4 %v1488_v16  ;;  %v1489_v26 = vmov 1934713408   ;;  %vm427_vm1 = vcmask 1047556   ;;  %vm771_vm3 = vcmask 64512  }
  0x14   : > { %s1568_s20 = sshll.u32 %s1815_s9, 3  ;;  %s1484_s9 = smov 104   ;;  %v432_v27 = vunpack.c.l.s4 %v1489_v26  ;;  %vm909_vm5 = vcmask 1043456   ;;  %vm1107_vm6 = vcmask 130048   ;;  %vm1109_vm7 = vcmask 195584  }
  0x15   : > { %s341_s23 = scalar_lea.vmem %s1804_s0, %s1568_s20  ;;  %v1603_v23 = vunpack.c.0.s8 %v418_v17  ;;  %s345_s15 = scalar_lea.vmem %s1805_s1, %s1568_s20 }
  0x16   : > { %v1580_v2 = vld [vmem:[%s341_s23] sm:$0xff]  ;;  %384 = vmatpush.bf16.msra.mxu0 %v1329_v1  ;;  %v1608_v37 = vunpack.c.0.s8 %v432_v27  ;;  %v1490_v1 = vmov 0   ;;  %s1491_s16 = smov 64   ;;  %s1492_s17 = smov 16  }
  0x17   : > { %v352_v3 = vpack.c.bf16 %v1580_v2, %v1580_v2  ;;  %1376 = vset.pattern.permute.xlu1 %v1490_v1  ;;  %1377 = vset.pattern.permute.xlu0 %v1490_v1  ;;  %s1493_s18 = smov 24   ;;  %s1494_s19 = smov 8  }
  0x18   : > { %s349_s28 = scalar_lea.vmem %s1812_s8, %s1568_s20 }
  0x19   : > { %1309 = vmatmul.msk.bf16.vlgmr.msra.gmra.mxu0 %vm373_vm0, %v352_v3 }
  0x96   : > { %v386_v5 = vpop.f32.mrf.mxu0 }
  0x97   : > { %v387_v6 = vadd.f32 %v1378_v4, %v386_v5 }
  0x99   : > { %v1588_v7 = vpack.c.bf16 %v387_v6, %v387_v6  ;;  %v390_v9 = vmul.f32 0.35355338, %v387_v6 }
  0x9b   : > { %525 = vrot.lane.b32.xlu1 %v1588_v7, %s1484_s9  ;;  %521 = vrot.lane.b32.xlu0 %v1588_v7, %s1485_s10  ;;  %v396_v10 = vpack.c.bf16 %v390_v9, %v390_v9 }
  0x9d   : > { %v407_v30 = vshrl.u32 %v396_v10, 16 }
  0x9e   : > { %v388_v8 = vpop.f32.mrf.mxu0 }
  0xa3   : > { %527 = vrot.lane.b32.xlu1 %v1588_v7, %s1486_s11  ;;  %523 = vrot.lane.b32.xlu0 %v1588_v7, %s1487_s12 }
  0xab   : > { %398 = vrot.lane.b32.xlu1 %v396_v10, %s1485_s10 }
 0x10d   : > { %v1594_v11 = vpop.permute.xlu1 %525  ;;  %v1596_v12 = vpop.permute.xlu0 %521 }
 0x10e   : > { %533 = vrot.lane.b32.xlu0 %v1594_v11, %s1486_s11  ;;  %529 = vrot.lane.b32.xlu2 %v1596_v12, %s1486_s11 }
 0x115   : > { %v1600_v13 = vpop.permute.xlu0 %523  ;;  %v528_v14 = vpop.permute.xlu1 %527 }
 0x116   : > { %531 = vrot.lane.b32.xlu2 %v1600_v13, %s1486_s11  ;;  %402 = vrot.lane.b32.xlu0 %v396_v10, %s1484_s9  ;;  %v538_v19 = vshrl.u32 %v528_v14, 16 }
 0x11d   : > { %v399_v20 = vpop.permute.xlu1 %398 }
 0x11e   : > { %400 = vrot.lane.b32.xlu2 %v396_v10, %s1487_s12  ;;  %v406_v25 = vpack.i.b16 %v399_v20, %v396_v10  ;;  %v408_v28 = vshrl.u32 %v399_v20, 16 }
 0x120   : > { %v420_v36 = vperm.slane %v406_v25, %v1603_v23  ;;  %v409_v38 = vpack.i.b16 %v408_v28, %v407_v30 }
 0x122   : > { %v429_v47 = vrot.slane %v420_v36, 4  ;;  %v447_v49 = vperm.slane %v409_v38, %v1603_v23 }
 0x124   : > { %v455_v3 = vrot.slane %v447_v49, 4 }
 0x168   : > { %v530_v15 = vpop.permute.xlu2 %529 }
 0x169   : > { %v539_v18 = vshrl.u32 %v530_v15, 16  ;;  %v537_v21 = vpack.i.b16 %v530_v15, %v528_v14 }
 0x16b   : > { %v540_v24 = vpack.i.b16 %v539_v18, %v538_v19  ;;  %v551_v29 = vperm.slane %v537_v21, %v1603_v23 }
 0x16d   : > { %v577_v32 = vperm.slane %v540_v24, %v1603_v23  ;;  %v559_v39 = vrot.slane %v551_v29, 4 }
 0x16f   : > { %v585_v42 = vrot.slane %v577_v32, 4 }
 0x170   : > { %v532_v22 = vpop.permute.xlu2 %531 }
 0x171   : > { %v544_v33 = vshrl.u32 %v532_v22, 16 }
 0x178   : > { %v401_v43 = vpop.permute.xlu2 %400 }
 0x179   : > { %v413_v53 = vshrl.u32 %v401_v43, 16 }
 0x180   : > { %v534_v31 = vpop.permute.xlu0 %533 }
 0x181   : > { %v543_v34 = vpack.i.b16 %v534_v31, %v532_v22  ;;  %v545_v35 = vshrl.u32 %v534_v31, 16 }
 0x183   : > { %v546_v40 = vpack.i.b16 %v545_v35, %v544_v33  ;;  %v556_v41 = vperm.slane %v543_v34, %v1603_v23 }
 0x185   : > { %v557_v44 = vrot.slane %v556_v41, 4  ;;  %v560_v45 = vsel %vm427_vm1, %v556_v41, %v559_v39  ;;  %v582_v46 = vperm.slane %v546_v40, %v1603_v23 }
 0x186   : > { %v568_v48 = vperm.slane %v560_v45, %v1608_v37 }
 0x187   : > { %v558_v50 = vsel %vm427_vm1, %v557_v44, %v551_v29  ;;  %v583_v51 = vrot.slane %v582_v46, 4  ;;  %v586_v52 = vsel %vm427_vm1, %v582_v46, %v585_v42 }
 0x188   : > { %v564_v54 = vperm.slane %v558_v50, %v1608_v37  ;;  %v571_v55 = vrot.slane %v568_v48, 4  ;;  %v594_v56 = vperm.slane %v586_v52, %v1608_v37  ;;  %v403_v57 = vpop.permute.xlu0 %402 }
 0x189   : > { %v584_v58 = vsel %vm427_vm1, %v583_v51, %v577_v32  ;;  %v412_v59 = vpack.i.b16 %v403_v57, %v401_v43  ;;  %v414_v60 = vshrl.u32 %v403_v57, 16  ;;  %v391_v32 = vld [vmem:[%s345_s15] sm:$0xff] }
 0x18a   : > { %v569_v61 = vrot.slane %v564_v54, 4  ;;  %v572_v62 = vsel %vm427_vm1, 0, %v571_v55  ;;  %v590_v63 = vperm.slane %v584_v58, %v1608_v37  ;;  %v597_v0 = vrot.slane %v594_v56, 4 }
 0x18b   : > { %v604_v4 = vrot.slane %v572_v62, 4  ;;  %v415_v5 = vpack.i.b16 %v414_v60, %v413_v53  ;;  %v425_v6 = vperm.slane %v412_v59, %v1603_v23  ;;  %v599_v14 = vsel %vm427_vm1, %v571_v55, %v564_v54 }
 0x18c   : > { %v570_v8 = vsel %vm427_vm1, 0, %v569_v61  ;;  %v595_v9 = vrot.slane %v590_v63, 4  ;;  %v598_v10 = vsel %vm427_vm1, 0, %v597_v0  ;;  %v618_v22 = vsel %vm427_vm1, %v597_v0, %v590_v63 }
 0x18d   : > { %v623_v15 = vrot.slane %v598_v10, 4  ;;  %v426_v16 = vrot.slane %v425_v6, 4  ;;  %v430_v17 = vsel %vm427_vm1, %v425_v6, %v429_v47  ;;  %v452_v18 = vperm.slane %v415_v5, %v1603_v23 }
 0x18e   : > { %v438_v19 = vperm.slane %v430_v17, %v1608_v37  ;;  %v596_v20 = vsel %vm427_vm1, 0, %v595_v9  ;;  %v605_v21 = vsel %vm427_vm1, %v604_v4, %v570_v8  ;;  %v603_v31 = vperm.slane %v599_v14, %v1603_v23 }
 0x18f   : > { %v428_v24 = vsel %vm427_vm1, %v426_v16, %v420_v36  ;;  %v453_v25 = vrot.slane %v452_v18, 4  ;;  %v456_v26 = vsel %vm427_vm1, %v452_v18, %v455_v3  ;;  %v609_v27 = vperm.slane %v605_v21, %v1603_v23 }
 0x190   : > { %v434_v28 = vperm.slane %v428_v24, %v1608_v37  ;;  %v441_v29 = vrot.slane %v438_v19, 4  ;;  %v464_v30 = vperm.slane %v456_v26, %v1608_v37  ;;  %v622_v35 = vperm.slane %v618_v22, %v1603_v23 }
 0x191   : > { %v454_v33 = vsel %vm427_vm1, %v453_v25, %v447_v49  ;;  %v610_v34 = vrot.slane %v609_v27, 4  ;;  %v624_v36 = vsel %vm427_vm1, %v623_v15, %v596_v20  ;;  %vm848_vm2 = vcmp.eq.f32.partialorder %v391_v32, 0.0 }
 0x192   : > { %v439_v38 = vrot.slane %v434_v28, 4  ;;  %v442_v39 = vsel %vm427_vm1, 0, %v441_v29  ;;  %v460_v40 = vperm.slane %v454_v33, %v1608_v37  ;;  %v467_v41 = vrot.slane %v464_v30, 4 }
 0x193   : > { %v474_v42 = vrot.slane %v442_v39, 4  ;;  %v611_v43 = vsel %vm427_vm1, %v610_v34, %v603_v31  ;;  %v628_v44 = vperm.slane %v624_v36, %v1603_v23  ;;  %v469_v49 = vsel %vm427_vm1, %v441_v29, %v434_v28 }
 0x194   : > { %v440_v45 = vsel %vm427_vm1, 0, %v439_v38  ;;  %v465_v46 = vrot.slane %v460_v40, 4  ;;  %v468_v47 = vsel %vm427_vm1, 0, %v467_v41  ;;  %v615_v48 = vperm.slane %v611_v43, %v1608_v37 }
 0x195   : > { %v493_v50 = vrot.slane %v468_v47, 4  ;;  %v629_v51 = vrot.slane %v628_v44, 4  ;;  %v475_v52 = vsel %vm427_vm1, %v474_v42, %v440_v45  ;;  %v849_v58 = vsel %vm848_vm2, 1, %v1490_v1 }
 0x196   : > { %v466_v53 = vsel %vm427_vm1, 0, %v465_v46  ;;  %v616_v54 = vrot.slane %v615_v48, 4  ;;  %v479_v55 = vperm.slane %v475_v52, %v1603_v23  ;;  %v473_v60 = vperm.slane %v469_v49, %v1603_v23  ;;  %851 = vperm.xlu1 %1376, %v849_v58  }
 0x197   : > { %v630_v56 = vsel %vm427_vm1, %v629_v51, %v622_v35  ;;  %v494_v57 = vsel %vm427_vm1, %v493_v50, %v466_v53  ;;  %v488_v62 = vsel %vm427_vm1, %v467_v41, %v460_v40  ;;  %v640_v63 = vshrl.u32 %v615_v48, 16 }
 0x198   : > { %v634_v59 = vperm.slane %v630_v56, %v1608_v37  ;;  %v480_v61 = vrot.slane %v479_v55, 4  ;;  %v617_v0 = vsel %vm427_vm1, 0, %v616_v54  ;;  %v498_v3 = vperm.slane %v494_v57, %v1603_v23 }
 0x199   : > { %v492_v9 = vperm.slane %v488_v62, %v1603_v23  ;;  %v646_v18 = vshrl.u32 %v617_v0, 16 }
 0x19a   : > { %v639_v4 = vpack.i.b16 %v634_v59, %v615_v48  ;;  %v641_v5 = vshrl.u32 %v634_v59, 16  ;;  %v635_v6 = vrot.slane %v634_v59, 4  ;;  %v481_v8 = vsel %vm427_vm1, %v480_v61, %v473_v60 }
 0x19b   : > { %v485_v1 = vperm.slane %v481_v8, %v1608_v37  ;;  %v499_v10 = vrot.slane %v498_v3, 4 }
 0x19c   : > { %v776_v14 = vsel %vm771_vm3, %v639_v4, 0  ;;  %v642_v15 = vpack.i.b16 %v641_v5, %v640_v63  ;;  %v636_v16 = vsel %vm427_vm1, 0, %v635_v6 }
 0x19d   : > { %785 = vmatpush.bf16.xpose.msra.mxu1 %v776_v14  ;;  %v645_v17 = vpack.i.b16 %v636_v16, %v617_v0  ;;  %v647_v19 = vshrl.u32 %v636_v16, 16  ;;  %v500_v20 = vsel %vm427_vm1, %v499_v10, %v492_v9  ;;  %v486_v24 = vrot.slane %v485_v1, 4 }
 0x19e   : > { %v795_v21 = vsel %vm771_vm3, %v642_v15, 0  ;;  %v504_v22 = vperm.slane %v500_v20, %v1608_v37  ;;  %v510_v27 = vshrl.u32 %v485_v1, 16 }
 0x19f   : > { %804 = vmatpush.bf16.xpose.msra.mxu2 %v795_v21  ;;  %v814_v25 = vsel %vm771_vm3, %v645_v17, 0  ;;  %v648_v26 = vpack.i.b16 %v647_v19, %v646_v18  ;;  %v487_v30 = vsel %vm427_vm1, 0, %v486_v24 }
 0x1a0   : > { %823 = vmatpush.bf16.xpose.msra.mxu3 %v814_v25  ;;  %v509_v28 = vpack.i.b16 %v504_v22, %v485_v1  ;;  %v511_v29 = vshrl.u32 %v504_v22, 16  ;;  %v505_v31 = vrot.slane %v504_v22, 4  ;;  %v516_v36 = vshrl.u32 %v487_v30, 16 }
 0x1a1   : > { %v833_v32 = vsel %vm771_vm3, %v648_v26, 0 }
 0x1a2   : > { %842 = vmatpush.bf16.xpose.msrb.mxu0 %v833_v32  ;;  %v512_v33 = vpack.i.b16 %v511_v29, %v510_v27  ;;  %v506_v34 = vsel %vm427_vm1, 0, %v505_v31 }
 0x1a3   : > { %v515_v35 = vpack.i.b16 %v506_v34, %v487_v30  ;;  %v517_v38 = vshrl.u32 %v506_v34, 16 }
 0x1a4   : > { %1310 = vmatmul.msk.bf16.vlgmr.msra.gmra.mxu1 %vm771_vm3, %v509_v28 }
 0x1a5   : > { %v518_v39 = vpack.i.b16 %v517_v38, %v516_v36 }
 0x1a6   : > { %1311 = vmatmul.msk.bf16.vlgmr.msra.gmra.mxu2 %vm771_vm3, %v512_v33 }
 0x1a7   : > { %1312 = vmatmul.msk.bf16.vlgmr.msra.gmra.mxu3 %vm771_vm3, %v515_v35 }
 0x1a9   : > { %1313 = vmatmul.msk.bf16.vlgmr.msrb.gmra.mxu0 %vm771_vm3, %v518_v39 }
 0x208   : > { %v852_v40 = vpop.permute.xlu1 %851 }
 0x209   : > { %vm853_vm4 = vcmp.eq.s32.totalorder %v852_v40, 1 }
 0x221   : > { %v787_v41 = vpop.f32.mrf.mxu1 }
 0x222   : > { %v854_v42 = vsel %vm853_vm4, -1e+10, %v787_v41 }
 0x223   : > { %v858_v43 = vsel %vm771_vm3, %v854_v42, -inf }
 0x224   : > { %859 = vmax.xlane.f32.xlu1 %v858_v43 }
 0x226   : > { %v844_v44 = vpop.f32.mrf.mxu0 }
 0x227   : > { %v857_v45 = vsel %vm853_vm4, -1e+10, %v844_v44 }
 0x228   : > { %v867_v46 = vsel %vm771_vm3, %v857_v45, -inf }
 0x229   : > { %v789_v47 = vpop.f32.mrf.mxu1  ;;  %v806_v48 = vpop.f32.mrf.mxu2  ;;  %868 = vmax.xlane.f32.xlu2 %v867_v46 }
 0x22a   : > { %v855_v49 = vsel %vm853_vm4, -1e+10, %v806_v48  ;;  %v825_v50 = vpop.f32.mrf.mxu3 }
 0x22b   : > { %v861_v51 = vsel %vm771_vm3, %v855_v49, -inf  ;;  %v856_v52 = vsel %vm853_vm4, -1e+10, %v825_v50 }
 0x22c   : > { %862 = vmax.xlane.f32.xlu0 %v861_v51  ;;  %v864_v54 = vsel %vm771_vm3, %v856_v52, -inf }
 0x22e   : > { %v846_v53 = vpop.f32.mrf.mxu0 }
 0x231   : > { %v808_v55 = vpop.f32.mrf.mxu2  ;;  %865 = vmax.xlane.f32.xlu2 %v864_v54 }
 0x232   : > { %v827_v56 = vpop.f32.mrf.mxu3 }
 0x23d   : > { %653 = vrot.lane.b32.xlu1 %v1600_v13, %s1491_s16 }
 0x240   : > { %651 = vrot.lane.b32.xlu0 %v1596_v12, %s1491_s16 }
 0x248   : > { %655 = vrot.lane.b32.xlu0 %v1594_v11, %s1491_s16 }
 0x249   : > { %649 = vrot.lane.b32.xlu2 %v1588_v7, %s1491_s16 }
 0x297   : > { %v860_v57 = vpop.xlane.xlu1 %859 }
 0x298   : > { %v870_v58 = vsub.f32 %v854_v42, %v860_v57 }
 0x29a   : > { %v874_v59 = vmul.f32 1.442695, %v870_v58 }
 0x29c   : > { %1382 = vpow2.f32 %v874_v59  ;;  %v869_v60 = vpop.xlane.xlu2 %868 }
 0x29d   : > { %v873_v11 = vsub.f32 %v857_v45, %v869_v60 }
 0x29f   : > { %v863_v61 = vpop.xlane.xlu0 %862  ;;  %v880_v5 = vmul.f32 1.442695, %v873_v11 }
 0x2a0   : > { %v871_v62 = vsub.f32 %v855_v49, %v863_v61 }
 0x2a2   : > { %v1687_v63 = vpop.eup %1382  ;;  %v876_v0 = vmul.f32 1.442695, %v871_v62 }
 0x2a3   : > { %v882_v3 = vsel %vm771_vm3, %v1687_v63, 0.0 }
 0x2a4   : > { %1384 = vpow2.f32 %v876_v0  ;;  %883 = vadd.xlane.f32.xlu0 %v882_v3  ;;  %v866_v12 = vpop.xlane.xlu2 %865 }
 0x2a5   : > { %v872_v13 = vsub.f32 %v856_v52, %v866_v12 }
 0x2a7   : > { %v878_v4 = vmul.f32 1.442695, %v872_v13 }
 0x2a9   : > { %1386 = vpow2.f32 %v878_v4 }
 0x2aa   : > { %v1691_v7 = vpop.eup %1384  ;;  %1388 = vpow2.f32 %v880_v5 }
 0x2ab   : > { %v885_v6 = vsel %vm771_vm3, %v1691_v7, 0.0 }
 0x2ac   : > { %886 = vadd.xlane.f32.xlu1 %v885_v6  ;;  %v650_v9 = vpop.permute.xlu2 %649 }
 0x2ad   : > { %v660_v16 = vshrl.u32 %v650_v9, 16 }
 0x2af   : > { %v1695_v8 = vpop.eup %1386  ;;  %v654_v19 = vpop.permute.xlu1 %653 }
 0x2b0   : > { %v888_v1 = vsel %vm771_vm3, %v1695_v8, 0.0  ;;  %v1699_v15 = vpop.eup %1388  ;;  %v666_v24 = vshrl.u32 %v654_v19, 16 }
 0x2b1   : > { %889 = vadd.xlane.f32.xlu2 %v888_v1  ;;  %v891_v20 = vsel %vm771_vm3, %v1699_v15, 0.0 }
 0x2b2   : > { %v652_v10 = vpop.permute.xlu0 %651 }
 0x2b3   : > { %v661_v14 = vshrl.u32 %v652_v10, 16  ;;  %v659_v17 = vpack.i.b16 %v652_v10, %v650_v9 }
 0x2b5   : > { %v662_v18 = vpack.i.b16 %v661_v14, %v660_v16  ;;  %v673_v21 = vperm.slane %v659_v17, %v1603_v23 }
 0x2b7   : > { %v699_v25 = vperm.slane %v662_v18, %v1603_v23  ;;  %v681_v28 = vrot.slane %v673_v21, 4 }
 0x2b9   : > { %892 = vadd.xlane.f32.xlu2 %v891_v20  ;;  %v707_v31 = vrot.slane %v699_v25, 4 }
 0x2ba   : > { %v656_v22 = vpop.permute.xlu0 %655 }
 0x2bb   : > { %v665_v26 = vpack.i.b16 %v656_v22, %v654_v19  ;;  %v667_v27 = vshrl.u32 %v656_v22, 16 }
 0x2bd   : > { %v668_v29 = vpack.i.b16 %v667_v27, %v666_v24  ;;  %v678_v30 = vperm.slane %v665_v26, %v1603_v23 }
 0x2bf   : > { %v679_v32 = vrot.slane %v678_v30, 4  ;;  %v682_v33 = vsel %vm427_vm1, %v678_v30, %v681_v28  ;;  %v704_v34 = vperm.slane %v668_v29, %v1603_v23 }
 0x2c0   : > { %v690_v35 = vperm.slane %v682_v33, %v1608_v37 }
 0x2c1   : > { %v680_v36 = vsel %vm427_vm1, %v679_v32, %v673_v21  ;;  %v705_v38 = vrot.slane %v704_v34, 4  ;;  %v708_v39 = vsel %vm427_vm1, %v704_v34, %v707_v31 }
 0x2c2   : > { %v686_v40 = vperm.slane %v680_v36, %v1608_v37  ;;  %v693_v41 = vrot.slane %v690_v35, 4  ;;  %v716_v42 = vperm.slane %v708_v39, %v1608_v37 }
 0x2c3   : > { %v706_v43 = vsel %vm427_vm1, %v705_v38, %v699_v25 }
 0x2c4   : > { %v691_v44 = vrot.slane %v686_v40, 4  ;;  %v694_v45 = vsel %vm427_vm1, 0, %v693_v41  ;;  %v712_v46 = vperm.slane %v706_v43, %v1608_v37  ;;  %v719_v47 = vrot.slane %v716_v42, 4 }
 0x2c5   : > { %v726_v48 = vrot.slane %v694_v45, 4  ;;  %v721_v53 = vsel %vm427_vm1, %v693_v41, %v686_v40 }
 0x2c6   : > { %v692_v49 = vsel %vm427_vm1, 0, %v691_v44  ;;  %v717_v50 = vrot.slane %v712_v46, 4  ;;  %v720_v51 = vsel %vm427_vm1, 0, %v719_v47  ;;  %v740_v57 = vsel %vm427_vm1, %v719_v47, %v712_v46 }
 0x2c7   : > { %v745_v52 = vrot.slane %v720_v51, 4  ;;  %v727_v54 = vsel %vm427_vm1, %v726_v48, %v692_v49  ;;  %v725_v59 = vperm.slane %v721_v53, %v1603_v23  ;;  %v744_v0 = vperm.slane %v740_v57, %v1603_v23 }
 0x2c8   : > { %v718_v55 = vsel %vm427_vm1, 0, %v717_v50  ;;  %v731_v56 = vperm.slane %v727_v54, %v1603_v23 }
 0x2c9   : > { %v746_v58 = vsel %vm427_vm1, %v745_v52, %v718_v55 }
 0x2ca   : > { %v732_v60 = vrot.slane %v731_v56, 4  ;;  %v750_v61 = vperm.slane %v746_v58, %v1603_v23 }
 0x2cc   : > { %v733_v62 = vsel %vm427_vm1, %v732_v60, %v725_v59  ;;  %v751_v3 = vrot.slane %v750_v61, 4 }
 0x2cd   : > { %v737_v12 = vperm.slane %v733_v62, %v1608_v37 }
 0x2ce   : > { %v752_v13 = vsel %vm427_vm1, %v751_v3, %v744_v0 }
 0x2cf   : > { %v756_v11 = vperm.slane %v752_v13, %v1608_v37  ;;  %v738_v4 = vrot.slane %v737_v12, 4  ;;  %v762_v5 = vshrl.u32 %v737_v12, 16 }
 0x2d1   : > { %v761_v6 = vpack.i.b16 %v756_v11, %v737_v12  ;;  %v763_v1 = vshrl.u32 %v756_v11, 16  ;;  %v739_v9 = vsel %vm427_vm1, 0, %v738_v4  ;;  %v757_v10 = vrot.slane %v756_v11, 4 }
 0x2d2   : > { %v768_v19 = vshrl.u32 %v739_v9, 16 }
 0x2d3   : > { %v911_v14 = vsel %vm909_vm5, %v761_v6, 0  ;;  %v764_v16 = vpack.i.b16 %v763_v1, %v762_v5  ;;  %v758_v17 = vsel %vm427_vm1, 0, %v757_v10 }
 0x2d4   : > { %920 = vmatpush.bf16.msrb.mxu1 %v911_v14  ;;  %v767_v18 = vpack.i.b16 %v758_v17, %v739_v9  ;;  %v769_v20 = vshrl.u32 %v758_v17, 16 }
 0x2d5   : > { %v930_v21 = vsel %vm909_vm5, %v764_v16, 0 }
 0x2d6   : > { %939 = vmatpush.bf16.msrb.mxu2 %v930_v21  ;;  %v949_v22 = vsel %vm909_vm5, %v767_v18, 0  ;;  %v770_v24 = vpack.i.b16 %v769_v20, %v768_v19 }
 0x2d7   : > { %958 = vmatpush.bf16.msrb.mxu3 %v949_v22 }
 0x2d8   : > { %v968_v25 = vsel %vm909_vm5, %v770_v24, 0 }
 0x2d9   : > { %977 = vmatpush.bf16.msra.mxu0 %v968_v25 }
 0x317   : > { %v884_v26 = vpop.xlane.xlu0 %883 }
 0x318   : > { %1390 = vrcp.f32 %v884_v26 }
 0x31e   : > { %v1391_v27 = vpop.eup %1390 }
 0x31f   : > { %v898_v28 = vmul.f32 %v1391_v27, %v1687_v63  ;;  %v887_v29 = vpop.xlane.xlu1 %886 }
 0x320   : > { %1392 = vrcp.f32 %v887_v29 }
 0x321   : > { %v902_v30 = vpack.c.bf16 %v898_v28, %v898_v28 }
 0x323   : > { %1314 = vmatmul.msk.bf16.vlgmr.msrb.gmra.mxu1 %vm771_vm3, %v902_v30 }
 0x324   : > { %v890_v31 = vpop.xlane.xlu2 %889 }
 0x325   : > { %1394 = vrcp.f32 %v890_v31 }
 0x326   : > { %v1393_v32 = vpop.eup %1392 }
 0x327   : > { %v899_v33 = vmul.f32 %v1393_v32, %v1691_v7 }
 0x329   : > { %v903_v34 = vpack.c.bf16 %v899_v33, %v899_v33 }
 0x32b   : > { %v1395_v35 = vpop.eup %1394  ;;  %1315 = vmatmul.msk.bf16.vlgmr.msrb.gmra.mxu2 %vm771_vm3, %v903_v34 }
 0x32c   : > { %v900_v36 = vmul.f32 %v1395_v35, %v1695_v8  ;;  %v893_v38 = vpop.xlane.xlu2 %892 }
 0x32d   : > { %1396 = vrcp.f32 %v893_v38 }
 0x32e   : > { %v904_v39 = vpack.c.bf16 %v900_v36, %v900_v36 }
 0x330   : > { %1316 = vmatmul.msk.bf16.vlgmr.msrb.gmra.mxu3 %vm771_vm3, %v904_v39 }
 0x333   : > { %v1397_v63 = vpop.eup %1396 }
 0x334   : > { %v901_v40 = vmul.f32 %v1397_v63, %v1699_v15 }
 0x336   : > { %v905_v41 = vpack.c.bf16 %v901_v40, %v901_v40 }
 0x338   : > { %1317 = vmatmul.msk.bf16.vlgmr.msra.gmra.mxu0 %vm771_vm3, %v905_v41 }
 0x3a0   : > { %v922_v42 = vpop.f32.mrf.mxu1 }
 0x3a1   : > { %v986_v44 = vrot.slane %v922_v42, 4 }
 0x3a8   : > { %v924_v43 = vpop.f32.mrf.mxu1 }
 0x3ae   : > { %v941_v7 = vpop.f32.mrf.mxu2 }
 0x3af   : > { %v998_v46 = vrot.slane %v941_v7, 4 }
 0x3b3   : > { %v960_v45 = vpop.f32.mrf.mxu3 }
 0x3b4   : > { %v983_v47 = vrot.slane %v960_v45, 4  ;;  %v987_v8 = vsel %vm427_vm1, %v960_v45, %v986_v44 }
 0x3b5   : > { %v995_v48 = vperm.slane %v987_v8, %v1603_v23  ;;  %v979_v49 = vpop.f32.mrf.mxu0 }
 0x3b6   : > { %v985_v50 = vsel %vm427_vm1, %v983_v47, %v922_v42  ;;  %v996_v51 = vrot.slane %v979_v49, 4  ;;  %v999_v15 = vsel %vm427_vm1, %v979_v49, %v998_v46  ;;  %v943_v52 = vpop.f32.mrf.mxu2  ;;  %v1331_v49 = vld [vmem:[#allocation2] sm:$0xff] }
 0x3b7   : > { %v991_v53 = vperm.slane %v985_v50, %v1603_v23  ;;  %v1022_v54 = vrot.slane %v995_v48, 4  ;;  %v1007_v55 = vperm.slane %v999_v15, %v1603_v23 }
 0x3b8   : > { %v997_v56 = vsel %vm427_vm1, %v996_v51, %v941_v7 }
 0x3b9   : > { %v1010_v57 = vrot.slane %v991_v53, 4  ;;  %v1003_v58 = vperm.slane %v997_v56, %v1603_v23  ;;  %v1020_v59 = vrot.slane %v1007_v55, 4  ;;  %v1023_v60 = vsel %vm427_vm1, %v1007_v55, %v1022_v54  ;;  %v1379_v55 = vld [vmem:[%s1809_s5] ss:$0 sm:$0xff] }
 0x3ba   : > { %v1031_v61 = vperm.slane %v1023_v60, %v1608_v37 }
 0x3bb   : > { %v1008_v62 = vrot.slane %v1003_v58, 4  ;;  %v1011_v0 = vsel %vm427_vm1, %v1003_v58, %v1010_v57  ;;  %v1021_v3 = vsel %vm427_vm1, %v1020_v59, %v995_v48  ;;  %v962_v12 = vpop.f32.mrf.mxu3  ;;  %v1332_v48 = vld [vmem:[#allocation2 + $0x8] sm:$0xff] }
 0x3bc   : > { %v1019_v13 = vperm.slane %v1011_v0, %v1608_v37  ;;  %v1027_v11 = vperm.slane %v1021_v3, %v1608_v37  ;;  %v1038_v4 = vrot.slane %v1031_v61, 4  ;;  %1133 = vmatpush.bf16.msra.mxu1 %v1332_v48  ;;  %v1495_v61 = vmov 32.0  }
 0x3bd   : > { %v1009_v5 = vsel %vm427_vm1, %v1008_v62, %v991_v53  ;;  %v981_v6 = vpop.f32.mrf.mxu0  ;;  %1398 = vrcp.f32 %v1495_v61 }
 0x3be   : > { %v1015_v1 = vperm.slane %v1009_v5, %v1608_v37  ;;  %v1034_v9 = vrot.slane %v1019_v13, 4  ;;  %v1036_v10 = vrot.slane %v1027_v11, 4  ;;  %v1039_v14 = vsel %vm427_vm1, 0.0, %v1038_v4 }
 0x3bf   : > { %v1051_v16 = vsel %vm427_vm1, %v1038_v4, %v1027_v11  ;;  %v1056_v17 = vrot.slane %v1039_v14, 4 }
 0x3c0   : > { %v1032_v18 = vrot.slane %v1015_v1, 4  ;;  %v1035_v19 = vsel %vm427_vm1, 0.0, %v1034_v9  ;;  %v1037_v20 = vsel %vm427_vm1, 0.0, %v1036_v10  ;;  %v1055_v21 = vperm.slane %v1051_v16, %v1603_v23  ;;  %1134 = vmatpush.bf16.msra.mxu1 %v1331_v49 }
 0x3c1   : > { %v1045_v22 = vrot.slane %v1035_v19, 4  ;;  %v1040_v24 = vsel %vm427_vm1, %v1034_v9, %v1015_v1  ;;  %v1057_v25 = vsel %vm427_vm1, %v1056_v17, %v1037_v20 }
 0x3c2   : > { %v1033_v26 = vsel %vm427_vm1, 0.0, %v1032_v18  ;;  %v1044_v27 = vperm.slane %v1040_v24, %v1603_v23  ;;  %v1061_v28 = vperm.slane %v1057_v25, %v1603_v23  ;;  %v1076_v29 = vrot.slane %v1055_v21, 4 }
 0x3c3   : > { %v1046_v30 = vsel %vm427_vm1, %v1045_v22, %v1033_v26  ;;  %v1399_v62 = vpop.eup %1398 }
 0x3c4   : > { %v1050_v31 = vperm.slane %v1046_v30, %v1603_v23  ;;  %v1064_v32 = vrot.slane %v1044_v27, 4  ;;  %v1077_v33 = vsel %vm427_vm1, %v1061_v28, %v1076_v29  ;;  %v1074_v34 = vrot.slane %v1061_v28, 4 }
 0x3c5   : > { %v1085_v35 = vperm.slane %v1077_v33, %v1608_v37  ;;  %v1152_v0 = vmul.f32 32.0, %v1399_v62  ;;  %vm1156_vm8 = vweird.f32 %v1399_v62 }
 0x3c6   : > { %v1065_v36 = vsel %vm427_vm1, %v1050_v31, %v1064_v32  ;;  %v1062_v38 = vrot.slane %v1050_v31, 4  ;;  %v1075_v39 = vsel %vm427_vm1, %v1074_v34, %v1055_v21 }
 0x3c7   : > { %v1073_v63 = vperm.slane %v1065_v36, %v1608_v37  ;;  %v1090_v40 = vrot.slane %v1085_v35, 4  ;;  %v1081_v41 = vperm.slane %v1075_v39, %v1608_v37  ;;  %v1153_v3 = vsub.f32 1.0, %v1152_v0  ;;  %v1381_v39 = vld [vmem:[#allocation4] ss:$0 sm:$0xff] }
 0x3c8   : > { %v1063_v42 = vsel %vm427_vm1, %v1062_v38, %v1044_v27 }
 0x3c9   : > { %v1091_v23 = vsel %vm427_vm1, %v1090_v40, %v1073_v63  ;;  %v1092_v43 = vrot.slane %v1073_v63, 4  ;;  %v1069_v7 = vperm.slane %v1063_v42, %v1608_v37  ;;  %v1086_v44 = vrot.slane %v1081_v41, 4 }
 0x3ca   : > { %1099 = vrot.lane.b32.xlu0 %v1091_v23, %s1492_s17  ;;  %v1154_v12 = vmul.f32 %v1399_v62, %v1153_v3 }
 0x3cb   : > { %v1093_v45 = vsel %vm427_vm1, %v1085_v35, %v1092_v43  ;;  %v1088_v46 = vrot.slane %v1069_v7, 4  ;;  %v1087_v47 = vsel %vm427_vm1, %v1086_v44, %v1069_v7  ;;  %v1380_v35 = vld [vmem:[%s1810_s6] ss:$0 sm:$0xff] }
 0x3cc   : > { %1103 = vrot.lane.b32.xlu2 %v1093_v45, %s1493_s18  ;;  %v1155_v13 = vadd.f32 %v1399_v62, %v1154_v12 }
 0x3cd   : > { %v1089_v8 = vsel %vm427_vm1, %v1081_v41, %v1088_v46 }
 0x3ce   : > { %1095 = vrot.lane.b32.xlu1 %v1089_v8, %s1494_s19  ;;  %v1157_v11 = vsel %vm1156_vm8, %v1399_v62, %v1155_v13 }
 0x426   : > { %v1104_v15 = vpop.permute.xlu2 %1103 }
 0x43c   : > { %v1100_v50 = vpop.permute.xlu0 %1099 }
 0x440   : > { %v1096_v37 = vpop.permute.xlu1 %1095 }
 0x441   : > { %v1106_v51 = vsel %vm771_vm3, %v1087_v47, %v1096_v37 }
 0x442   : > { %v1108_v52 = vsel %vm1107_vm6, %v1106_v51, %v1100_v50 }
 0x443   : > { %v1110_v53 = vsel %vm1109_vm7, %v1108_v52, %v1104_v15 }
 0x444   : > { %v1111_v54 = vpack.c.bf16 %v1110_v53, %v1110_v53 }
 0x446   : > { %1326 = vmatmul.msk.bf16.vlgmr.msra.gmra.mxu1 %vm373_vm0, %v1111_v54 }
 0x4c3   : > { %v1136_v56 = vpop.f32.mrf.mxu1 }
 0x4c4   : > { %v1140_v57 = vadd.f32 %v1136_v56, %v1580_v2 }
 0x4c6   : > { %v1145_v58 = vadd.f32 %v1379_v55, %v1140_v57 }
 0x4c8   : > { %v1148_v59 = vsel %vm373_vm0, %v1145_v58, 0.0 }
 0x4c9   : > { %1149 = vadd.xlane.f32.xlu0 %v1148_v59 }
 0x4cb   : > { %v1138_v60 = vpop.f32.mrf.mxu1 }
 0x53c   : > { %v1150_v4 = vpop.xlane.xlu0 %1149 }
 0x53d   : > { %v1158_v5 = vmul.f32 %v1157_v11, %v1150_v4 }
 0x53f   : > { %v1159_v6 = vsub.f32 %v1145_v58, %v1158_v5 }
 0x541   : > { %v1160_v1 = vmul.f32 %v1159_v6, %v1159_v6 }
 0x543   : > { %v1161_v2 = vsel %vm373_vm0, %v1160_v1, 0.0 }
 0x544   : > { %1162 = vadd.xlane.f32.xlu1 %v1161_v2 }
 0x5b7   : > { %v1163_v9 = vpop.xlane.xlu1 %1162 }
 0x5b8   : > { %v1164_v10 = vmul.f32 0.032258064, %v1163_v9 }
 0x5ba   : > { %1400 = vrsqrt.f32 %v1164_v10  ;;  %vm1172_vm9 = vcmp.eq.f32.partialorder %v1164_v10, inf  ;;  %v1175_v22 = vand.u32 2147483648, %v1164_v10  ;;  %vm1174_vm10 = vcmp.eq.f32.partialorder %v1164_v10, 0.0 }
 0x5c0   : > { %v1401_v14 = vpop.eup %1400 }
 0x5c1   : > { %v1166_v16 = vmul.f32 %v1401_v14, %v1164_v10 }
 0x5c3   : > { %v1167_v17 = vmul.f32 %v1401_v14, %v1166_v16 }
 0x5c5   : > { %v1168_v18 = vmul.f32 0.5, %v1167_v17 }
 0x5c7   : > { %v1169_v19 = vsub.f32 1.5, %v1168_v18 }
 0x5c9   : > { %v1170_v20 = vmul.f32 %v1401_v14, %v1169_v19 }
 0x5cb   : > { %v1171_v21 = vmul.f32 %v1170_v20, %v1164_v10 }
 0x5cd   : > { %v1173_v24 = vsel %vm1172_vm9, %v1164_v10, %v1171_v21 }
 0x5ce   : > { %v1176_v25 = vsel %vm1174_vm10, %v1175_v22, %v1173_v24 }
 0x5cf   : > { %v1177_v26 = vadd.f32 1e-12, %v1176_v25 }
 0x5d1   : > { %1402 = vrcp.f32 %v1177_v26  ;;  %v1189_v30 = vand.u32 2147483648, %v1177_v26  ;;  %v1187_v32 = vand.u32 2147483647, %v1177_v26  ;;  %vm1183_vm12 = vweird.f32 %v1177_v26 }
 0x5d3   : > { %v1190_v34 = vor.u32 1.1754944e-38, %v1189_v30  ;;  %vm1188_vm14 = vcmp.eq.f32.partialorder %v1187_v32, 8.507059e+37 }
 0x5d7   : > { %v1403_v27 = vpop.eup %1402 }
 0x5d8   : > { %v1179_v28 = vmul.f32 %v1403_v27, %v1177_v26  ;;  %vm1184_vm11 = vweird.f32 %v1403_v27 }
 0x5d9   : > { %vm1185_vm13 = vmor %vm1183_vm12, %vm1184_vm11 }
 0x5da   : > { %v1180_v29 = vsub.f32 1.0, %v1179_v28 }
 0x5dc   : > { %v1181_v31 = vmul.f32 %v1403_v27, %v1180_v29 }
 0x5de   : > { %v1182_v33 = vadd.f32 %v1403_v27, %v1181_v31 }
 0x5e0   : > { %v1186_v36 = vsel %vm1185_vm13, %v1403_v27, %v1182_v33 }
 0x5e1   : > { %v1191_v38 = vsel %vm1188_vm14, %v1190_v34, %v1186_v36 }
 0x5e2   : > { %v1192_v63 = vmul.f32 %v1191_v38, %v1159_v6 }
 0x5e4   : > { %v1196_v40 = vmul.f32 %v1380_v35, %v1192_v63 }
 0x5e6   : > { %v1200_v41 = vadd.f32 %v1381_v39, %v1196_v40 }
 0x5e8   : > { %1201 = vst.msk [vmem:[%s349_s28] sm:$0xff] %vm373_vm0, %v1200_v41 }
 0x5e9 PF: > { %s20_s27 = sadd.s32 1, %s1478_s27  }
 0x5ea   : > { %p17_p7 = scmp.ge.s32.totalorder %s20_s27, 4  }
 0x5ec   :  { %19 = sbr.rel (!%p17_p7) target bundleno = 2 (0x2), region = 94 }
 0x5f1   :  { %1221 = vsyncpa [#allocation3], 1 }
 0x5f2   :  { %1223 = vsyncpa [#allocation3 + $0x1], 1 }
 0x5f3   :  { %1224 = vsyncpa [#allocation5], 1 }

// kernel: decoder_forward.13
= control target key start
LH: loop header
LB: loop body
LE: loop exit
PB: predicated region body
PF: predicated region fallthrough
CT: control target
= control target key end

     0   :  { %s2205_s0 = inlined_call_operand.vmem [shape: f32[2,8,32], index: 0, kind: input, shape index: {}]   ;;  %s2206_s1 = inlined_call_operand.vmem [shape: bf16[2,8,32], index: 1, kind: input, shape index: {}]   ;;  %s2207_s2 = inlined_call_operand.vmem [shape: f32[2,1,8], index: 2, kind: input, shape index: {}]   ;;  %s2208_s3 = inlined_call_operand.hbm [shape: bf16[32,32], index: 3, kind: input, shape index: {}]   ;;  %s2209_s4 = inlined_call_operand.vmem [shape: f32[1,32], index: 4, kind: input, shape index: {}]   ;;  %s2210_s5 = inlined_call_operand.hbm [shape: bf16[32,64], index: 5, kind: input, shape index: {}]   ;;  %s2211_s6 = inlined_call_operand.hbm [shape: f32[1,64], index: 6, kind: input, shape index: {}]   ;;  %s2212_s7 = inlined_call_operand.hbm [shape: bf16[32,32], index: 7, kind: input, shape index: {}]   ;;  %s2213_s8 = inlined_call_operand.hbm [shape: f32[1,32], index: 8, kind: input, shape index: {}]   ;;  %s2214_s9 = inlined_call_operand.vmem [shape: f32[1,32], index: 9, kind: input, shape index: {}]   ;;  %s2215_s10 = inlined_call_operand.vmem [shape: f32[1,32], index: 10, kind: input, shape index: {}]   ;;  %s2216_s11 = inlined_call_operand.vmem [shape: f32[2,8,32], index: 11, kind: output, shape index: {}]  }
   0x1   :  { %2217 = sst [smem:[#allocation13_spill]] %s2208_s3 }
   0x2   :  { %16 = vsyncpa [#allocation3], 0 }
   0x3   :  { %17 = vsyncpa [#allocation5], 0 }
   0x4   :  { %18 = vsyncpa [#allocation8], 0  ;;  %s1903_s17 = smov 0  }
   0x5 LB: > { %s1909_s18 = sadd.s32 4294967295, %s1823_s17   ;;  %p1497_p0 = scmp.ge.s32.totalorder %s1823_s17, 1  ;;  %s1823_s17 = sphi %s1903_s17, %s24_s17  }
   0x6   : > { %p301_p1 = scmp.lt.s32.totalorder %s1823_s17, 3  ;;  %p1592_p2 = scmp.eq.s32.totalorder %s1909_s18, 0 }
   0x7   : > { %s329_s21 = sshll.u32 %s2210_s5, 4  ;;  %s355_s25 = sshll.u32 %s2212_s7, 4  ;;  %s330_s21 = int_to_ptr.hbm [resolvable:$true] %s329_s21  ;;  %s356_s25 = int_to_ptr.hbm [resolvable:$true] %s355_s25 }
   0x8   : > { %p1917_p3 = pnand %p1497_p0, %p301_p1  ;;  %s1825_s26 = smov [#allocation4]  }
   0x9   : > { %s331_s27 = sshll.u32 %s1825_s26, 4  ;;  %s1826_s29 = smov [#allocation7]   ;;  %s332_s27 = int_to_ptr.vmem [resolvable:$true] %s331_s27 }
   0xa   : > { %p1576_p4 = pneg %p1917_p3  ;;  %s357_s30 = sshll.u32 %s1826_s29, 4  ;;  %s358_s30 = int_to_ptr.vmem [resolvable:$true] %s357_s30 }
   0xb   : > { %s2220_s3 = sld [smem:[#allocation13_spill]]  ;;  %s1827_s15 = smov 64  }
   0xc   : > { %p1928_p5 = pnand %p1592_p2, %p1576_p4  ;;  %s1828_s16 = smov 4  }
   0xd   : > { %s1829_s19 = smov [#allocation2]   ;;  %s344_s26 = sshll.u32 %s2211_s6, 4  ;;  %s345_s26 = int_to_ptr.hbm [resolvable:$true] %s344_s26 }
   0xe   : > { %1582 = dma.hbm_to_vmem [thread:$0]  (!%p1928_p5), %s330_s21, 256, %s332_s27, [#allocation5], %s1827_s15, %s1827_s15, %s1828_s16  }
   0xf   : > { %1588 = dma.hbm_to_vmem [thread:$0]  (!%p1928_p5), %s356_s25, 256, %s358_s30, [#allocation8], %s1827_s15, %s1827_s15, %s1828_s16  }
  0x10   : > { %s314_s20 = sshll.u32 %s1829_s19, 4  ;;  %s370_s13 = sshll.u32 %s2213_s8, 4  ;;  %s315_s20 = int_to_ptr.vmem [resolvable:$true] %s314_s20  ;;  %s371_s13 = int_to_ptr.hbm [resolvable:$true] %s370_s13 }
  0x11   : > { %s312_s14 = sshll.u32 %s2220_s3, 4  ;;  %s1830_s3 = smov [#allocation6]   ;;  %s313_s14 = int_to_ptr.hbm [resolvable:$true] %s312_s14 }
  0x12   : > { %1579 = dma.hbm_to_vmem [thread:$0]  (!%p1928_p5), %s313_s14, 256, %s315_s20, [#allocation3], %s1827_s15, %s1827_s15, %s1828_s16  }
  0x13   : > { %s346_s21 = sshll.u32 %s1830_s3, 4  ;;  %s1831_s25 = smov [#allocation9]   ;;  %s347_s21 = int_to_ptr.vmem [resolvable:$true] %s346_s21 }
  0x14   : > { %1585 = dma.hbm_to_vmem [thread:$0]  (!%p1928_p5), %s345_s26, 16, %s347_s21, [#allocation5]  }
  0x15   : > { %s372_s27 = sshll.u32 %s1831_s25, 4  ;;  %411 = sbr.rel (%p1917_p3) target bundleno = 1417 (0x589), region = 64  ;;  %s373_s27 = int_to_ptr.vmem [resolvable:$true] %s372_s27 }
  0x16   : > { %1591 = dma.hbm_to_vmem [thread:$0]  (!%p1928_p5), %s371_s13, 16, %s373_s27, [#allocation8]  }
  0x1a   : > { %1810 = dma.done.wait (%p1592_p2), [#allocation3], 256  }
  0x1b   : > { %1812 = vsyncadd (%p1592_p2), [#allocation3], 4294967040 }
  0x1c   : > { %1814 = dma.done.wait (%p1592_p2), [#allocation5], 272  }
  0x1d   : > { %1816 = vsyncadd (%p1592_p2), [#allocation5], 4294967024 }
  0x1e   : > { %1818 = dma.done.wait (%p1592_p2), [#allocation8], 272  }
  0x1f   : > { %1820 = vsyncadd (%p1592_p2), [#allocation8], 4294967024  ;;  %p477_p6 = scmp.lt.s32.totalorder %s1909_s18, 1  ;;  %v1553_v0 = vld [vmem:[#allocation4 + $0x8] sm:$0xff]  ;;  %v1551_v1 = vld [vmem:[#allocation2 + $0x8] sm:$0xff]  ;;  %vm515_vm0 = vcmask 261120  }
  0x20   : > { %v1552_v2 = vld [vmem:[#allocation4] sm:$0xff]  ;;  %v1550_v3 = vld [vmem:[#allocation2] sm:$0xff]  ;;  %563 = vmatpush.bf16.msra.mxu1 %v1553_v0  ;;  %525 = vmatpush.bf16.msra.mxu0 %v1551_v1  ;;  %s1832_s24 = smov 104   ;;  %s1833_s26 = smov 120   ;;  %v1836_v19 = vmov 1983009808  }
  0x21   : > { %s2222_s18 = smov (!%p477_p6, %s1909_s18), 1  ;;  %v1628_v7 = vld [vmem:[#allocation6] ss:$0 sm:$0xff]  ;;  %s1834_s29 = smov 112   ;;  %v597_v20 = vunpack.c.l.s4 %v1836_v19  ;;  %v1837_v35 = vmov 1934713408  }
  0x22   : > { %s1510_s3 = sshll.u32 %s2222_s18, 3  ;;  %s1511_s14 = sshll.u32 %s2222_s18, 2  ;;  %v1629_v8 = vld [vmem:[%s2209_s4] ss:$0 sm:$0xff]  ;;  %v611_v36 = vunpack.c.l.s4 %v1837_v35  ;;  %vm606_vm1 = vcmask 1047556   ;;  %vm942_vm2 = vcmask 64512  }
  0x23   : > { %s480_s30 = scalar_lea.vmem %s2205_s0, %s1510_s3  ;;  %s484_s19 = scalar_lea.vmem %s2206_s1, %s1511_s14  ;;  %v1993_v24 = vunpack.c.0.s8 %v597_v20  ;;  %vm1078_vm5 = vcmask 1043456   ;;  %vm1276_vm6 = vcmask 130048   ;;  %vm1278_vm7 = vcmask 195584  }
  0x24   : > { %v1976_v4 = vld [vmem:[%s480_s30] sm:$0xff]  ;;  %564 = vmatpush.bf16.msra.mxu1 %v1552_v2  ;;  %526 = vmatpush.bf16.msra.mxu0 %v1550_v3  ;;  %s1835_s12 = smov 96   ;;  %v2007_v49 = vunpack.c.0.s8 %v611_v36  ;;  %s487_s25 = scalar_lea.vmem %s2207_s2, %s2222_s18 }
  0x25   : > { %v494_v5 = vpack.c.bf16 %v1976_v4, %v1976_v4  ;;  %v533_v6 = vld [vmem:[%s484_s19] sm:$0xf]  ;;  %s1839_s27 = smov 24   ;;  %s1840_s22 = smov 16  }
  0x26   : > { %s1841_s28 = smov 8   ;;  %s491_s23 = scalar_lea.vmem %s2216_s11, %s1510_s3 }
  0x27   : > { %1530 = vmatmul.msk.bf16.vlgmr.msra.gmra.mxu1 %vm515_vm0, %v533_v6  ;;  %1521 = vmatmul.msk.bf16.vlgmr.msra.gmra.mxu0 %vm515_vm0, %v494_v5 }
  0xa4   : > { %v566_v9 = vpop.f32.mrf.mxu1  ;;  %v528_v10 = vpop.f32.mrf.mxu0 }
  0xa5   : > { %v567_v11 = vadd.f32 %v1628_v7, %v566_v9  ;;  %v529_v12 = vadd.f32 %v1629_v8, %v528_v10 }
  0xa7   : > { %v698_v13 = vpack.c.bf16 %v567_v11, %v567_v11  ;;  %v532_v14 = vmul.f32 0.35355338, %v529_v12 }
  0xa9   : > { %704 = vrot.lane.b32.xlu1 %v698_v13, %s1832_s24  ;;  %700 = vrot.lane.b32.xlu0 %v698_v13, %s1833_s26  ;;  %v575_v15 = vpack.c.bf16 %v532_v14, %v532_v14  ;;  %v709_v25 = vshrl.u32 %v698_v13, 16 }
  0xab   : > { %579 = vrot.lane.b32.xlu2 %v575_v15, %s1834_s29  ;;  %v586_v41 = vshrl.u32 %v575_v15, 16 }
  0xac   : > { %v568_v16 = vpop.f32.mrf.mxu1  ;;  %v530_v17 = vpop.f32.mrf.mxu0 }
  0xb1   : > { %702 = vrot.lane.b32.xlu0 %v698_v13, %s1834_s29  ;;  %577 = vrot.lane.b32.xlu1 %v575_v15, %s1833_s26 }
  0xb3   : > { %581 = vrot.lane.b32.xlu2 %v575_v15, %s1832_s24 }
  0xb9   : > { %820 = vrot.lane.b32.xlu0 %v698_v13, %s1835_s12 }
 0x105   : > { %v580_v18 = vpop.permute.xlu2 %579 }
 0x106   : > { %v592_v27 = vshrl.u32 %v580_v18, 16 }
 0x10d   : > { %v582_v21 = vpop.permute.xlu2 %581 }
 0x10e   : > { %v591_v28 = vpack.i.b16 %v582_v21, %v580_v18  ;;  %v593_v29 = vshrl.u32 %v582_v21, 16 }
 0x110   : > { %v594_v32 = vpack.i.b16 %v593_v29, %v592_v27  ;;  %v604_v33 = vperm.slane %v591_v28, %v1993_v24 }
 0x112   : > { %v605_v46 = vrot.slane %v604_v33, 4  ;;  %v631_v47 = vperm.slane %v594_v32, %v1993_v24 }
 0x114   : > { %v632_v59 = vrot.slane %v631_v47, 4 }
 0x11b   : > { %v1989_v22 = vpop.permute.xlu1 %704  ;;  %v1991_v23 = vpop.permute.xlu0 %700 }
 0x11c   : > { %v710_v26 = vshrl.u32 %v1991_v23, 16  ;;  %v708_v30 = vpack.i.b16 %v1991_v23, %v698_v13  ;;  %v716_v37 = vshrl.u32 %v1989_v22, 16 }
 0x11e   : > { %v711_v31 = vpack.i.b16 %v710_v26, %v709_v25  ;;  %v722_v34 = vperm.slane %v708_v30, %v1993_v24 }
 0x120   : > { %v748_v38 = vperm.slane %v711_v31, %v1993_v24  ;;  %v730_v48 = vrot.slane %v722_v34, 4 }
 0x122   : > { %v756_v54 = vrot.slane %v748_v38, 4 }
 0x123   : > { %v2001_v39 = vpop.permute.xlu0 %702  ;;  %v578_v40 = vpop.permute.xlu1 %577 }
 0x124   : > { %v714_v42 = vpack.i.b16 %v1989_v22, %v2001_v39  ;;  %v715_v43 = vshrl.u32 %v2001_v39, 16  ;;  %v585_v44 = vpack.i.b16 %v578_v40, %v575_v15  ;;  %v587_v45 = vshrl.u32 %v578_v40, 16 }
 0x126   : > { %v717_v50 = vpack.i.b16 %v716_v37, %v715_v43  ;;  %v727_v51 = vperm.slane %v714_v42, %v1993_v24  ;;  %v588_v52 = vpack.i.b16 %v587_v45, %v586_v41  ;;  %v599_v53 = vperm.slane %v585_v44, %v1993_v24 }
 0x128   : > { %v728_v55 = vrot.slane %v727_v51, 4  ;;  %v731_v56 = vsel %vm606_vm1, %v727_v51, %v730_v48  ;;  %v753_v57 = vperm.slane %v717_v50, %v1993_v24  ;;  %v607_v58 = vsel %vm606_vm1, %v605_v46, %v599_v53 }
 0x129   : > { %v739_v60 = vperm.slane %v731_v56, %v2007_v49  ;;  %v608_v61 = vrot.slane %v599_v53, 4  ;;  %v626_v62 = vperm.slane %v588_v52, %v1993_v24  ;;  %v613_v2 = vperm.slane %v607_v58, %v2007_v49 }
 0x12a   : > { %v729_v63 = vsel %vm606_vm1, %v728_v55, %v722_v34  ;;  %v754_v0 = vrot.slane %v753_v57, 4  ;;  %v757_v1 = vsel %vm606_vm1, %v753_v57, %v756_v54 }
 0x12b   : > { %v735_v3 = vperm.slane %v729_v63, %v2007_v49  ;;  %v742_v5 = vrot.slane %v739_v60, 4  ;;  %v765_v6 = vperm.slane %v757_v1, %v2007_v49  ;;  %v609_v7 = vsel %vm606_vm1, %v604_v33, %v608_v61 }
 0x12c   : > { %v755_v8 = vsel %vm606_vm1, %v754_v0, %v748_v38  ;;  %v617_v9 = vperm.slane %v609_v7, %v2007_v49  ;;  %v633_v10 = vsel %vm606_vm1, %v632_v59, %v626_v62  ;;  %v634_v17 = vrot.slane %v626_v62, 4 }
 0x12d   : > { %v740_v11 = vrot.slane %v735_v3, 4  ;;  %v743_v12 = vsel %vm606_vm1, 0, %v742_v5  ;;  %v761_v13 = vperm.slane %v755_v8, %v2007_v49  ;;  %v768_v14 = vrot.slane %v765_v6, 4 }
 0x12e   : > { %v775_v15 = vrot.slane %v743_v12, 4  ;;  %v620_v16 = vrot.slane %v617_v9, 4  ;;  %v618_v20 = vrot.slane %v613_v2, 4  ;;  %v639_v21 = vperm.slane %v633_v10, %v2007_v49 }
 0x12f   : > { %v766_v18 = vrot.slane %v761_v13, 4  ;;  %v769_v19 = vsel %vm606_vm1, 0, %v768_v14  ;;  %v635_v27 = vsel %vm606_vm1, %v631_v47, %v634_v17  ;;  %v741_v30 = vsel %vm606_vm1, 0, %v740_v11 }
 0x130   : > { %v794_v25 = vrot.slane %v769_v19, 4  ;;  %v621_v26 = vsel %vm606_vm1, 0, %v620_v16  ;;  %v643_v28 = vperm.slane %v635_v27, %v2007_v49  ;;  %v644_v31 = vrot.slane %v639_v21, 4 }
 0x131   : > { %v653_v29 = vrot.slane %v621_v26, 4  ;;  %v767_v32 = vsel %vm606_vm1, 0, %v766_v18  ;;  %v770_v33 = vsel %vm606_vm1, %v742_v5, %v735_v3  ;;  %v776_v34 = vsel %vm606_vm1, %v775_v15, %v741_v30 }
 0x132   : > { %v619_v35 = vsel %vm606_vm1, 0, %v618_v20  ;;  %v646_v36 = vrot.slane %v643_v28, 4  ;;  %v780_v37 = vperm.slane %v776_v34, %v1993_v24  ;;  %v789_v38 = vsel %vm606_vm1, %v768_v14, %v761_v13 }
 0x133   : > { %v648_v40 = vsel %vm606_vm1, %v620_v16, %v613_v2  ;;  %v774_v41 = vperm.slane %v770_v33, %v1993_v24  ;;  %v795_v42 = vsel %vm606_vm1, %v794_v25, %v767_v32  ;;  %v654_v43 = vsel %vm606_vm1, %v653_v29, %v619_v35 }
 0x134   : > { %v647_v44 = vsel %vm606_vm1, 0, %v646_v36  ;;  %v781_v45 = vrot.slane %v780_v37, 4  ;;  %v799_v46 = vperm.slane %v795_v42, %v1993_v24  ;;  %v658_v47 = vperm.slane %v654_v43, %v1993_v24 }
 0x135   : > { %v645_v48 = vsel %vm606_vm1, 0, %v644_v31  ;;  %v672_v50 = vrot.slane %v647_v44, 4  ;;  %v793_v51 = vperm.slane %v789_v38, %v1993_v24  ;;  %v652_v54 = vperm.slane %v648_v40, %v1993_v24 }
 0x136   : > { %v782_v52 = vsel %vm606_vm1, %v781_v45, %v774_v41  ;;  %v800_v53 = vrot.slane %v799_v46, 4  ;;  %v659_v55 = vrot.slane %v658_v47, 4  ;;  %v667_v57 = vsel %vm606_vm1, %v646_v36, %v639_v21  ;;  %v570_v36 = vld [vmem:[%s487_s25] sm:$0x1] }
 0x137   : > { %v786_v56 = vperm.slane %v782_v52, %v2007_v49  ;;  %v673_v58 = vsel %vm606_vm1, %v672_v50, %v645_v48  ;;  %v671_v2 = vperm.slane %v667_v57, %v1993_v24  ;;  %vm1019_vm3 = vcmp.eq.f32.partialorder %v570_v36, 0.0 }
 0x138   : > { %v801_v59 = vsel %vm606_vm1, %v800_v53, %v793_v51  ;;  %v660_v60 = vsel %vm606_vm1, %v659_v55, %v652_v54  ;;  %v677_v61 = vperm.slane %v673_v58, %v1993_v24  ;;  %v1838_v37 = vmov 0   ;;  %v821_v58 = vpop.permute.xlu0 %820 }
 0x139   : > { %v805_v62 = vperm.slane %v801_v59, %v2007_v49  ;;  %v787_v63 = vrot.slane %v786_v56, 4  ;;  %v811_v0 = vshrl.u32 %v786_v56, 16  ;;  %v664_v1 = vperm.slane %v660_v60, %v2007_v49 }
 0x13a   : > { %v678_v3 = vrot.slane %v677_v61, 4  ;;  %v1020_v38 = vsel %vm1019_vm3, 1, %v1838_v37 }
 0x13b   : > { %v810_v5 = vpack.i.b16 %v805_v62, %v786_v56  ;;  %v812_v6 = vshrl.u32 %v805_v62, 16  ;;  %v788_v7 = vsel %vm606_vm1, 0, %v787_v63  ;;  %v806_v8 = vrot.slane %v805_v62, 4 }
 0x13c   : > { %v679_v9 = vsel %vm606_vm1, %v678_v3, %v671_v2  ;;  %v817_v15 = vshrl.u32 %v788_v7, 16  ;;  %v665_v18 = vrot.slane %v664_v1, 4  ;;  %v689_v29 = vshrl.u32 %v664_v1, 16 }
 0x13d   : > { %v947_v10 = vsel %vm942_vm2, %v810_v5, 0  ;;  %v813_v11 = vpack.i.b16 %v812_v6, %v811_v0  ;;  %v807_v12 = vsel %vm606_vm1, 0, %v806_v8  ;;  %v683_v13 = vperm.slane %v679_v9, %v2007_v49 }
 0x13e   : > { %956 = vmatpush.bf16.xpose.msra.mxu2 %v947_v10  ;;  %v816_v14 = vpack.i.b16 %v807_v12, %v788_v7  ;;  %v818_v16 = vshrl.u32 %v807_v12, 16  ;;  %v666_v30 = vsel %vm606_vm1, 0, %v665_v18  ;;  %v1021_v40 = vperm.slane %v1020_v38, 0 }
 0x13f   : > { %v966_v17 = vsel %vm942_vm2, %v813_v11, 0  ;;  %v684_v19 = vrot.slane %v683_v13, 4  ;;  %v690_v25 = vshrl.u32 %v683_v13, 16  ;;  %v688_v28 = vpack.i.b16 %v683_v13, %v664_v1 }
 0x140   : > { %975 = vmatpush.bf16.xpose.msra.mxu3 %v966_v17  ;;  %v985_v20 = vsel %vm942_vm2, %v816_v14, 0  ;;  %v819_v21 = vpack.i.b16 %v818_v16, %v817_v15  ;;  %v695_v34 = vshrl.u32 %v666_v30, 16  ;;  %vm1022_vm4 = vcmp.eq.s32.totalorder %v1021_v40, 1 }
 0x141   : > { %994 = vmatpush.bf16.xpose.msrb.mxu0 %v985_v20  ;;  %v685_v26 = vsel %vm606_vm1, 0, %v684_v19  ;;  %v691_v32 = vpack.i.b16 %v690_v25, %v689_v29 }
 0x142   : > { %v1004_v27 = vsel %vm942_vm2, %v819_v21, 0  ;;  %v696_v31 = vshrl.u32 %v685_v26, 16  ;;  %v694_v33 = vpack.i.b16 %v685_v26, %v666_v30  ;;  %v831_v21 = vshrl.u32 %v821_v58, 16 }
 0x143   : > { %1013 = vmatpush.bf16.xpose.msrb.mxu1 %v1004_v27 }
 0x144   : > { %v697_v35 = vpack.i.b16 %v696_v31, %v695_v34 }
 0x145   : > { %1531 = vmatmul.msk.bf16.vlgmr.msra.gmra.mxu2 %vm942_vm2, %v688_v28 }
 0x147   : > { %1532 = vmatmul.msk.bf16.vlgmr.msra.gmra.mxu3 %vm942_vm2, %v691_v32 }
 0x148   : > { %1533 = vmatmul.msk.bf16.vlgmr.msrb.gmra.mxu0 %vm942_vm2, %v694_v33 }
 0x14a   : > { %1534 = vmatmul.msk.bf16.vlgmr.msrb.gmra.mxu1 %vm942_vm2, %v697_v35 }
 0x1c5   : > { %v996_v41 = vpop.f32.mrf.mxu0 }
 0x1c6   : > { %v1025_v42 = vsel %vm1022_vm4, -1e+10, %v996_v41 }
 0x1c7   : > { %v1015_v43 = vpop.f32.mrf.mxu1  ;;  %v1033_v44 = vsel %vm942_vm2, %v1025_v42, -inf }
 0x1c8   : > { %v958_v45 = vpop.f32.mrf.mxu2  ;;  %1034 = vmax.xlane.f32.xlu2 %v1033_v44  ;;  %v1026_v51 = vsel %vm1022_vm4, -1e+10, %v1015_v43 }
 0x1c9   : > { %v1023_v46 = vsel %vm1022_vm4, -1e+10, %v958_v45  ;;  %v1036_v55 = vsel %vm942_vm2, %v1026_v51, -inf }
 0x1ca   : > { %v977_v47 = vpop.f32.mrf.mxu3  ;;  %v1027_v48 = vsel %vm942_vm2, %v1023_v46, -inf }
 0x1cb   : > { %v1024_v50 = vsel %vm1022_vm4, -1e+10, %v977_v47  ;;  %1028 = vmax.xlane.f32.xlu0 %v1027_v48 }
 0x1cc   : > { %v1030_v52 = vsel %vm942_vm2, %v1024_v50, -inf }
 0x1cd   : > { %1031 = vmax.xlane.f32.xlu1 %v1030_v52  ;;  %v998_v53 = vpop.f32.mrf.mxu0 }
 0x1cf   : > { %v1017_v54 = vpop.f32.mrf.mxu1 }
 0x1d0   : > { %v960_v56 = vpop.f32.mrf.mxu2  ;;  %1037 = vmax.xlane.f32.xlu2 %v1036_v55 }
 0x1d2   : > { %v979_v57 = vpop.f32.mrf.mxu3 }
 0x1df   : > { %826 = vrot.lane.b32.xlu0 %v1989_v22, %s1835_s12 }
 0x1e6   : > { %822 = vrot.lane.b32.xlu1 %v1991_v23, %s1835_s12 }
 0x1e8   : > { %824 = vrot.lane.b32.xlu2 %v2001_v39, %s1835_s12 }
 0x23b   : > { %v1035_v59 = vpop.xlane.xlu2 %1034 }
 0x23c   : > { %v1041_v60 = vsub.f32 %v1025_v42, %v1035_v59 }
 0x23e   : > { %v1047_v61 = vmul.f32 1.442695, %v1041_v60  ;;  %v1029_v62 = vpop.xlane.xlu0 %1028 }
 0x23f   : > { %v1039_v63 = vsub.f32 %v1023_v46, %v1029_v62 }
 0x240   : > { %1633 = vpow2.f32 %v1047_v61  ;;  %v1032_v0 = vpop.xlane.xlu1 %1031 }
 0x241   : > { %v1043_v1 = vmul.f32 1.442695, %v1039_v63  ;;  %v1040_v2 = vsub.f32 %v1024_v50, %v1032_v0 }
 0x243   : > { %1635 = vpow2.f32 %v1043_v1  ;;  %v1045_v3 = vmul.f32 1.442695, %v1040_v2  ;;  %v1038_v5 = vpop.xlane.xlu2 %1037 }
 0x244   : > { %v1042_v22 = vsub.f32 %v1026_v51, %v1038_v5 }
 0x245   : > { %1637 = vpow2.f32 %v1045_v3 }
 0x246   : > { %v2087_v6 = vpop.eup %1633  ;;  %v1049_v23 = vmul.f32 1.442695, %v1042_v22 }
 0x247   : > { %v1057_v39 = vsel %vm942_vm2, %v2087_v6, 0.0 }
 0x248   : > { %1058 = vadd.xlane.f32.xlu2 %v1057_v39  ;;  %1639 = vpow2.f32 %v1049_v23 }
 0x249   : > { %v2091_v7 = vpop.eup %1635 }
 0x24a   : > { %v1051_v8 = vsel %vm942_vm2, %v2091_v7, 0.0 }
 0x24b   : > { %v2095_v9 = vpop.eup %1637  ;;  %1052 = vadd.xlane.f32.xlu1 %v1051_v8  ;;  %v825_v12 = vpop.permute.xlu2 %824 }
 0x24c   : > { %v1054_v10 = vsel %vm942_vm2, %v2095_v9, 0.0  ;;  %v837_v16 = vshrl.u32 %v825_v12, 16 }
 0x24d   : > { %1055 = vadd.xlane.f32.xlu0 %v1054_v10 }
 0x24e   : > { %v2099_v11 = vpop.eup %1639 }
 0x24f   : > { %v1060_v15 = vsel %vm942_vm2, %v2099_v11, 0.0 }
 0x251   : > { %v827_v13 = vpop.permute.xlu0 %826 }
 0x252   : > { %v838_v14 = vshrl.u32 %v827_v13, 16  ;;  %v836_v17 = vpack.i.b16 %v827_v13, %v825_v12 }
 0x253   : > { %1061 = vadd.xlane.f32.xlu1 %v1060_v15 }
 0x254   : > { %v839_v18 = vpack.i.b16 %v838_v14, %v837_v16  ;;  %v849_v19 = vperm.slane %v836_v17, %v1993_v24 }
 0x256   : > { %v875_v25 = vperm.slane %v839_v18, %v1993_v24  ;;  %v850_v28 = vrot.slane %v849_v19, 4 }
 0x258   : > { %v823_v20 = vpop.permute.xlu1 %822  ;;  %v876_v31 = vrot.slane %v875_v25, 4 }
 0x259   : > { %v830_v26 = vpack.i.b16 %v823_v20, %v821_v58  ;;  %v832_v27 = vshrl.u32 %v823_v20, 16 }
 0x25b   : > { %v833_v29 = vpack.i.b16 %v832_v27, %v831_v21  ;;  %v844_v30 = vperm.slane %v830_v26, %v1993_v24 }
 0x25d   : > { %v851_v32 = vsel %vm606_vm1, %v850_v28, %v844_v30  ;;  %v852_v33 = vrot.slane %v844_v30, 4  ;;  %v870_v34 = vperm.slane %v833_v29, %v1993_v24 }
 0x25e   : > { %v857_v35 = vperm.slane %v851_v32, %v2007_v49 }
 0x25f   : > { %v853_v36 = vsel %vm606_vm1, %v849_v19, %v852_v33  ;;  %v877_v37 = vsel %vm606_vm1, %v876_v31, %v870_v34  ;;  %v878_v38 = vrot.slane %v870_v34, 4 }
 0x260   : > { %v861_v40 = vperm.slane %v853_v36, %v2007_v49  ;;  %v883_v41 = vperm.slane %v877_v37, %v2007_v49  ;;  %v862_v43 = vrot.slane %v857_v35, 4 }
 0x261   : > { %v879_v42 = vsel %vm606_vm1, %v875_v25, %v878_v38 }
 0x262   : > { %v864_v44 = vrot.slane %v861_v40, 4  ;;  %v887_v45 = vperm.slane %v879_v42, %v2007_v49  ;;  %v888_v47 = vrot.slane %v883_v41, 4  ;;  %v863_v51 = vsel %vm606_vm1, 0, %v862_v43 }
 0x264   : > { %v865_v46 = vsel %vm606_vm1, 0, %v864_v44  ;;  %v890_v48 = vrot.slane %v887_v45, 4  ;;  %v892_v54 = vsel %vm606_vm1, %v864_v44, %v857_v35  ;;  %v889_v56 = vsel %vm606_vm1, 0, %v888_v47 }
 0x265   : > { %v897_v50 = vrot.slane %v865_v46, 4  ;;  %v896_v60 = vperm.slane %v892_v54, %v1993_v24 }
 0x266   : > { %v891_v52 = vsel %vm606_vm1, 0, %v890_v48  ;;  %v911_v58 = vsel %vm606_vm1, %v890_v48, %v883_v41 }
 0x267   : > { %v916_v53 = vrot.slane %v891_v52, 4  ;;  %v898_v55 = vsel %vm606_vm1, %v897_v50, %v863_v51  ;;  %v915_v0 = vperm.slane %v911_v58, %v1993_v24 }
 0x268   : > { %v902_v57 = vperm.slane %v898_v55, %v1993_v24 }
 0x269   : > { %v917_v59 = vsel %vm606_vm1, %v916_v53, %v889_v56 }
 0x26a   : > { %v903_v61 = vrot.slane %v902_v57, 4  ;;  %v921_v62 = vperm.slane %v917_v59, %v1993_v24 }
 0x26c   : > { %v904_v63 = vsel %vm606_vm1, %v903_v61, %v896_v60  ;;  %v922_v1 = vrot.slane %v921_v62, 4 }
 0x26d   : > { %v908_v2 = vperm.slane %v904_v63, %v2007_v49 }
 0x26e   : > { %v923_v3 = vsel %vm606_vm1, %v922_v1, %v915_v0 }
 0x26f   : > { %v927_v5 = vperm.slane %v923_v3, %v2007_v49  ;;  %v909_v22 = vrot.slane %v908_v2, 4  ;;  %v933_v23 = vshrl.u32 %v908_v2, 16 }
 0x271   : > { %v932_v39 = vpack.i.b16 %v927_v5, %v908_v2  ;;  %v934_v8 = vshrl.u32 %v927_v5, 16  ;;  %v910_v10 = vsel %vm606_vm1, 0, %v909_v22  ;;  %v928_v12 = vrot.slane %v927_v5, 4 }
 0x272   : > { %v939_v17 = vshrl.u32 %v910_v10, 16 }
 0x273   : > { %v1080_v13 = vsel %vm1078_vm5, %v932_v39, 0  ;;  %v935_v14 = vpack.i.b16 %v934_v8, %v933_v23  ;;  %v929_v15 = vsel %vm606_vm1, 0, %v928_v12 }
 0x274   : > { %1089 = vmatpush.bf16.msrb.mxu2 %v1080_v13  ;;  %v938_v16 = vpack.i.b16 %v929_v15, %v910_v10  ;;  %v940_v18 = vshrl.u32 %v929_v15, 16 }
 0x275   : > { %v1099_v19 = vsel %vm1078_vm5, %v935_v14, 0 }
 0x276   : > { %1108 = vmatpush.bf16.msrb.mxu3 %v1099_v19  ;;  %v1118_v20 = vsel %vm1078_vm5, %v938_v16, 0  ;;  %v941_v21 = vpack.i.b16 %v940_v18, %v939_v17 }
 0x277   : > { %1127 = vmatpush.bf16.msra.mxu0 %v1118_v20 }
 0x278   : > { %v1137_v25 = vsel %vm1078_vm5, %v941_v21, 0 }
 0x279   : > { %1146 = vmatpush.bf16.msra.mxu1 %v1137_v25 }
 0x2bb   : > { %v1059_v26 = vpop.xlane.xlu2 %1058 }
 0x2bc   : > { %1641 = vrcp.f32 %v1059_v26 }
 0x2be   : > { %v1053_v27 = vpop.xlane.xlu1 %1052 }
 0x2bf   : > { %1643 = vrcp.f32 %v1053_v27 }
 0x2c0   : > { %v1056_v28 = vpop.xlane.xlu0 %1055 }
 0x2c1   : > { %1645 = vrcp.f32 %v1056_v28 }
 0x2c2   : > { %v1642_v29 = vpop.eup %1641 }
 0x2c3   : > { %v1069_v30 = vmul.f32 %v1642_v29, %v2087_v6 }
 0x2c5   : > { %v1644_v31 = vpop.eup %1643  ;;  %v1073_v32 = vpack.c.bf16 %v1069_v30, %v1069_v30 }
 0x2c6   : > { %v1067_v33 = vmul.f32 %v1644_v31, %v2091_v7  ;;  %v1062_v34 = vpop.xlane.xlu1 %1061 }
 0x2c7   : > { %v1646_v35 = vpop.eup %1645  ;;  %1647 = vrcp.f32 %v1062_v34  ;;  %1537 = vmatmul.msk.bf16.vlgmr.msra.gmra.mxu0 %vm942_vm2, %v1073_v32 }
 0x2c8   : > { %v1068_v36 = vmul.f32 %v1646_v35, %v2095_v9  ;;  %v1071_v37 = vpack.c.bf16 %v1067_v33, %v1067_v33 }
 0x2ca   : > { %1535 = vmatmul.msk.bf16.vlgmr.msrb.gmra.mxu2 %vm942_vm2, %v1071_v37  ;;  %v1072_v38 = vpack.c.bf16 %v1068_v36, %v1068_v36 }
 0x2cc   : > { %1536 = vmatmul.msk.bf16.vlgmr.msrb.gmra.mxu3 %vm942_vm2, %v1072_v38 }
 0x2cd   : > { %v1648_v40 = vpop.eup %1647 }
 0x2ce   : > { %v1070_v6 = vmul.f32 %v1648_v40, %v2099_v11 }
 0x2d0   : > { %v1074_v41 = vpack.c.bf16 %v1070_v6, %v1070_v6 }
 0x2d2   : > { %1538 = vmatmul.msk.bf16.vlgmr.msra.gmra.mxu1 %vm942_vm2, %v1074_v41 }
 0x344   : > { %v1129_v7 = vpop.f32.mrf.mxu0 }
 0x345   : > { %v1152_v42 = vrot.slane %v1129_v7, 4 }
 0x34c   : > { %v1131_v43 = vpop.f32.mrf.mxu0 }
 0x34d   : > { %v1091_v44 = vpop.f32.mrf.mxu2 }
 0x34e   : > { %v1154_v45 = vsel %vm606_vm1, %v1152_v42, %v1091_v44  ;;  %v1155_v46 = vrot.slane %v1091_v44, 4 }
 0x34f   : > { %v1160_v9 = vperm.slane %v1154_v45, %v1993_v24  ;;  %v1110_v47 = vpop.f32.mrf.mxu3  ;;  %v1148_v48 = vpop.f32.mrf.mxu1 }
 0x350   : > { %v1156_v50 = vsel %vm606_vm1, %v1129_v7, %v1155_v46  ;;  %v1167_v51 = vrot.slane %v1110_v47, 4  ;;  %v1165_v52 = vrot.slane %v1148_v48, 4 }
 0x351   : > { %v1164_v11 = vperm.slane %v1156_v50, %v1993_v24  ;;  %v1179_v55 = vrot.slane %v1160_v9, 4  ;;  %v1554_v50 = vld [vmem:[#allocation7] sm:$0xff] }
 0x352   : > { %v1166_v53 = vsel %vm606_vm1, %v1165_v52, %v1110_v47  ;;  %v1168_v54 = vsel %vm606_vm1, %v1148_v48, %v1167_v51  ;;  %v1555_v48 = vld [vmem:[#allocation7 + $0x8] sm:$0xff] }
 0x353   : > { %v1191_v56 = vrot.slane %v1164_v11, 4  ;;  %v1172_v57 = vperm.slane %v1166_v53, %v1993_v24  ;;  %v1176_v58 = vperm.slane %v1168_v54, %v1993_v24  ;;  %1302 = vmatpush.bf16.msra.mxu2 %v1555_v48 }
 0x355   : > { %v1177_v59 = vrot.slane %v1172_v57, 4  ;;  %v1180_v60 = vsel %vm606_vm1, %v1172_v57, %v1179_v55  ;;  %v1189_v61 = vrot.slane %v1176_v58, 4  ;;  %v1192_v62 = vsel %vm606_vm1, %v1176_v58, %v1191_v56  ;;  %v1093_v63 = vpop.f32.mrf.mxu2  ;;  %v1630_v56 = vld [vmem:[#allocation9] ss:$0 sm:$0xff] }
 0x356   : > { %v1188_v0 = vperm.slane %v1180_v60, %v2007_v49  ;;  %v1200_v1 = vperm.slane %v1192_v62, %v2007_v49  ;;  %v1842_v62 = vmov 32.0  }
 0x357   : > { %v1178_v2 = vsel %vm606_vm1, %v1177_v59, %v1160_v9  ;;  %v1190_v3 = vsel %vm606_vm1, %v1189_v61, %v1164_v11  ;;  %v1112_v5 = vpop.f32.mrf.mxu3  ;;  %v1150_v22 = vpop.f32.mrf.mxu1  ;;  %1303 = vmatpush.bf16.msra.mxu2 %v1554_v50  ;;  %1649 = vrcp.f32 %v1842_v62 }
 0x358   : > { %v1184_v23 = vperm.slane %v1178_v2, %v2007_v49  ;;  %v1196_v39 = vperm.slane %v1190_v3, %v2007_v49  ;;  %v1203_v8 = vrot.slane %v1188_v0, 4  ;;  %v1207_v10 = vrot.slane %v1200_v1, 4 }
 0x35a   : > { %v1201_v12 = vrot.slane %v1184_v23, 4  ;;  %v1204_v13 = vsel %vm606_vm1, 0.0, %v1203_v8  ;;  %v1205_v14 = vrot.slane %v1196_v39, 4  ;;  %v1208_v15 = vsel %vm606_vm1, 0.0, %v1207_v10 }
 0x35b   : > { %v1214_v16 = vrot.slane %v1204_v13, 4  ;;  %v1220_v17 = vsel %vm606_vm1, %v1207_v10, %v1196_v39  ;;  %v1225_v18 = vrot.slane %v1208_v15, 4  ;;  %v1209_v19 = vsel %vm606_vm1, %v1203_v8, %v1184_v23 }
 0x35c   : > { %v1206_v20 = vsel %vm606_vm1, 0.0, %v1205_v14  ;;  %v1202_v21 = vsel %vm606_vm1, 0.0, %v1201_v12  ;;  %v1213_v25 = vperm.slane %v1209_v19, %v1993_v24  ;;  %v1224_v26 = vperm.slane %v1220_v17, %v1993_v24 }
 0x35d   : > { %v1215_v27 = vsel %vm606_vm1, %v1214_v16, %v1202_v21  ;;  %v1226_v28 = vsel %vm606_vm1, %v1225_v18, %v1206_v20  ;;  %v1650_v63 = vpop.eup %1649 }
 0x35e   : > { %v1219_v29 = vperm.slane %v1215_v27, %v1993_v24  ;;  %v1230_v30 = vperm.slane %v1226_v28, %v1993_v24  ;;  %v1233_v31 = vrot.slane %v1213_v25, 4  ;;  %v1245_v32 = vrot.slane %v1224_v26, 4 }
 0x35f   : > { %v1321_v0 = vmul.f32 32.0, %v1650_v63  ;;  %vm1325_vm8 = vweird.f32 %v1650_v63 }
 0x360   : > { %v1234_v33 = vsel %vm606_vm1, %v1219_v29, %v1233_v31  ;;  %v1246_v34 = vsel %vm606_vm1, %v1230_v30, %v1245_v32  ;;  %v1231_v35 = vrot.slane %v1219_v29, 4  ;;  %v1243_v36 = vrot.slane %v1230_v30, 4 }
 0x361   : > { %v1242_v37 = vperm.slane %v1234_v33, %v2007_v49  ;;  %v1254_v38 = vperm.slane %v1246_v34, %v2007_v49  ;;  %v1322_v1 = vsub.f32 1.0, %v1321_v0 }
 0x362   : > { %v1232_v40 = vsel %vm606_vm1, %v1231_v35, %v1213_v25  ;;  %v1244_v6 = vsel %vm606_vm1, %v1243_v36, %v1224_v26  ;;  %v1631_v35 = vld [vmem:[%s2214_s9] ss:$0 sm:$0xff] }
 0x363   : > { %v1261_v41 = vrot.slane %v1242_v37, 4  ;;  %v1259_v7 = vrot.slane %v1254_v38, 4  ;;  %v1238_v24 = vperm.slane %v1232_v40, %v2007_v49  ;;  %v1250_v42 = vperm.slane %v1244_v6, %v2007_v49 }
 0x364   : > { %v1323_v2 = vmul.f32 %v1650_v63, %v1322_v1 }
 0x365   : > { %v1262_v43 = vsel %vm606_vm1, %v1254_v38, %v1261_v41  ;;  %v1260_v44 = vsel %vm606_vm1, %v1259_v7, %v1242_v37  ;;  %v1255_v45 = vrot.slane %v1250_v42, 4  ;;  %v1257_v46 = vrot.slane %v1238_v24, 4  ;;  %v1632_v38 = vld [vmem:[%s2215_s10] ss:$0 sm:$0xff] }
 0x366   : > { %1272 = vrot.lane.b32.xlu1 %v1262_v43, %s1839_s27  ;;  %1268 = vrot.lane.b32.xlu2 %v1260_v44, %s1840_s22  ;;  %v1324_v3 = vadd.f32 %v1650_v63, %v1323_v2 }
 0x367   : > { %v1258_v9 = vsel %vm606_vm1, %v1250_v42, %v1257_v46  ;;  %v1256_v47 = vsel %vm606_vm1, %v1255_v45, %v1238_v24 }
 0x368   : > { %1264 = vrot.lane.b32.xlu0 %v1258_v9, %s1841_s28  ;;  %v1326_v5 = vsel %vm1325_vm8, %v1650_v63, %v1324_v3 }
 0x3c0   : > { %v1269_v51 = vpop.permute.xlu2 %1268 }
 0x3d8   : > { %v1273_v11 = vpop.permute.xlu1 %1272 }
 0x3da   : > { %v1265_v49 = vpop.permute.xlu0 %1264 }
 0x3db   : > { %v1275_v52 = vsel %vm942_vm2, %v1256_v47, %v1265_v49 }
 0x3dc   : > { %v1277_v53 = vsel %vm1276_vm6, %v1275_v52, %v1269_v51 }
 0x3dd   : > { %v1279_v54 = vsel %vm1278_vm7, %v1277_v53, %v1273_v11 }
 0x3de   : > { %v1280_v55 = vpack.c.bf16 %v1279_v54, %v1279_v54 }
 0x3e0   : > { %1547 = vmatmul.msk.bf16.vlgmr.msra.gmra.mxu2 %vm515_vm0, %v1280_v55 }
 0x463   : > { %v1305_v57 = vpop.f32.mrf.mxu2 }
 0x464   : > { %v1309_v58 = vadd.f32 %v1305_v57, %v1976_v4 }
 0x466   : > { %v1314_v59 = vadd.f32 %v1630_v56, %v1309_v58 }
 0x468   : > { %v1317_v60 = vsel %vm515_vm0, %v1314_v59, 0.0 }
 0x469   : > { %1318 = vadd.xlane.f32.xlu0 %v1317_v60 }
 0x46b   : > { %v1307_v61 = vpop.f32.mrf.mxu2 }
 0x4dc   : > { %v1319_v22 = vpop.xlane.xlu0 %1318 }
 0x4dd   : > { %v1327_v23 = vmul.f32 %v1326_v5, %v1319_v22 }
 0x4df   : > { %v1328_v39 = vsub.f32 %v1314_v59, %v1327_v23 }
 0x4e1   : > { %v1329_v8 = vmul.f32 %v1328_v39, %v1328_v39 }
 0x4e3   : > { %v1330_v4 = vsel %vm515_vm0, %v1329_v8, 0.0 }
 0x4e4   : > { %1331 = vadd.xlane.f32.xlu2 %v1330_v4 }
 0x557   : > { %v1332_v10 = vpop.xlane.xlu2 %1331 }
 0x558   : > { %v1333_v12 = vmul.f32 0.032258064, %v1332_v10 }
 0x55a   : > { %1651 = vrsqrt.f32 %v1333_v12  ;;  %vm1341_vm9 = vcmp.eq.f32.partialorder %v1333_v12, inf  ;;  %v1344_v20 = vand.u32 2147483648, %v1333_v12  ;;  %vm1343_vm10 = vcmp.eq.f32.partialorder %v1333_v12, 0.0 }
 0x560   : > { %v1652_v13 = vpop.eup %1651 }
 0x561   : > { %v1335_v14 = vmul.f32 %v1652_v13, %v1333_v12 }
 0x563   : > { %v1336_v15 = vmul.f32 %v1652_v13, %v1335_v14 }
 0x565   : > { %v1337_v16 = vmul.f32 0.5, %v1336_v15 }
 0x567   : > { %v1338_v17 = vsub.f32 1.5, %v1337_v16 }
 0x569   : > { %v1339_v18 = vmul.f32 %v1652_v13, %v1338_v17 }
 0x56b   : > { %v1340_v19 = vmul.f32 %v1339_v18, %v1333_v12 }
 0x56d   : > { %v1342_v21 = vsel %vm1341_vm9, %v1333_v12, %v1340_v19 }
 0x56e   : > { %v1345_v25 = vsel %vm1343_vm10, %v1344_v20, %v1342_v21 }
 0x56f   : > { %v1346_v26 = vadd.f32 1e-12, %v1345_v25 }
 0x571   : > { %1653 = vrcp.f32 %v1346_v26  ;;  %v1358_v30 = vand.u32 2147483648, %v1346_v26  ;;  %v1356_v32 = vand.u32 2147483647, %v1346_v26  ;;  %vm1352_vm12 = vweird.f32 %v1346_v26 }
 0x573   : > { %v1359_v34 = vor.u32 1.1754944e-38, %v1358_v30  ;;  %vm1357_vm14 = vcmp.eq.f32.partialorder %v1356_v32, 8.507059e+37 }
 0x577   : > { %v1654_v27 = vpop.eup %1653 }
 0x578   : > { %v1348_v28 = vmul.f32 %v1654_v27, %v1346_v26  ;;  %vm1353_vm11 = vweird.f32 %v1654_v27 }
 0x579   : > { %vm1354_vm13 = vmor %vm1352_vm12, %vm1353_vm11 }
 0x57a   : > { %v1349_v29 = vsub.f32 1.0, %v1348_v28 }
 0x57c   : > { %v1350_v31 = vmul.f32 %v1654_v27, %v1349_v29 }
 0x57e   : > { %v1351_v33 = vadd.f32 %v1654_v27, %v1350_v31 }
 0x580   : > { %v1355_v36 = vsel %vm1354_vm13, %v1654_v27, %v1351_v33 }
 0x581   : > { %v1360_v37 = vsel %vm1357_vm14, %v1359_v34, %v1355_v36 }
 0x582   : > { %v1361_v40 = vmul.f32 %v1360_v37, %v1328_v39 }
 0x584   : > { %v1365_v6 = vmul.f32 %v1631_v35, %v1361_v40 }
 0x586   : > { %v1369_v41 = vadd.f32 %v1632_v38, %v1365_v6 }
 0x588   : > { %1370 = vst.msk [vmem:[%s491_s23] sm:$0xff] %vm515_vm0, %v1369_v41 }
 0x589 PF: > { %s24_s17 = sadd.s32 1, %s1823_s17  }
 0x58a   : > { %p21_p7 = scmp.ge.s32.totalorder %s24_s17, 4  }
 0x58c   :  { %23 = sbr.rel (!%p21_p7) target bundleno = 5 (0x5), region = 121 }
 0x591   :  { %1390 = vsyncpa [#allocation3], 1 }
 0x592   :  { %1392 = vsyncpa [#allocation3 + $0x1], 1 }
 0x593   :  { %1393 = vsyncpa [#allocation5], 1 }
 0x594   :  { %1394 = vsyncpa [#allocation8], 1 }

// kernel: decoder_forward.15
= control target key start
LH: loop header
LB: loop body
LE: loop exit
PB: predicated region body
PF: predicated region fallthrough
CT: control target
= control target key end

     0   :  { %s1006_s15 = smov 0   ;;  %s1137_s0 = inlined_call_operand.vmem [shape: f32[2,8,32], index: 0, kind: input, shape index: {}]   ;;  %s1138_s1 = inlined_call_operand.vmem [shape: f32[2,8,1], index: 1, kind: input, shape index: {}]   ;;  %s1139_s2 = inlined_call_operand.vmem [shape: bf16[32,256], index: 2, kind: input, shape index: {}]   ;;  %s1140_s3 = inlined_call_operand.vmem [shape: f32[1,256], index: 3, kind: input, shape index: {}]   ;;  %s1141_s4 = inlined_call_operand.vmem [shape: bf16[256,64], index: 4, kind: input, shape index: {}]   ;;  %s1142_s5 = inlined_call_operand.vmem [shape: f32[1,64], index: 5, kind: input, shape index: {}]   ;;  %s1143_s6 = inlined_call_operand.vmem [shape: bf16[64,32], index: 6, kind: input, shape index: {}]   ;;  %s1144_s7 = inlined_call_operand.vmem [shape: f32[1,32], index: 7, kind: input, shape index: {}]   ;;  %s1145_s8 = inlined_call_operand.vmem [shape: bf16[32,1], index: 8, kind: input, shape index: {}]   ;;  %s1146_s9 = inlined_call_operand.<no memory space> [shape: f32[1,1], index: 9, kind: input, shape index: {}]   ;;  %s1147_s10 = inlined_call_operand.vmem [shape: f32[2,1,1], index: 10, kind: output, shape index: {}]  }
   0x1   :  { %v15_v0 = vstv %s1146_s9 }
   0x2   :  { %16 = vst [vmem:[#allocation2] sm:$0x1] %v15_v0 }
   0x3 LB: > { %s784_s16 = sadd.s32 4294967295, %s945_s15   ;;  %p788_p0 = scmp.ge.s32.totalorder %s945_s15, 1  ;;  %s945_s15 = sphi %s1006_s15, %s22_s15  }
   0x4   : > { %p322_p1 = scmp.lt.s32.totalorder %s945_s15, 3 }
   0x6   : > { %p323_p2 = pnand %p788_p0, %p322_p1 }
   0x7   : > { %p361_p3 = scmp.lt.s32.totalorder (!%p323_p2), %s784_s16, 1 }
   0x8   : > { %326 = sbr.rel (%p323_p2) target bundleno = 710 (0x2c6), region = 60 }
   0xd   : > { %v947_v1 = vmov 0   ;;  %s1149_s16 = smov (!%p361_p3, %s784_s16), 1  ;;  %vm389_vm0 = vcmask 7168   ;;  %v801_v10 = vld [vmem:[%s1139_s2 + $0x10] sm:$0xf]  ;;  %v912_v22 = vld [vmem:[%s1141_s4 + $0x38] sm:$0xff] }
   0xe   : > { %936 = vset.pattern.permute.xlu0 %v947_v1  ;;  %s789_s9 = sshll.u32 %s1149_s16, 3  ;;  %v904_v11 = vld [vmem:[%s1139_s2 + $0x14] sm:$0xf0]  ;;  %v903_v12 = vld [vmem:[%s1139_s2 + $0x14] sm:$0xf]  ;;  %610 = vmatpush.bf16.msra.mxu2 %v912_v22  ;;  %v910_v27 = vld [vmem:[%s1141_s4 + $0x28] sm:$0xff]  ;;  %s371_s17 = scalar_lea.vmem %s1147_s10, %s1149_s16 }
   0xf   : > { %s368_s19 = scalar_lea.vmem %s1138_s1, %s789_s9  ;;  %v802_v13 = vor.u32 %v904_v11, %v801_v10  ;;  %v803_v14 = vld [vmem:[%s1139_s2 + $0x18] sm:$0xf0]  ;;  %v793_v16 = vld [vmem:[%s1139_s2] sm:$0xf]  ;;  %v902_v17 = vld [vmem:[%s1139_s2 + $0x4] sm:$0xf0]  ;;  %s364_s12 = scalar_lea.vmem %s1137_s0, %s789_s9 }
  0x10   : > { %v374_v2 = vld [vmem:[%s368_s19] sm:$0xff]  ;;  %v806_v15 = vor.u32 %v903_v12, %v803_v14  ;;  %v794_v19 = vor.u32 %v902_v17, %v793_v16  ;;  %v795_v20 = vld [vmem:[%s1139_s2 + $0x8] sm:$0xf0]  ;;  %v920_v23 = vld [vmem:[%s1141_s4 + $0x78] sm:$0xff]  ;;  %vm381_vm1 = vcmask 261120   ;;  %vm671_vm6 = vcmask 523264  }
  0x11   : > { %v390_v3 = vsel %vm389_vm0, %v374_v2, 0.0  ;;  %v901_v18 = vld [vmem:[%s1139_s2 + $0x4] sm:$0xf]  ;;  %457 = vmatpush.bf16.msra.mxu0 %v802_v13  ;;  %623 = vmatpush.bf16.msra.mxu3 %v920_v23  ;;  %v911_v24 = vld [vmem:[%s1141_s4 + $0x30] sm:$0xff]  ;;  %v918_v28 = vld [vmem:[%s1141_s4 + $0x68] sm:$0xff]  ;;  %vm723_vm7 = vcmask 0  }
  0x12   : > { %v391_v4 = vrot.slane %v390_v3, 4  ;;  %470 = vmatpush.bf16.msra.mxu1 %v806_v15  ;;  %v798_v21 = vor.u32 %v901_v18, %v795_v20  ;;  %v919_v25 = vld [vmem:[%s1141_s4 + $0x70] sm:$0xff]  ;;  %611 = vmatpush.bf16.msra.mxu2 %v911_v24  ;;  %v373_v29 = vld [vmem:[%s364_s12] sm:$0xff]  ;;  %v908_v37 = vld [vmem:[%s1141_s4 + $0x18] sm:$0xff] }
  0x13   : > { %v909_v30 = vld [vmem:[%s1141_s4 + $0x20] sm:$0xff]  ;;  %v916_v38 = vld [vmem:[%s1141_s4 + $0x58] sm:$0xff]  ;;  %v907_v43 = vld [vmem:[%s1141_s4 + $0x10] sm:$0xff] }
  0x14   : > { %v392_v5 = vadd.f32 %v391_v4, %v390_v3  ;;  %v917_v31 = vld [vmem:[%s1141_s4 + $0x60] sm:$0xff]  ;;  %v915_v44 = vld [vmem:[%s1141_s4 + $0x50] sm:$0xff]  ;;  %v906_v57 = vld [vmem:[%s1141_s4 + $0x8] sm:$0xff] }
  0x15   : > { %458 = vmatpush.bf16.msra.mxu0 %v794_v19  ;;  %624 = vmatpush.bf16.msra.mxu3 %v919_v25  ;;  %v914_v58 = vld [vmem:[%s1141_s4 + $0x48] sm:$0xff]  ;;  %v905_v59 = vld [vmem:[%s1141_s4] sm:$0xff]  ;;  %v924_v61 = vld [vmem:[%s1143_s6 + $0x18] sm:$0xff] }
  0x16   : > { %v393_v6 = vrot.slane %v392_v5, 2  ;;  %471 = vmatpush.bf16.msra.mxu1 %v798_v21  ;;  %612 = vmatpush.bf16.msra.mxu2 %v910_v27  ;;  %v913_v60 = vld [vmem:[%s1141_s4 + $0x40] sm:$0xff]  ;;  %v923_v62 = vld [vmem:[%s1143_s6 + $0x10] sm:$0xff]  ;;  %v922_v12 = vld [vmem:[%s1143_s6 + $0x8] sm:$0xff] }
  0x17   : > { %v422_v63 = vld [vmem:[%s1140_s3] sm:$0x3]  ;;  %v926_v14 = vld [vmem:[%s1145_s8 + $0x8] sm:$0xff] }
  0x18   : > { %v394_v7 = vadd.f32 %v393_v6, %v392_v5  ;;  %v444_v0 = vperm.slane %v422_v63, 0  ;;  %v445_v1 = vperm.slane %v422_v63, 1  ;;  %v921_v13 = vld [vmem:[%s1143_s6] sm:$0xff] }
  0x19   : > { %625 = vmatpush.bf16.msra.mxu3 %v918_v28  ;;  %679 = vmatpush.bf16.msrb.mxu0 %v924_v61  ;;  %v925_v15 = vld [vmem:[%s1145_s8] sm:$0xff] }
  0x1a   : > { %v395_v8 = vrot.slane %v394_v7, 1  ;;  %613 = vmatpush.bf16.msra.mxu2 %v909_v30  ;;  %716 = vmatpush.bf16.msrb.mxu1 %v926_v14  ;;  %v513_v16 = vld [vmem:[%s1142_s5] sm:$0x1] }
  0x1b   : > { %v646_v25 = vld [vmem:[%s1144_s7] sm:$0x1] }
  0x1c   : > { %v396_v9 = vadd.f32 %v395_v8, %v394_v7 }
  0x1d   : > { %626 = vmatpush.bf16.msra.mxu3 %v917_v31  ;;  %680 = vmatpush.bf16.msrb.mxu0 %v923_v62  ;;  %v694_v31 = vld [vmem:[#allocation2] sm:$0x1] }
  0x1e   : > { %399 = vperm.xlu0 %936, %v396_v9   ;;  %614 = vmatpush.bf16.msra.mxu2 %v908_v37 }
  0x1f   : > { %717 = vmatpush.bf16.msrb.mxu1 %v925_v15 }
  0x21   : > { %627 = vmatpush.bf16.msra.mxu3 %v916_v38  ;;  %681 = vmatpush.bf16.msrb.mxu0 %v922_v12 }
  0x22   : > { %615 = vmatpush.bf16.msra.mxu2 %v907_v43 }
  0x25   : > { %628 = vmatpush.bf16.msra.mxu3 %v915_v44  ;;  %682 = vmatpush.bf16.msrb.mxu0 %v921_v13 }
  0x26   : > { %377 = vperm.xlu0 %936, %v374_v2   ;;  %616 = vmatpush.bf16.msra.mxu2 %v906_v57 }
  0x29   : > { %629 = vmatpush.bf16.msra.mxu3 %v914_v58 }
  0x2a   : > { %617 = vmatpush.bf16.msra.mxu2 %v905_v59 }
  0x2d   : > { %630 = vmatpush.bf16.msra.mxu3 %v913_v60 }
  0x90   : > { %v400_v26 = vpop.permute.xlu0 %399 }
  0x91   : > { %937 = vrcp.f32 %v400_v26  ;;  %v413_v47 = vand.u32 2147483648, %v400_v26  ;;  %vm407_vm3 = vweird.f32 %v400_v26  ;;  %v411_v49 = vand.u32 2147483647, %v400_v26 }
  0x93   : > { %v414_v52 = vor.u32 1.1754944e-38, %v413_v47  ;;  %vm412_vm5 = vcmp.eq.f32.partialorder %v411_v49, 8.507059e+37 }
  0x97   : > { %v938_v32 = vpop.eup %937 }
  0x98   : > { %v403_v33 = vmul.f32 %v938_v32, %v400_v26  ;;  %v378_v34 = vpop.permute.xlu0 %377  ;;  %vm408_vm2 = vweird.f32 %v938_v32 }
  0x99   : > { %v380_v35 = vmul.f32 %v378_v34, %v373_v29  ;;  %vm409_vm4 = vmor %vm407_vm3, %vm408_vm2 }
  0x9a   : > { %v404_v36 = vsub.f32 1.0, %v403_v33 }
  0x9b   : > { %v382_v39 = vsel %vm381_vm1, %v380_v35, 0.0 }
  0x9c   : > { %v405_v40 = vmul.f32 %v938_v32, %v404_v36  ;;  %v383_v41 = vrot.slane %v382_v39, 4 }
  0x9e   : > { %v384_v42 = vadd.f32 %v383_v41, %v382_v39  ;;  %v406_v46 = vadd.f32 %v938_v32, %v405_v40 }
  0xa0   : > { %v385_v45 = vrot.slane %v384_v42, 2  ;;  %v410_v51 = vsel %vm409_vm4, %v938_v32, %v406_v46 }
  0xa1   : > { %v415_v54 = vsel %vm412_vm5, %v414_v52, %v410_v51 }
  0xa2   : > { %v386_v48 = vadd.f32 %v385_v45, %v384_v42 }
  0xa4   : > { %v387_v50 = vrot.slane %v386_v48, 1 }
  0xa6   : > { %v388_v53 = vadd.f32 %v387_v50, %v386_v48 }
  0xa8   : > { %v416_v55 = vmul.f32 %v415_v54, %v388_v53 }
  0xaa   : > { %v417_v56 = vpack.c.bf16 %v416_v55, %v416_v55 }
  0xac   : > { %807 = vmatmul.msk.bf16.vlgmr.msra.gmra.mxu0 %vm381_vm1, %v417_v56  ;;  %808 = vmatmul.msk.bf16.vlgmr.msra.gmra.mxu1 %vm381_vm1, %v417_v56 }
 0x129   : > { %v460_v2 = vpop.f32.mrf.mxu0  ;;  %v473_v3 = vpop.f32.mrf.mxu1 }
 0x12a   : > { %v461_v4 = vadd.f32 %v460_v2, %v444_v0  ;;  %v474_v5 = vadd.f32 %v473_v3, %v445_v1 }
 0x12c   : > { %v477_v6 = vmax.f32 %v461_v4, 0.0  ;;  %v478_v7 = vmax.f32 %v474_v5, 0.0 }
 0x12e   : > { %v479_v8 = vpack.c.bf16 %v477_v6, %v477_v6  ;;  %v480_v9 = vpack.c.bf16 %v478_v7, %v478_v7 }
 0x130   : > { %618 = vmatmul.bf16.vlgmr.msra.gmra.mxu2 %v479_v8  ;;  %631 = vmatmul.bf16.vlgmr.msra.gmra.mxu3 %v480_v9 }
 0x131   : > { %v462_v10 = vpop.f32.mrf.mxu0  ;;  %v475_v11 = vpop.f32.mrf.mxu1 }
 0x1b3   : > { %v619_v17 = vpop.f32.mrf.mxu2  ;;  %v632_v18 = vpop.f32.mrf.mxu3 }
 0x1b4   : > { %v620_v19 = vadd.f32 %v619_v17, %v513_v16 }
 0x1b6   : > { %v633_v20 = vadd.f32 %v632_v18, %v620_v19 }
 0x1b8   : > { %v636_v21 = vmax.f32 %v633_v20, 0.0 }
 0x1ba   : > { %v637_v22 = vpack.c.bf16 %v636_v21, %v636_v21 }
 0x1bb   : > { %v621_v23 = vpop.f32.mrf.mxu2  ;;  %v634_v24 = vpop.f32.mrf.mxu3 }
 0x1bc   : > { %889 = vmatmul.msk.bf16.vlgmr.msrb.gmra.mxu0 %vm671_vm6, %v637_v22 }
 0x239   : > { %v684_v26 = vpop.f32.mrf.mxu0 }
 0x23a   : > { %v685_v27 = vadd.f32 %v684_v26, %v646_v25 }
 0x23c   : > { %v688_v28 = vmax.f32 %v685_v27, 0.0 }
 0x23e   : > { %v689_v29 = vpack.c.bf16 %v688_v28, %v688_v28 }
 0x240   : > { %898 = vmatmul.msk.bf16.vlgmr.msrb.gmra.mxu1 %vm381_vm1, %v689_v29 }
 0x241   : > { %v686_v30 = vpop.f32.mrf.mxu0 }
 0x2bd   : > { %v719_v32 = vpop.f32.mrf.mxu1 }
 0x2be   : > { %v720_v33 = vadd.f32 %v719_v32, %v694_v31 }
 0x2c0   : > { %724 = vst.msk [vmem:[%s371_s17] sm:$0x1] %vm723_vm7, %v720_v33 }
 0x2c5   : > { %v721_v34 = vpop.f32.mrf.mxu1 }
 0x2c6 PF: > { %s22_s15 = sadd.s32 1, %s945_s15  }
 0x2c7   : > { %p19_p4 = scmp.ge.s32.totalorder %s22_s15, 4  }
 0x2c9   :  { %21 = sbr.rel (!%p19_p4) target bundleno = 3 (0x3), region = 93 }

</bundles_post_ra>
